<compile_context>
chip_gen: v7x
topology: tpu7x:2x2x1
jax: 0.10.0
libtpu: 0.0.40
codegen_flags: <defaults>
</compile_context>

<pallas_src>
import math
import functools

import jax
import jax.numpy as jnp
from jax import lax
from jax.experimental import pallas as pl
from jax.experimental.pallas import tpu as pltpu

NEG_INF = -1e30
VOCAB_PAD = 128   # lane-dense width for the output projection / softmax


# ------------------------------ kernel helpers ------------------------------

def _dot(a, b):
    return jnp.dot(a, b, preferred_element_type=jnp.float32)


def _layernorm(x, g, b, eps=1e-5):
    mu = jnp.mean(x, axis=-1, keepdims=True)
    xc = x - mu
    var = jnp.mean(xc * xc, axis=-1, keepdims=True)
    return xc * lax.rsqrt(var + eps) * g + b


def _mha_core(q, k, v, out_w_ref, out_b_ref, nheads, mask):
    """Multi-head attention on (seq, emb) slabs.  The 1/sqrt(head_dim) scale
    is already folded into the Q projection.  Heads are unrolled and each
    head's output is folded directly into the output projection (no concat,
    no (H, S, d) transposes)."""
    Sq, E = q.shape
    d = E // nheads
    y = jnp.zeros((Sq, E), jnp.float32)
    for h in range(nheads):
        lo, hi = h * d, (h + 1) * d
        qh, kh, vh = q[:, lo:hi], k[:, lo:hi], v[:, lo:hi]
        s = lax.dot_general(qh, kh, (((1,), (1,)), ((), ())),
                            preferred_element_type=jnp.float32)
        if mask is not None:
            s = s + mask
        s = s - jnp.max(s, axis=-1, keepdims=True)
        e = jnp.exp(s)
        p_attn = e * pl.reciprocal(jnp.sum(e, axis=-1, keepdims=True),
                                   approx=True)
        oh = _dot(p_attn, vh)                        # (Sq, d)
        y = y + _dot(oh, out_w_ref[lo:hi, :])        # fold into out-projection
    return y + out_b_ref[...]


def _ffn(x, p):
    h = jnp.maximum(_dot(x, p['l1_w'][...]) + p['l1_b'][...], 0.0)
    return _dot(h, p['l2_w'][...]) + p['l2_b'][...]


def _enc_layer(x, p, nheads):
    E = x.shape[-1]
    qkv = _dot(x, p['qkv_w'][...]) + p['qkv_b'][...]           # fused QKV
    q, k, v = qkv[:, 0:E], qkv[:, E:2 * E], qkv[:, 2 * E:3 * E]
    a = _mha_core(q, k, v, p['ao_w'], p['ao_b'], nheads, None)
    x = _layernorm(x + a, p['n1_g'][...], p['n1_b'][...])
    x = _layernorm(x + _ffn(x, p), p['n2_g'][...], p['n2_b'][...])
    return x


def _dec_layer(x, mem, p, causal, nheads):
    E = x.shape[-1]
    # masked self-attention
    qkv = _dot(x, p['sa_qkv_w'][...]) + p['sa_qkv_b'][...]
    q, k, v = qkv[:, 0:E], qkv[:, E:2 * E], qkv[:, 2 * E:3 * E]
    a = _mha_core(q, k, v, p['sa_o_w'], p['sa_o_b'], nheads, causal)
    x = _layernorm(x + a, p['n1_g'][...], p['n1_b'][...])
    # cross-attention over encoder memory
    cw = p['ca_qkv_w'][...]
    cb = p['ca_qkv_b'][...]
    q = _dot(x, cw[:, 0:E]) + cb[:, 0:E]
    kv = _dot(mem, cw[:, E:3 * E]) + cb[:, E:3 * E]
    k, v = kv[:, 0:E], kv[:, E:2 * E]
    a = _mha_core(q, k, v, p['ca_o_w'], p['ca_o_b'], nheads, None)
    x = _layernorm(x + a, p['n2_g'][...], p['n2_b'][...])
    # feed-forward
    x = _layernorm(x + _ffn(x, p), p['n3_g'][...], p['n3_b'][...])
    return x


# ------------------------------ fused kernel --------------------------------

def _transformer_kernel(*refs, treedef, nheads):
    src_ref, tgt_ref = refs[0], refs[1]
    out_ref = refs[-1]
    p = jax.tree_util.tree_unflatten(treedef, list(refs[2:-1]))  # pytree of refs

    # ---- encoder ----
    mem = src_ref[...]
    for lp in p['enc']:
        mem = _enc_layer(mem, lp, nheads)
    mem = _layernorm(mem, p['enc_norm_g'][...], p['enc_norm_b'][...])

    # ---- decoder ----
    x = tgt_ref[...]
    T = x.shape[0]
    row = lax.broadcasted_iota(jnp.int32, (T, T), 0)
    col = lax.broadcasted_iota(jnp.int32, (T, T), 1)
    causal = jnp.where(col > row, NEG_INF, 0.0).astype(jnp.float32)
    for lp in p['dec']:
        x = _dec_layer(x, mem, lp, causal, nheads)
    x = _layernorm(x, p['dec_norm_g'][...], p['dec_norm_b'][...])

    # ---- output projection (lane-dense, pad columns biased to -inf) + softmax
    logits = _dot(x, p['out_w'][...]) + p['out_b'][...]
    logits = logits - jnp.max(logits, axis=-1, keepdims=True)
    e = jnp.exp(logits)
    # exact reciprocal here so output rows sum to 1 to tight tolerance
    out_ref[...] = e * pl.reciprocal(jnp.sum(e, axis=-1, keepdims=True))


def transformer_probs(prepared, src_emb, tgt_emb, nheads):
    flat, treedef = jax.tree_util.tree_flatten(prepared)
    T = tgt_emb.shape[0]
    vpad = prepared['out_b'].shape[-1]
    n_in = 2 + len(flat)
    vmem = pltpu.MemorySpace.VMEM
    return pl.pallas_call(
        functools.partial(_transformer_kernel, treedef=treedef, nheads=nheads),
        in_specs=[pl.BlockSpec(memory_space=vmem)] * n_in,
        out_specs=pl.BlockSpec(memory_space=vmem),
        out_shape=jax.ShapeDtypeStruct((T, vpad), jnp.float32),
    )(src_emb, tgt_emb, *flat)


# --------------------------------- wrapper ----------------------------------

@functools.partial(jax.jit, static_argnames=("nheads", "nb_tokens"))
def forward(prepared, emb_table, pe, src, tgt, *, nheads, nb_tokens):
    emb_size = emb_table.shape[1]
    scale = math.sqrt(emb_size)
    src_x = emb_table[src] * scale + pe[: src.shape[0]]
    tgt_x = emb_table[tgt] * scale + pe[: tgt.shape[0]]
    probs = transformer_probs(prepared, src_x, tgt_x, nheads)     # (T, VOCAB_PAD)
    T = tgt.shape[0]
    return probs[:, :nb_tokens].reshape(T, 1, nb_tokens)          # (T, 1, vocab)


# -------------------------------- param init --------------------------------

def positional_encoding(max_len, d_model):
    pos = jnp.arange(max_len, dtype=jnp.float32)[:, None]
    div = jnp.exp(jnp.arange(0, d_model, 2, dtype=jnp.float32)
                  * (-math.log(10000.0) / d_model))
    pe = jnp.zeros((max_len, d_model), jnp.float32)
    pe = pe.at[:, 0::2].set(jnp.sin(pos * div))
    pe = pe.at[:, 1::2].set(jnp.cos(pos * div))
    return pe                                   # (max_len, d_model), batch=1 implicit


def init_params(key, nb_tokens, emb, nlayers, hid, nheads, vpad=VOCAB_PAD):
    """Parameters directly in the kernel-friendly layout:
       * Linear weights stored (in, out); biases stored (1, out).
       * Q/K/V pre-concatenated as (E, 3E) with 1/sqrt(head_dim) folded into
         the Q columns.
       * Vocab projection padded to `vpad` lanes; pad bias = -1e30."""
    d = emb // nheads
    qscale = 1.0 / math.sqrt(d)
    keys = iter(jax.random.split(key, 512))
    w = lambda *shape: 0.05 * jax.random.normal(next(keys), shape, jnp.float32)
    z = lambda *shape: jnp.zeros(shape, jnp.float32)
    one = lambda *shape: jnp.ones(shape, jnp.float32)

    def ffn_norms(nnorms):
        p = {'l1_w': w(emb, hid), 'l1_b': z(1, hid),
             'l2_w': w(hid, emb), 'l2_b': z(1, emb)}
        for i in range(1, nnorms + 1):
            p[f"n{i}_g"] = one(1, emb)
            p[f"n{i}_b"] = z(1, emb)
        return p

    def enc_layer():
        p = {'qkv_w': w(emb, 3 * emb).at[:, :emb].multiply(qscale),
             'qkv_b': z(1, 3 * emb),
             'ao_w': w(emb, emb), 'ao_b': z(1, emb)}
        p.update(ffn_norms(2))
        return p

    def dec_layer():
        p = {'sa_qkv_w': w(emb, 3 * emb).at[:, :emb].multiply(qscale),
             'sa_qkv_b': z(1, 3 * emb),
             'sa_o_w': w(emb, emb), 'sa_o_b': z(1, emb),
             'ca_qkv_w': w(emb, 3 * emb).at[:, :emb].multiply(qscale),
             'ca_qkv_b': z(1, 3 * emb),
             'ca_o_w': w(emb, emb), 'ca_o_b': z(1, emb)}
        p.update(ffn_norms(3))
        return p

    out_w = jnp.zeros((emb, vpad), jnp.float32).at[:, :nb_tokens].set(
        w(emb, nb_tokens))
    out_b = jnp.full((1, vpad), NEG_INF, jnp.float32).at[:, :nb_tokens].set(0.0)

    prepared = {
        'enc': [enc_layer() for _ in range(nlayers)],
        'enc_norm_g': one(1, emb), 'enc_norm_b': z(1, emb),
        'dec': [dec_layer() for _ in range(nlayers)],
        'dec_norm_g': one(1, emb), 'dec_norm_b': z(1, emb),
        'out_w': out_w, 'out_b': out_b,
    }
    emb_table = w(nb_tokens, emb)
    return emb_table, prepared


# ----------------------------------- main ------------------------------------

if __name__ == "__main__":
    nb_tokens, emb_size, nb_heads, nb_layers, hid_size, max_len = 16, 32, 4, 2, 64, 30

    key = jax.random.PRNGKey(0)
    kp, ks, kt = jax.random.split(key, 3)
    emb_table, prepared = init_params(kp, nb_tokens, emb_size, nb_layers,
                                      hid_size, nb_heads)
    pe = positional_encoding(max_len, emb_size)

    src = jax.random.randint(ks, (10,), 0, nb_tokens, dtype=jnp.int32)
    tgt = jax.random.randint(kt, (8,), 0, nb_tokens, dtype=jnp.int32)

    out = forward(prepared, emb_table, pe, src, tgt,
                  nheads=nb_heads, nb_tokens=nb_tokens)   # (8, 1, 16)
    out = jax.block_until_ready(out)

    assert out.shape == (tgt.shape[0], 1, nb_tokens)
    assert bool(jnp.all(jnp.isfinite(out)))
    # rows of the eval-mode softmax output must sum to 1
    assert bool(jnp.allclose(jnp.sum(out, axis=-1), 1.0, atol=1e-4))
    print("KERNEL_OK")
</pallas_src>

<mosaic_0001>
module attributes {stable_mosaic.version = 11 : i64} {
  func.func @_transformer_kernel(%arg0: memref<10x32xf32, #tpu.memory_space<vmem>>, %arg1: memref<8x32xf32, #tpu.memory_space<vmem>>, %arg2: memref<1x32xf32, #tpu.memory_space<vmem>>, %arg3: memref<32x32xf32, #tpu.memory_space<vmem>>, %arg4: memref<1x96xf32, #tpu.memory_space<vmem>>, %arg5: memref<32x96xf32, #tpu.memory_space<vmem>>, %arg6: memref<1x64xf32, #tpu.memory_space<vmem>>, %arg7: memref<32x64xf32, #tpu.memory_space<vmem>>, %arg8: memref<1x32xf32, #tpu.memory_space<vmem>>, %arg9: memref<64x32xf32, #tpu.memory_space<vmem>>, %arg10: memref<1x32xf32, #tpu.memory_space<vmem>>, %arg11: memref<1x32xf32, #tpu.memory_space<vmem>>, %arg12: memref<1x32xf32, #tpu.memory_space<vmem>>, %arg13: memref<1x32xf32, #tpu.memory_space<vmem>>, %arg14: memref<1x32xf32, #tpu.memory_space<vmem>>, %arg15: memref<1x32xf32, #tpu.memory_space<vmem>>, %arg16: memref<1x32xf32, #tpu.memory_space<vmem>>, %arg17: memref<32x32xf32, #tpu.memory_space<vmem>>, %arg18: memref<1x96xf32, #tpu.memory_space<vmem>>, %arg19: memref<32x96xf32, #tpu.memory_space<vmem>>, %arg20: memref<1x32xf32, #tpu.memory_space<vmem>>, %arg21: memref<32x32xf32, #tpu.memory_space<vmem>>, %arg22: memref<1x96xf32, #tpu.memory_space<vmem>>, %arg23: memref<32x96xf32, #tpu.memory_space<vmem>>, %arg24: memref<1x64xf32, #tpu.memory_space<vmem>>, %arg25: memref<32x64xf32, #tpu.memory_space<vmem>>, %arg26: memref<1x32xf32, #tpu.memory_space<vmem>>, %arg27: memref<64x32xf32, #tpu.memory_space<vmem>>, %arg28: memref<1x32xf32, #tpu.memory_space<vmem>>, %arg29: memref<1x32xf32, #tpu.memory_space<vmem>>, %arg30: memref<1x32xf32, #tpu.memory_space<vmem>>, %arg31: memref<1x32xf32, #tpu.memory_space<vmem>>, %arg32: memref<1x32xf32, #tpu.memory_space<vmem>>, %arg33: memref<1x32xf32, #tpu.memory_space<vmem>>, %arg34: memref<1x32xf32, #tpu.memory_space<vmem>>, %arg35: memref<32x32xf32, #tpu.memory_space<vmem>>, %arg36: memref<1x96xf32, #tpu.memory_space<vmem>>, %arg37: memref<32x96xf32, #tpu.memory_space<vmem>>, %arg38: memref<1x32xf32, #tpu.memory_space<vmem>>, %arg39: memref<1x32xf32, #tpu.memory_space<vmem>>, %arg40: memref<1x32xf32, #tpu.memory_space<vmem>>, %arg41: memref<32x32xf32, #tpu.memory_space<vmem>>, %arg42: memref<1x64xf32, #tpu.memory_space<vmem>>, %arg43: memref<32x64xf32, #tpu.memory_space<vmem>>, %arg44: memref<1x32xf32, #tpu.memory_space<vmem>>, %arg45: memref<64x32xf32, #tpu.memory_space<vmem>>, %arg46: memref<1x32xf32, #tpu.memory_space<vmem>>, %arg47: memref<1x32xf32, #tpu.memory_space<vmem>>, %arg48: memref<1x32xf32, #tpu.memory_space<vmem>>, %arg49: memref<1x32xf32, #tpu.memory_space<vmem>>, %arg50: memref<1x96xf32, #tpu.memory_space<vmem>>, %arg51: memref<32x96xf32, #tpu.memory_space<vmem>>, %arg52: memref<1x32xf32, #tpu.memory_space<vmem>>, %arg53: memref<32x32xf32, #tpu.memory_space<vmem>>, %arg54: memref<1x64xf32, #tpu.memory_space<vmem>>, %arg55: memref<32x64xf32, #tpu.memory_space<vmem>>, %arg56: memref<1x32xf32, #tpu.memory_space<vmem>>, %arg57: memref<64x32xf32, #tpu.memory_space<vmem>>, %arg58: memref<1x32xf32, #tpu.memory_space<vmem>>, %arg59: memref<1x32xf32, #tpu.memory_space<vmem>>, %arg60: memref<1x32xf32, #tpu.memory_space<vmem>>, %arg61: memref<1x32xf32, #tpu.memory_space<vmem>>, %arg62: memref<1x96xf32, #tpu.memory_space<vmem>>, %arg63: memref<32x96xf32, #tpu.memory_space<vmem>>, %arg64: memref<1x32xf32, #tpu.memory_space<vmem>>, %arg65: memref<1x32xf32, #tpu.memory_space<vmem>>, %arg66: memref<1x128xf32, #tpu.memory_space<vmem>>, %arg67: memref<32x128xf32, #tpu.memory_space<vmem>>, %arg68: memref<8x128xf32, #tpu.memory_space<vmem>>) attributes {dimension_semantics = [], scalar_prefetch = 0 : i64, scratch_operands = 0 : i64, tpu.core_type = #tpu.core_type<tc>} {
    %c0 = arith.constant 0 : index
    %c0_0 = arith.constant 0 : index
    %0 = vector.load %arg0[%c0, %c0_0] : memref<10x32xf32, #tpu.memory_space<vmem>>, vector<10x32xf32>
    %c0_1 = arith.constant 0 : index
    %c0_2 = arith.constant 0 : index
    %1 = vector.load %arg51[%c0_1, %c0_2] : memref<32x96xf32, #tpu.memory_space<vmem>>, vector<32x96xf32>
    %cst = arith.constant dense<0.000000e+00> : vector<10x96xf32>
    %2 = tpu.matmul %0, %1, %cst {dimension_numbers = #tpu.dot_dimension_numbers<[1], [0], [0], [1], [0, 0, 1, 1], [], []>} : vector<10x32xf32>, vector<32x96xf32>, vector<10x96xf32> -> vector<10x96xf32>
    %c0_3 = arith.constant 0 : index
    %c0_4 = arith.constant 0 : index
    %3 = vector.load %arg50[%c0_3, %c0_4] : memref<1x96xf32, #tpu.memory_space<vmem>>, vector<1x96xf32>
    %4 = vector.broadcast %3 : vector<1x96xf32> to vector<10x96xf32>
    %5 = arith.addf %2, %4 : vector<10x96xf32>
    %6 = vector.extract_strided_slice %5 {offsets = [0, 0], sizes = [10, 32], strides = [1, 1]} : vector<10x96xf32> to vector<10x32xf32>
    %7 = vector.extract_strided_slice %5 {offsets = [0, 32], sizes = [10, 32], strides = [1, 1]} : vector<10x96xf32> to vector<10x32xf32>
    %8 = vector.extract_strided_slice %5 {offsets = [0, 64], sizes = [10, 32], strides = [1, 1]} : vector<10x96xf32> to vector<10x32xf32>
    %cst_5 = arith.constant 0.000000e+00 : f32
    %9 = vector.broadcast %cst_5 : f32 to vector<10x32xf32>
    %10 = vector.extract_strided_slice %6 {offsets = [0, 0], sizes = [10, 8], strides = [1, 1]} : vector<10x32xf32> to vector<10x8xf32>
    %11 = vector.extract_strided_slice %7 {offsets = [0, 0], sizes = [10, 8], strides = [1, 1]} : vector<10x32xf32> to vector<10x8xf32>
    %12 = vector.extract_strided_slice %8 {offsets = [0, 0], sizes = [10, 8], strides = [1, 1]} : vector<10x32xf32> to vector<10x8xf32>
    %cst_6 = arith.constant dense<0.000000e+00> : vector<10x10xf32>
    %13 = tpu.matmul %10, %11, %cst_6 {dimension_numbers = #tpu.dot_dimension_numbers<[1], [1], [0], [0], [0, 0, 1, 0], [], []>} : vector<10x8xf32>, vector<10x8xf32>, vector<10x10xf32> -> vector<10x10xf32>
    %cst_7 = arith.constant dense<0xFF800000> : vector<10xf32>
    %14 = vector.multi_reduction <maximumf>, %13, %cst_7 [1] : vector<10x10xf32> to vector<10xf32>
    %15 = vector.shape_cast %14 : vector<10xf32> to vector<10x1xf32>
    %16 = vector.broadcast %15 : vector<10x1xf32> to vector<10x10xf32>
    %17 = arith.subf %13, %16 : vector<10x10xf32>
    %18 = math.exp %17 : vector<10x10xf32>
    %cst_8 = arith.constant dense<0.000000e+00> : vector<10xf32>
    %19 = vector.multi_reduction <add>, %18, %cst_8 [1] : vector<10x10xf32> to vector<10xf32>
    %20 = vector.shape_cast %19 : vector<10xf32> to vector<10x1xf32>
    %21 = tpu.reciprocal %20 {approx = true} : vector<10x1xf32> -> vector<10x1xf32>
    %22 = vector.broadcast %21 : vector<10x1xf32> to vector<10x10xf32>
    %23 = arith.mulf %18, %22 : vector<10x10xf32>
    %cst_9 = arith.constant dense<0.000000e+00> : vector<10x8xf32>
    %24 = tpu.matmul %23, %12, %cst_9 {dimension_numbers = #tpu.dot_dimension_numbers<[1], [0], [0], [1], [0, 0, 1, 1], [], []>} : vector<10x10xf32>, vector<10x8xf32>, vector<10x8xf32> -> vector<10x8xf32>
    %c0_10 = arith.constant 0 : index
    %c0_11 = arith.constant 0 : index
    %25 = vector.load %arg41[%c0_10, %c0_11] : memref<32x32xf32, #tpu.memory_space<vmem>>, vector<8x32xf32>
    %cst_12 = arith.constant dense<0.000000e+00> : vector<10x32xf32>
    %26 = tpu.matmul %24, %25, %cst_12 {dimension_numbers = #tpu.dot_dimension_numbers<[1], [0], [0], [1], [0, 0, 1, 1], [], []>} : vector<10x8xf32>, vector<8x32xf32>, vector<10x32xf32> -> vector<10x32xf32>
    %27 = arith.addf %9, %26 : vector<10x32xf32>
    %28 = vector.extract_strided_slice %6 {offsets = [0, 8], sizes = [10, 8], strides = [1, 1]} : vector<10x32xf32> to vector<10x8xf32>
    %29 = vector.extract_strided_slice %7 {offsets = [0, 8], sizes = [10, 8], strides = [1, 1]} : vector<10x32xf32> to vector<10x8xf32>
    %30 = vector.extract_strided_slice %8 {offsets = [0, 8], sizes = [10, 8], strides = [1, 1]} : vector<10x32xf32> to vector<10x8xf32>
    %cst_13 = arith.constant dense<0.000000e+00> : vector<10x10xf32>
    %31 = tpu.matmul %28, %29, %cst_13 {dimension_numbers = #tpu.dot_dimension_numbers<[1], [1], [0], [0], [0, 0, 1, 0], [], []>} : vector<10x8xf32>, vector<10x8xf32>, vector<10x10xf32> -> vector<10x10xf32>
    %cst_14 = arith.constant dense<0xFF800000> : vector<10xf32>
    %32 = vector.multi_reduction <maximumf>, %31, %cst_14 [1] : vector<10x10xf32> to vector<10xf32>
    %33 = vector.shape_cast %32 : vector<10xf32> to vector<10x1xf32>
    %34 = vector.broadcast %33 : vector<10x1xf32> to vector<10x10xf32>
    %35 = arith.subf %31, %34 : vector<10x10xf32>
    %36 = math.exp %35 : vector<10x10xf32>
    %cst_15 = arith.constant dense<0.000000e+00> : vector<10xf32>
    %37 = vector.multi_reduction <add>, %36, %cst_15 [1] : vector<10x10xf32> to vector<10xf32>
    %38 = vector.shape_cast %37 : vector<10xf32> to vector<10x1xf32>
    %39 = tpu.reciprocal %38 {approx = true} : vector<10x1xf32> -> vector<10x1xf32>
    %40 = vector.broadcast %39 : vector<10x1xf32> to vector<10x10xf32>
    %41 = arith.mulf %36, %40 : vector<10x10xf32>
    %cst_16 = arith.constant dense<0.000000e+00> : vector<10x8xf32>
    %42 = tpu.matmul %41, %30, %cst_16 {dimension_numbers = #tpu.dot_dimension_numbers<[1], [0], [0], [1], [0, 0, 1, 1], [], []>} : vector<10x10xf32>, vector<10x8xf32>, vector<10x8xf32> -> vector<10x8xf32>
    %c8 = arith.constant 8 : index
    %c0_17 = arith.constant 0 : index
    %43 = vector.load %arg41[%c8, %c0_17] : memref<32x32xf32, #tpu.memory_space<vmem>>, vector<8x32xf32>
    %cst_18 = arith.constant dense<0.000000e+00> : vector<10x32xf32>
    %44 = tpu.matmul %42, %43, %cst_18 {dimension_numbers = #tpu.dot_dimension_numbers<[1], [0], [0], [1], [0, 0, 1, 1], [], []>} : vector<10x8xf32>, vector<8x32xf32>, vector<10x32xf32> -> vector<10x32xf32>
    %45 = arith.addf %27, %44 : vector<10x32xf32>
    %46 = vector.extract_strided_slice %6 {offsets = [0, 16], sizes = [10, 8], strides = [1, 1]} : vector<10x32xf32> to vector<10x8xf32>
    %47 = vector.extract_strided_slice %7 {offsets = [0, 16], sizes = [10, 8], strides = [1, 1]} : vector<10x32xf32> to vector<10x8xf32>
    %48 = vector.extract_strided_slice %8 {offsets = [0, 16], sizes = [10, 8], strides = [1, 1]} : vector<10x32xf32> to vector<10x8xf32>
    %cst_19 = arith.constant dense<0.000000e+00> : vector<10x10xf32>
    %49 = tpu.matmul %46, %47, %cst_19 {dimension_numbers = #tpu.dot_dimension_numbers<[1], [1], [0], [0], [0, 0, 1, 0], [], []>} : vector<10x8xf32>, vector<10x8xf32>, vector<10x10xf32> -> vector<10x10xf32>
    %cst_20 = arith.constant dense<0xFF800000> : vector<10xf32>
    %50 = vector.multi_reduction <maximumf>, %49, %cst_20 [1] : vector<10x10xf32> to vector<10xf32>
    %51 = vector.shape_cast %50 : vector<10xf32> to vector<10x1xf32>
    %52 = vector.broadcast %51 : vector<10x1xf32> to vector<10x10xf32>
    %53 = arith.subf %49, %52 : vector<10x10xf32>
    %54 = math.exp %53 : vector<10x10xf32>
    %cst_21 = arith.constant dense<0.000000e+00> : vector<10xf32>
    %55 = vector.multi_reduction <add>, %54, %cst_21 [1] : vector<10x10xf32> to vector<10xf32>
    %56 = vector.shape_cast %55 : vector<10xf32> to vector<10x1xf32>
    %57 = tpu.reciprocal %56 {approx = true} : vector<10x1xf32> -> vector<10x1xf32>
    %58 = vector.broadcast %57 : vector<10x1xf32> to vector<10x10xf32>
    %59 = arith.mulf %54, %58 : vector<10x10xf32>
    %cst_22 = arith.constant dense<0.000000e+00> : vector<10x8xf32>
    %60 = tpu.matmul %59, %48, %cst_22 {dimension_numbers = #tpu.dot_dimension_numbers<[1], [0], [0], [1], [0, 0, 1, 1], [], []>} : vector<10x10xf32>, vector<10x8xf32>, vector<10x8xf32> -> vector<10x8xf32>
    %c16 = arith.constant 16 : index
    %c0_23 = arith.constant 0 : index
    %61 = vector.load %arg41[%c16, %c0_23] : memref<32x32xf32, #tpu.memory_space<vmem>>, vector<8x32xf32>
    %cst_24 = arith.constant dense<0.000000e+00> : vector<10x32xf32>
    %62 = tpu.matmul %60, %61, %cst_24 {dimension_numbers = #tpu.dot_dimension_numbers<[1], [0], [0], [1], [0, 0, 1, 1], [], []>} : vector<10x8xf32>, vector<8x32xf32>, vector<10x32xf32> -> vector<10x32xf32>
    %63 = arith.addf %45, %62 : vector<10x32xf32>
    %64 = vector.extract_strided_slice %6 {offsets = [0, 24], sizes = [10, 8], strides = [1, 1]} : vector<10x32xf32> to vector<10x8xf32>
    %65 = vector.extract_strided_slice %7 {offsets = [0, 24], sizes = [10, 8], strides = [1, 1]} : vector<10x32xf32> to vector<10x8xf32>
    %66 = vector.extract_strided_slice %8 {offsets = [0, 24], sizes = [10, 8], strides = [1, 1]} : vector<10x32xf32> to vector<10x8xf32>
    %cst_25 = arith.constant dense<0.000000e+00> : vector<10x10xf32>
    %67 = tpu.matmul %64, %65, %cst_25 {dimension_numbers = #tpu.dot_dimension_numbers<[1], [1], [0], [0], [0, 0, 1, 0], [], []>} : vector<10x8xf32>, vector<10x8xf32>, vector<10x10xf32> -> vector<10x10xf32>
    %cst_26 = arith.constant dense<0xFF800000> : vector<10xf32>
    %68 = vector.multi_reduction <maximumf>, %67, %cst_26 [1] : vector<10x10xf32> to vector<10xf32>
    %69 = vector.shape_cast %68 : vector<10xf32> to vector<10x1xf32>
    %70 = vector.broadcast %69 : vector<10x1xf32> to vector<10x10xf32>
    %71 = arith.subf %67, %70 : vector<10x10xf32>
    %72 = math.exp %71 : vector<10x10xf32>
    %cst_27 = arith.constant dense<0.000000e+00> : vector<10xf32>
    %73 = vector.multi_reduction <add>, %72, %cst_27 [1] : vector<10x10xf32> to vector<10xf32>
    %74 = vector.shape_cast %73 : vector<10xf32> to vector<10x1xf32>
    %75 = tpu.reciprocal %74 {approx = true} : vector<10x1xf32> -> vector<10x1xf32>
    %76 = vector.broadcast %75 : vector<10x1xf32> to vector<10x10xf32>
    %77 = arith.mulf %72, %76 : vector<10x10xf32>
    %cst_28 = arith.constant dense<0.000000e+00> : vector<10x8xf32>
    %78 = tpu.matmul %77, %66, %cst_28 {dimension_numbers = #tpu.dot_dimension_numbers<[1], [0], [0], [1], [0, 0, 1, 1], [], []>} : vector<10x10xf32>, vector<10x8xf32>, vector<10x8xf32> -> vector<10x8xf32>
    %c24 = arith.constant 24 : index
    %c0_29 = arith.constant 0 : index
    %79 = vector.load %arg41[%c24, %c0_29] : memref<32x32xf32, #tpu.memory_space<vmem>>, vector<8x32xf32>
    %cst_30 = arith.constant dense<0.000000e+00> : vector<10x32xf32>
    %80 = tpu.matmul %78, %79, %cst_30 {dimension_numbers = #tpu.dot_dimension_numbers<[1], [0], [0], [1], [0, 0, 1, 1], [], []>} : vector<10x8xf32>, vector<8x32xf32>, vector<10x32xf32> -> vector<10x32xf32>
    %81 = arith.addf %63, %80 : vector<10x32xf32>
    %c0_31 = arith.constant 0 : index
    %c0_32 = arith.constant 0 : index
    %82 = vector.load %arg40[%c0_31, %c0_32] : memref<1x32xf32, #tpu.memory_space<vmem>>, vector<1x32xf32>
    %83 = vector.broadcast %82 : vector<1x32xf32> to vector<10x32xf32>
    %84 = arith.addf %81, %83 : vector<10x32xf32>
    %85 = arith.addf %0, %84 : vector<10x32xf32>
    %c0_33 = arith.constant 0 : index
    %c0_34 = arith.constant 0 : index
    %86 = vector.load %arg47[%c0_33, %c0_34] : memref<1x32xf32, #tpu.memory_space<vmem>>, vector<1x32xf32>
    %c0_35 = arith.constant 0 : index
    %c0_36 = arith.constant 0 : index
    %87 = vector.load %arg46[%c0_35, %c0_36] : memref<1x32xf32, #tpu.memory_space<vmem>>, vector<1x32xf32>
    %cst_37 = arith.constant dense<0.000000e+00> : vector<10xf32>
    %88 = vector.multi_reduction <add>, %85, %cst_37 [1] : vector<10x32xf32> to vector<10xf32>
    %89 = vector.shape_cast %88 : vector<10xf32> to vector<10x1xf32>
    %cst_38 = arith.constant 3.200000e+01 : f32
    %90 = vector.broadcast %cst_38 : f32 to vector<10x1xf32>
    %91 = arith.divf %89, %90 : vector<10x1xf32>
    %92 = vector.broadcast %91 : vector<10x1xf32> to vector<10x32xf32>
    %93 = arith.subf %85, %92 : vector<10x32xf32>
    %94 = arith.mulf %93, %93 : vector<10x32xf32>
    %cst_39 = arith.constant dense<0.000000e+00> : vector<10xf32>
    %95 = vector.multi_reduction <add>, %94, %cst_39 [1] : vector<10x32xf32> to vector<10xf32>
    %96 = vector.shape_cast %95 : vector<10xf32> to vector<10x1xf32>
    %cst_40 = arith.constant 3.200000e+01 : f32
    %97 = vector.broadcast %cst_40 : f32 to vector<10x1xf32>
    %98 = arith.divf %96, %97 : vector<10x1xf32>
    %cst_41 = arith.constant 9.99999974E-6 : f32
    %99 = vector.broadcast %cst_41 : f32 to vector<10x1xf32>
    %100 = arith.addf %98, %99 : vector<10x1xf32>
    %101 = math.rsqrt %100 : vector<10x1xf32>
    %102 = vector.broadcast %101 : vector<10x1xf32> to vector<10x32xf32>
    %103 = arith.mulf %93, %102 : vector<10x32xf32>
    %104 = vector.broadcast %86 : vector<1x32xf32> to vector<10x32xf32>
    %105 = arith.mulf %103, %104 : vector<10x32xf32>
    %106 = vector.broadcast %87 : vector<1x32xf32> to vector<10x32xf32>
    %107 = arith.addf %105, %106 : vector<10x32xf32>
    %c0_42 = arith.constant 0 : index
    %c0_43 = arith.constant 0 : index
    %108 = vector.load %arg43[%c0_42, %c0_43] : memref<32x64xf32, #tpu.memory_space<vmem>>, vector<32x64xf32>
    %cst_44 = arith.constant dense<0.000000e+00> : vector<10x64xf32>
    %109 = tpu.matmul %107, %108, %cst_44 {dimension_numbers = #tpu.dot_dimension_numbers<[1], [0], [0], [1], [0, 0, 1, 1], [], []>} : vector<10x32xf32>, vector<32x64xf32>, vector<10x64xf32> -> vector<10x64xf32>
    %c0_45 = arith.constant 0 : index
    %c0_46 = arith.constant 0 : index
    %110 = vector.load %arg42[%c0_45, %c0_46] : memref<1x64xf32, #tpu.memory_space<vmem>>, vector<1x64xf32>
    %111 = vector.broadcast %110 : vector<1x64xf32> to vector<10x64xf32>
    %112 = arith.addf %109, %111 : vector<10x64xf32>
    %cst_47 = arith.constant 0.000000e+00 : f32
    %113 = vector.broadcast %cst_47 : f32 to vector<10x64xf32>
    %114 = arith.maximumf %112, %113 : vector<10x64xf32>
    %c0_48 = arith.constant 0 : index
    %c0_49 = arith.constant 0 : index
    %115 = vector.load %arg45[%c0_48, %c0_49] : memref<64x32xf32, #tpu.memory_space<vmem>>, vector<64x32xf32>
    %cst_50 = arith.constant dense<0.000000e+00> : vector<10x32xf32>
    %116 = tpu.matmul %114, %115, %cst_50 {dimension_numbers = #tpu.dot_dimension_numbers<[1], [0], [0], [1], [0, 0, 1, 1], [], []>} : vector<10x64xf32>, vector<64x32xf32>, vector<10x32xf32> -> vector<10x32xf32>
    %c0_51 = arith.constant 0 : index
    %c0_52 = arith.constant 0 : index
    %117 = vector.load %arg44[%c0_51, %c0_52] : memref<1x32xf32, #tpu.memory_space<vmem>>, vector<1x32xf32>
    %118 = vector.broadcast %117 : vector<1x32xf32> to vector<10x32xf32>
    %119 = arith.addf %116, %118 : vector<10x32xf32>
    %120 = arith.addf %107, %119 : vector<10x32xf32>
    %c0_53 = arith.constant 0 : index
    %c0_54 = arith.constant 0 : index
    %121 = vector.load %arg49[%c0_53, %c0_54] : memref<1x32xf32, #tpu.memory_space<vmem>>, vector<1x32xf32>
    %c0_55 = arith.constant 0 : index
    %c0_56 = arith.constant 0 : index
    %122 = vector.load %arg48[%c0_55, %c0_56] : memref<1x32xf32, #tpu.memory_space<vmem>>, vector<1x32xf32>
    %cst_57 = arith.constant dense<0.000000e+00> : vector<10xf32>
    %123 = vector.multi_reduction <add>, %120, %cst_57 [1] : vector<10x32xf32> to vector<10xf32>
    %124 = vector.shape_cast %123 : vector<10xf32> to vector<10x1xf32>
    %cst_58 = arith.constant 3.200000e+01 : f32
    %125 = vector.broadcast %cst_58 : f32 to vector<10x1xf32>
    %126 = arith.divf %124, %125 : vector<10x1xf32>
    %127 = vector.broadcast %126 : vector<10x1xf32> to vector<10x32xf32>
    %128 = arith.subf %120, %127 : vector<10x32xf32>
    %129 = arith.mulf %128, %128 : vector<10x32xf32>
    %cst_59 = arith.constant dense<0.000000e+00> : vector<10xf32>
    %130 = vector.multi_reduction <add>, %129, %cst_59 [1] : vector<10x32xf32> to vector<10xf32>
    %131 = vector.shape_cast %130 : vector<10xf32> to vector<10x1xf32>
    %cst_60 = arith.constant 3.200000e+01 : f32
    %132 = vector.broadcast %cst_60 : f32 to vector<10x1xf32>
    %133 = arith.divf %131, %132 : vector<10x1xf32>
    %cst_61 = arith.constant 9.99999974E-6 : f32
    %134 = vector.broadcast %cst_61 : f32 to vector<10x1xf32>
    %135 = arith.addf %133, %134 : vector<10x1xf32>
    %136 = math.rsqrt %135 : vector<10x1xf32>
    %137 = vector.broadcast %136 : vector<10x1xf32> to vector<10x32xf32>
    %138 = arith.mulf %128, %137 : vector<10x32xf32>
    %139 = vector.broadcast %121 : vector<1x32xf32> to vector<10x32xf32>
    %140 = arith.mulf %138, %139 : vector<10x32xf32>
    %141 = vector.broadcast %122 : vector<1x32xf32> to vector<10x32xf32>
    %142 = arith.addf %140, %141 : vector<10x32xf32>
    %c0_62 = arith.constant 0 : index
    %c0_63 = arith.constant 0 : index
    %143 = vector.load %arg63[%c0_62, %c0_63] : memref<32x96xf32, #tpu.memory_space<vmem>>, vector<32x96xf32>
    %cst_64 = arith.constant dense<0.000000e+00> : vector<10x96xf32>
    %144 = tpu.matmul %142, %143, %cst_64 {dimension_numbers = #tpu.dot_dimension_numbers<[1], [0], [0], [1], [0, 0, 1, 1], [], []>} : vector<10x32xf32>, vector<32x96xf32>, vector<10x96xf32> -> vector<10x96xf32>
    %c0_65 = arith.constant 0 : index
    %c0_66 = arith.constant 0 : index
    %145 = vector.load %arg62[%c0_65, %c0_66] : memref<1x96xf32, #tpu.memory_space<vmem>>, vector<1x96xf32>
    %146 = vector.broadcast %145 : vector<1x96xf32> to vector<10x96xf32>
    %147 = arith.addf %144, %146 : vector<10x96xf32>
    %148 = vector.extract_strided_slice %147 {offsets = [0, 0], sizes = [10, 32], strides = [1, 1]} : vector<10x96xf32> to vector<10x32xf32>
    %149 = vector.extract_strided_slice %147 {offsets = [0, 32], sizes = [10, 32], strides = [1, 1]} : vector<10x96xf32> to vector<10x32xf32>
    %150 = vector.extract_strided_slice %147 {offsets = [0, 64], sizes = [10, 32], strides = [1, 1]} : vector<10x96xf32> to vector<10x32xf32>
    %cst_67 = arith.constant 0.000000e+00 : f32
    %151 = vector.broadcast %cst_67 : f32 to vector<10x32xf32>
    %152 = vector.extract_strided_slice %148 {offsets = [0, 0], sizes = [10, 8], strides = [1, 1]} : vector<10x32xf32> to vector<10x8xf32>
    %153 = vector.extract_strided_slice %149 {offsets = [0, 0], sizes = [10, 8], strides = [1, 1]} : vector<10x32xf32> to vector<10x8xf32>
    %154 = vector.extract_strided_slice %150 {offsets = [0, 0], sizes = [10, 8], strides = [1, 1]} : vector<10x32xf32> to vector<10x8xf32>
    %cst_68 = arith.constant dense<0.000000e+00> : vector<10x10xf32>
    %155 = tpu.matmul %152, %153, %cst_68 {dimension_numbers = #tpu.dot_dimension_numbers<[1], [1], [0], [0], [0, 0, 1, 0], [], []>} : vector<10x8xf32>, vector<10x8xf32>, vector<10x10xf32> -> vector<10x10xf32>
    %cst_69 = arith.constant dense<0xFF800000> : vector<10xf32>
    %156 = vector.multi_reduction <maximumf>, %155, %cst_69 [1] : vector<10x10xf32> to vector<10xf32>
    %157 = vector.shape_cast %156 : vector<10xf32> to vector<10x1xf32>
    %158 = vector.broadcast %157 : vector<10x1xf32> to vector<10x10xf32>
    %159 = arith.subf %155, %158 : vector<10x10xf32>
    %160 = math.exp %159 : vector<10x10xf32>
    %cst_70 = arith.constant dense<0.000000e+00> : vector<10xf32>
    %161 = vector.multi_reduction <add>, %160, %cst_70 [1] : vector<10x10xf32> to vector<10xf32>
    %162 = vector.shape_cast %161 : vector<10xf32> to vector<10x1xf32>
    %163 = tpu.reciprocal %162 {approx = true} : vector<10x1xf32> -> vector<10x1xf32>
    %164 = vector.broadcast %163 : vector<10x1xf32> to vector<10x10xf32>
    %165 = arith.mulf %160, %164 : vector<10x10xf32>
    %cst_71 = arith.constant dense<0.000000e+00> : vector<10x8xf32>
    %166 = tpu.matmul %165, %154, %cst_71 {dimension_numbers = #tpu.dot_dimension_numbers<[1], [0], [0], [1], [0, 0, 1, 1], [], []>} : vector<10x10xf32>, vector<10x8xf32>, vector<10x8xf32> -> vector<10x8xf32>
    %c0_72 = arith.constant 0 : index
    %c0_73 = arith.constant 0 : index
    %167 = vector.load %arg53[%c0_72, %c0_73] : memref<32x32xf32, #tpu.memory_space<vmem>>, vector<8x32xf32>
    %cst_74 = arith.constant dense<0.000000e+00> : vector<10x32xf32>
    %168 = tpu.matmul %166, %167, %cst_74 {dimension_numbers = #tpu.dot_dimension_numbers<[1], [0], [0], [1], [0, 0, 1, 1], [], []>} : vector<10x8xf32>, vector<8x32xf32>, vector<10x32xf32> -> vector<10x32xf32>
    %169 = arith.addf %151, %168 : vector<10x32xf32>
    %170 = vector.extract_strided_slice %148 {offsets = [0, 8], sizes = [10, 8], strides = [1, 1]} : vector<10x32xf32> to vector<10x8xf32>
    %171 = vector.extract_strided_slice %149 {offsets = [0, 8], sizes = [10, 8], strides = [1, 1]} : vector<10x32xf32> to vector<10x8xf32>
    %172 = vector.extract_strided_slice %150 {offsets = [0, 8], sizes = [10, 8], strides = [1, 1]} : vector<10x32xf32> to vector<10x8xf32>
    %cst_75 = arith.constant dense<0.000000e+00> : vector<10x10xf32>
    %173 = tpu.matmul %170, %171, %cst_75 {dimension_numbers = #tpu.dot_dimension_numbers<[1], [1], [0], [0], [0, 0, 1, 0], [], []>} : vector<10x8xf32>, vector<10x8xf32>, vector<10x10xf32> -> vector<10x10xf32>
    %cst_76 = arith.constant dense<0xFF800000> : vector<10xf32>
    %174 = vector.multi_reduction <maximumf>, %173, %cst_76 [1] : vector<10x10xf32> to vector<10xf32>
    %175 = vector.shape_cast %174 : vector<10xf32> to vector<10x1xf32>
    %176 = vector.broadcast %175 : vector<10x1xf32> to vector<10x10xf32>
    %177 = arith.subf %173, %176 : vector<10x10xf32>
    %178 = math.exp %177 : vector<10x10xf32>
    %cst_77 = arith.constant dense<0.000000e+00> : vector<10xf32>
    %179 = vector.multi_reduction <add>, %178, %cst_77 [1] : vector<10x10xf32> to vector<10xf32>
    %180 = vector.shape_cast %179 : vector<10xf32> to vector<10x1xf32>
    %181 = tpu.reciprocal %180 {approx = true} : vector<10x1xf32> -> vector<10x1xf32>
    %182 = vector.broadcast %181 : vector<10x1xf32> to vector<10x10xf32>
    %183 = arith.mulf %178, %182 : vector<10x10xf32>
    %cst_78 = arith.constant dense<0.000000e+00> : vector<10x8xf32>
    %184 = tpu.matmul %183, %172, %cst_78 {dimension_numbers = #tpu.dot_dimension_numbers<[1], [0], [0], [1], [0, 0, 1, 1], [], []>} : vector<10x10xf32>, vector<10x8xf32>, vector<10x8xf32> -> vector<10x8xf32>
    %c8_79 = arith.constant 8 : index
    %c0_80 = arith.constant 0 : index
    %185 = vector.load %arg53[%c8_79, %c0_80] : memref<32x32xf32, #tpu.memory_space<vmem>>, vector<8x32xf32>
    %cst_81 = arith.constant dense<0.000000e+00> : vector<10x32xf32>
    %186 = tpu.matmul %184, %185, %cst_81 {dimension_numbers = #tpu.dot_dimension_numbers<[1], [0], [0], [1], [0, 0, 1, 1], [], []>} : vector<10x8xf32>, vector<8x32xf32>, vector<10x32xf32> -> vector<10x32xf32>
    %187 = arith.addf %169, %186 : vector<10x32xf32>
    %188 = vector.extract_strided_slice %148 {offsets = [0, 16], sizes = [10, 8], strides = [1, 1]} : vector<10x32xf32> to vector<10x8xf32>
    %189 = vector.extract_strided_slice %149 {offsets = [0, 16], sizes = [10, 8], strides = [1, 1]} : vector<10x32xf32> to vector<10x8xf32>
    %190 = vector.extract_strided_slice %150 {offsets = [0, 16], sizes = [10, 8], strides = [1, 1]} : vector<10x32xf32> to vector<10x8xf32>
    %cst_82 = arith.constant dense<0.000000e+00> : vector<10x10xf32>
    %191 = tpu.matmul %188, %189, %cst_82 {dimension_numbers = #tpu.dot_dimension_numbers<[1], [1], [0], [0], [0, 0, 1, 0], [], []>} : vector<10x8xf32>, vector<10x8xf32>, vector<10x10xf32> -> vector<10x10xf32>
    %cst_83 = arith.constant dense<0xFF800000> : vector<10xf32>
    %192 = vector.multi_reduction <maximumf>, %191, %cst_83 [1] : vector<10x10xf32> to vector<10xf32>
    %193 = vector.shape_cast %192 : vector<10xf32> to vector<10x1xf32>
    %194 = vector.broadcast %193 : vector<10x1xf32> to vector<10x10xf32>
    %195 = arith.subf %191, %194 : vector<10x10xf32>
    %196 = math.exp %195 : vector<10x10xf32>
    %cst_84 = arith.constant dense<0.000000e+00> : vector<10xf32>
    %197 = vector.multi_reduction <add>, %196, %cst_84 [1] : vector<10x10xf32> to vector<10xf32>
    %198 = vector.shape_cast %197 : vector<10xf32> to vector<10x1xf32>
    %199 = tpu.reciprocal %198 {approx = true} : vector<10x1xf32> -> vector<10x1xf32>
    %200 = vector.broadcast %199 : vector<10x1xf32> to vector<10x10xf32>
    %201 = arith.mulf %196, %200 : vector<10x10xf32>
    %cst_85 = arith.constant dense<0.000000e+00> : vector<10x8xf32>
    %202 = tpu.matmul %201, %190, %cst_85 {dimension_numbers = #tpu.dot_dimension_numbers<[1], [0], [0], [1], [0, 0, 1, 1], [], []>} : vector<10x10xf32>, vector<10x8xf32>, vector<10x8xf32> -> vector<10x8xf32>
    %c16_86 = arith.constant 16 : index
    %c0_87 = arith.constant 0 : index
    %203 = vector.load %arg53[%c16_86, %c0_87] : memref<32x32xf32, #tpu.memory_space<vmem>>, vector<8x32xf32>
    %cst_88 = arith.constant dense<0.000000e+00> : vector<10x32xf32>
    %204 = tpu.matmul %202, %203, %cst_88 {dimension_numbers = #tpu.dot_dimension_numbers<[1], [0], [0], [1], [0, 0, 1, 1], [], []>} : vector<10x8xf32>, vector<8x32xf32>, vector<10x32xf32> -> vector<10x32xf32>
    %205 = arith.addf %187, %204 : vector<10x32xf32>
    %206 = vector.extract_strided_slice %148 {offsets = [0, 24], sizes = [10, 8], strides = [1, 1]} : vector<10x32xf32> to vector<10x8xf32>
    %207 = vector.extract_strided_slice %149 {offsets = [0, 24], sizes = [10, 8], strides = [1, 1]} : vector<10x32xf32> to vector<10x8xf32>
    %208 = vector.extract_strided_slice %150 {offsets = [0, 24], sizes = [10, 8], strides = [1, 1]} : vector<10x32xf32> to vector<10x8xf32>
    %cst_89 = arith.constant dense<0.000000e+00> : vector<10x10xf32>
    %209 = tpu.matmul %206, %207, %cst_89 {dimension_numbers = #tpu.dot_dimension_numbers<[1], [1], [0], [0], [0, 0, 1, 0], [], []>} : vector<10x8xf32>, vector<10x8xf32>, vector<10x10xf32> -> vector<10x10xf32>
    %cst_90 = arith.constant dense<0xFF800000> : vector<10xf32>
    %210 = vector.multi_reduction <maximumf>, %209, %cst_90 [1] : vector<10x10xf32> to vector<10xf32>
    %211 = vector.shape_cast %210 : vector<10xf32> to vector<10x1xf32>
    %212 = vector.broadcast %211 : vector<10x1xf32> to vector<10x10xf32>
    %213 = arith.subf %209, %212 : vector<10x10xf32>
    %214 = math.exp %213 : vector<10x10xf32>
    %cst_91 = arith.constant dense<0.000000e+00> : vector<10xf32>
    %215 = vector.multi_reduction <add>, %214, %cst_91 [1] : vector<10x10xf32> to vector<10xf32>
    %216 = vector.shape_cast %215 : vector<10xf32> to vector<10x1xf32>
    %217 = tpu.reciprocal %216 {approx = true} : vector<10x1xf32> -> vector<10x1xf32>
    %218 = vector.broadcast %217 : vector<10x1xf32> to vector<10x10xf32>
    %219 = arith.mulf %214, %218 : vector<10x10xf32>
    %cst_92 = arith.constant dense<0.000000e+00> : vector<10x8xf32>
    %220 = tpu.matmul %219, %208, %cst_92 {dimension_numbers = #tpu.dot_dimension_numbers<[1], [0], [0], [1], [0, 0, 1, 1], [], []>} : vector<10x10xf32>, vector<10x8xf32>, vector<10x8xf32> -> vector<10x8xf32>
    %c24_93 = arith.constant 24 : index
    %c0_94 = arith.constant 0 : index
    %221 = vector.load %arg53[%c24_93, %c0_94] : memref<32x32xf32, #tpu.memory_space<vmem>>, vector<8x32xf32>
    %cst_95 = arith.constant dense<0.000000e+00> : vector<10x32xf32>
    %222 = tpu.matmul %220, %221, %cst_95 {dimension_numbers = #tpu.dot_dimension_numbers<[1], [0], [0], [1], [0, 0, 1, 1], [], []>} : vector<10x8xf32>, vector<8x32xf32>, vector<10x32xf32> -> vector<10x32xf32>
    %223 = arith.addf %205, %222 : vector<10x32xf32>
    %c0_96 = arith.constant 0 : index
    %c0_97 = arith.constant 0 : index
    %224 = vector.load %arg52[%c0_96, %c0_97] : memref<1x32xf32, #tpu.memory_space<vmem>>, vector<1x32xf32>
    %225 = vector.broadcast %224 : vector<1x32xf32> to vector<10x32xf32>
    %226 = arith.addf %223, %225 : vector<10x32xf32>
    %227 = arith.addf %142, %226 : vector<10x32xf32>
    %c0_98 = arith.constant 0 : index
    %c0_99 = arith.constant 0 : index
    %228 = vector.load %arg59[%c0_98, %c0_99] : memref<1x32xf32, #tpu.memory_space<vmem>>, vector<1x32xf32>
    %c0_100 = arith.constant 0 : index
    %c0_101 = arith.constant 0 : index
    %229 = vector.load %arg58[%c0_100, %c0_101] : memref<1x32xf32, #tpu.memory_space<vmem>>, vector<1x32xf32>
    %cst_102 = arith.constant dense<0.000000e+00> : vector<10xf32>
    %230 = vector.multi_reduction <add>, %227, %cst_102 [1] : vector<10x32xf32> to vector<10xf32>
    %231 = vector.shape_cast %230 : vector<10xf32> to vector<10x1xf32>
    %cst_103 = arith.constant 3.200000e+01 : f32
    %232 = vector.broadcast %cst_103 : f32 to vector<10x1xf32>
    %233 = arith.divf %231, %232 : vector<10x1xf32>
    %234 = vector.broadcast %233 : vector<10x1xf32> to vector<10x32xf32>
    %235 = arith.subf %227, %234 : vector<10x32xf32>
    %236 = arith.mulf %235, %235 : vector<10x32xf32>
    %cst_104 = arith.constant dense<0.000000e+00> : vector<10xf32>
    %237 = vector.multi_reduction <add>, %236, %cst_104 [1] : vector<10x32xf32> to vector<10xf32>
    %238 = vector.shape_cast %237 : vector<10xf32> to vector<10x1xf32>
    %cst_105 = arith.constant 3.200000e+01 : f32
    %239 = vector.broadcast %cst_105 : f32 to vector<10x1xf32>
    %240 = arith.divf %238, %239 : vector<10x1xf32>
    %cst_106 = arith.constant 9.99999974E-6 : f32
    %241 = vector.broadcast %cst_106 : f32 to vector<10x1xf32>
    %242 = arith.addf %240, %241 : vector<10x1xf32>
    %243 = math.rsqrt %242 : vector<10x1xf32>
    %244 = vector.broadcast %243 : vector<10x1xf32> to vector<10x32xf32>
    %245 = arith.mulf %235, %244 : vector<10x32xf32>
    %246 = vector.broadcast %228 : vector<1x32xf32> to vector<10x32xf32>
    %247 = arith.mulf %245, %246 : vector<10x32xf32>
    %248 = vector.broadcast %229 : vector<1x32xf32> to vector<10x32xf32>
    %249 = arith.addf %247, %248 : vector<10x32xf32>
    %c0_107 = arith.constant 0 : index
    %c0_108 = arith.constant 0 : index
    %250 = vector.load %arg55[%c0_107, %c0_108] : memref<32x64xf32, #tpu.memory_space<vmem>>, vector<32x64xf32>
    %cst_109 = arith.constant dense<0.000000e+00> : vector<10x64xf32>
    %251 = tpu.matmul %249, %250, %cst_109 {dimension_numbers = #tpu.dot_dimension_numbers<[1], [0], [0], [1], [0, 0, 1, 1], [], []>} : vector<10x32xf32>, vector<32x64xf32>, vector<10x64xf32> -> vector<10x64xf32>
    %c0_110 = arith.constant 0 : index
    %c0_111 = arith.constant 0 : index
    %252 = vector.load %arg54[%c0_110, %c0_111] : memref<1x64xf32, #tpu.memory_space<vmem>>, vector<1x64xf32>
    %253 = vector.broadcast %252 : vector<1x64xf32> to vector<10x64xf32>
    %254 = arith.addf %251, %253 : vector<10x64xf32>
    %cst_112 = arith.constant 0.000000e+00 : f32
    %255 = vector.broadcast %cst_112 : f32 to vector<10x64xf32>
    %256 = arith.maximumf %254, %255 : vector<10x64xf32>
    %c0_113 = arith.constant 0 : index
    %c0_114 = arith.constant 0 : index
    %257 = vector.load %arg57[%c0_113, %c0_114] : memref<64x32xf32, #tpu.memory_space<vmem>>, vector<64x32xf32>
    %cst_115 = arith.constant dense<0.000000e+00> : vector<10x32xf32>
    %258 = tpu.matmul %256, %257, %cst_115 {dimension_numbers = #tpu.dot_dimension_numbers<[1], [0], [0], [1], [0, 0, 1, 1], [], []>} : vector<10x64xf32>, vector<64x32xf32>, vector<10x32xf32> -> vector<10x32xf32>
    %c0_116 = arith.constant 0 : index
    %c0_117 = arith.constant 0 : index
    %259 = vector.load %arg56[%c0_116, %c0_117] : memref<1x32xf32, #tpu.memory_space<vmem>>, vector<1x32xf32>
    %260 = vector.broadcast %259 : vector<1x32xf32> to vector<10x32xf32>
    %261 = arith.addf %258, %260 : vector<10x32xf32>
    %262 = arith.addf %249, %261 : vector<10x32xf32>
    %c0_118 = arith.constant 0 : index
    %c0_119 = arith.constant 0 : index
    %263 = vector.load %arg61[%c0_118, %c0_119] : memref<1x32xf32, #tpu.memory_space<vmem>>, vector<1x32xf32>
    %c0_120 = arith.constant 0 : index
    %c0_121 = arith.constant 0 : index
    %264 = vector.load %arg60[%c0_120, %c0_121] : memref<1x32xf32, #tpu.memory_space<vmem>>, vector<1x32xf32>
    %cst_122 = arith.constant dense<0.000000e+00> : vector<10xf32>
    %265 = vector.multi_reduction <add>, %262, %cst_122 [1] : vector<10x32xf32> to vector<10xf32>
    %266 = vector.shape_cast %265 : vector<10xf32> to vector<10x1xf32>
    %cst_123 = arith.constant 3.200000e+01 : f32
    %267 = vector.broadcast %cst_123 : f32 to vector<10x1xf32>
    %268 = arith.divf %266, %267 : vector<10x1xf32>
    %269 = vector.broadcast %268 : vector<10x1xf32> to vector<10x32xf32>
    %270 = arith.subf %262, %269 : vector<10x32xf32>
    %271 = arith.mulf %270, %270 : vector<10x32xf32>
    %cst_124 = arith.constant dense<0.000000e+00> : vector<10xf32>
    %272 = vector.multi_reduction <add>, %271, %cst_124 [1] : vector<10x32xf32> to vector<10xf32>
    %273 = vector.shape_cast %272 : vector<10xf32> to vector<10x1xf32>
    %cst_125 = arith.constant 3.200000e+01 : f32
    %274 = vector.broadcast %cst_125 : f32 to vector<10x1xf32>
    %275 = arith.divf %273, %274 : vector<10x1xf32>
    %cst_126 = arith.constant 9.99999974E-6 : f32
    %276 = vector.broadcast %cst_126 : f32 to vector<10x1xf32>
    %277 = arith.addf %275, %276 : vector<10x1xf32>
    %278 = math.rsqrt %277 : vector<10x1xf32>
    %279 = vector.broadcast %278 : vector<10x1xf32> to vector<10x32xf32>
    %280 = arith.mulf %270, %279 : vector<10x32xf32>
    %281 = vector.broadcast %263 : vector<1x32xf32> to vector<10x32xf32>
    %282 = arith.mulf %280, %281 : vector<10x32xf32>
    %283 = vector.broadcast %264 : vector<1x32xf32> to vector<10x32xf32>
    %284 = arith.addf %282, %283 : vector<10x32xf32>
    %c0_127 = arith.constant 0 : index
    %c0_128 = arith.constant 0 : index
    %285 = vector.load %arg65[%c0_127, %c0_128] : memref<1x32xf32, #tpu.memory_space<vmem>>, vector<1x32xf32>
    %c0_129 = arith.constant 0 : index
    %c0_130 = arith.constant 0 : index
    %286 = vector.load %arg64[%c0_129, %c0_130] : memref<1x32xf32, #tpu.memory_space<vmem>>, vector<1x32xf32>
    %cst_131 = arith.constant dense<0.000000e+00> : vector<10xf32>
    %287 = vector.multi_reduction <add>, %284, %cst_131 [1] : vector<10x32xf32> to vector<10xf32>
    %288 = vector.shape_cast %287 : vector<10xf32> to vector<10x1xf32>
    %cst_132 = arith.constant 3.200000e+01 : f32
    %289 = vector.broadcast %cst_132 : f32 to vector<10x1xf32>
    %290 = arith.divf %288, %289 : vector<10x1xf32>
    %291 = vector.broadcast %290 : vector<10x1xf32> to vector<10x32xf32>
    %292 = arith.subf %284, %291 : vector<10x32xf32>
    %293 = arith.mulf %292, %292 : vector<10x32xf32>
    %cst_133 = arith.constant dense<0.000000e+00> : vector<10xf32>
    %294 = vector.multi_reduction <add>, %293, %cst_133 [1] : vector<10x32xf32> to vector<10xf32>
    %295 = vector.shape_cast %294 : vector<10xf32> to vector<10x1xf32>
    %cst_134 = arith.constant 3.200000e+01 : f32
    %296 = vector.broadcast %cst_134 : f32 to vector<10x1xf32>
    %297 = arith.divf %295, %296 : vector<10x1xf32>
    %cst_135 = arith.constant 9.99999974E-6 : f32
    %298 = vector.broadcast %cst_135 : f32 to vector<10x1xf32>
    %299 = arith.addf %297, %298 : vector<10x1xf32>
    %300 = math.rsqrt %299 : vector<10x1xf32>
    %301 = vector.broadcast %300 : vector<10x1xf32> to vector<10x32xf32>
    %302 = arith.mulf %292, %301 : vector<10x32xf32>
    %303 = vector.broadcast %285 : vector<1x32xf32> to vector<10x32xf32>
    %304 = arith.mulf %302, %303 : vector<10x32xf32>
    %305 = vector.broadcast %286 : vector<1x32xf32> to vector<10x32xf32>
    %306 = arith.addf %304, %305 : vector<10x32xf32>
    %c0_136 = arith.constant 0 : index
    %c0_137 = arith.constant 0 : index
    %307 = vector.load %arg1[%c0_136, %c0_137] : memref<8x32xf32, #tpu.memory_space<vmem>>, vector<8x32xf32>
    %308 = tpu.iota {dimensions = array<i32: 0>} : vector<8x8xi32>
    %309 = tpu.iota {dimensions = array<i32: 1>} : vector<8x8xi32>
    %310 = arith.cmpi sgt, %309, %308 : vector<8x8xi32>
    %cst_138 = arith.constant -1.000000e+30 : f32
    %cst_139 = arith.constant 0.000000e+00 : f32
    %311 = vector.broadcast %cst_138 : f32 to vector<8x8xf32>
    %312 = vector.broadcast %cst_139 : f32 to vector<8x8xf32>
    %313 = arith.select %310, %311, %312 : vector<8x8xi1>, vector<8x8xf32>
    %c0_140 = arith.constant 0 : index
    %c0_141 = arith.constant 0 : index
    %314 = vector.load %arg19[%c0_140, %c0_141] : memref<32x96xf32, #tpu.memory_space<vmem>>, vector<32x96xf32>
    %cst_142 = arith.constant dense<0.000000e+00> : vector<8x96xf32>
    %315 = tpu.matmul %307, %314, %cst_142 {dimension_numbers = #tpu.dot_dimension_numbers<[1], [0], [0], [1], [0, 0, 1, 1], [], []>} : vector<8x32xf32>, vector<32x96xf32>, vector<8x96xf32> -> vector<8x96xf32>
    %c0_143 = arith.constant 0 : index
    %c0_144 = arith.constant 0 : index
    %316 = vector.load %arg18[%c0_143, %c0_144] : memref<1x96xf32, #tpu.memory_space<vmem>>, vector<1x96xf32>
    %317 = vector.broadcast %316 : vector<1x96xf32> to vector<8x96xf32>
    %318 = arith.addf %315, %317 : vector<8x96xf32>
    %319 = vector.extract_strided_slice %318 {offsets = [0, 0], sizes = [8, 32], strides = [1, 1]} : vector<8x96xf32> to vector<8x32xf32>
    %320 = vector.extract_strided_slice %318 {offsets = [0, 32], sizes = [8, 32], strides = [1, 1]} : vector<8x96xf32> to vector<8x32xf32>
    %321 = vector.extract_strided_slice %318 {offsets = [0, 64], sizes = [8, 32], strides = [1, 1]} : vector<8x96xf32> to vector<8x32xf32>
    %cst_145 = arith.constant 0.000000e+00 : f32
    %322 = vector.broadcast %cst_145 : f32 to vector<8x32xf32>
    %323 = vector.extract_strided_slice %319 {offsets = [0, 0], sizes = [8, 8], strides = [1, 1]} : vector<8x32xf32> to vector<8x8xf32>
    %324 = vector.extract_strided_slice %320 {offsets = [0, 0], sizes = [8, 8], strides = [1, 1]} : vector<8x32xf32> to vector<8x8xf32>
    %325 = vector.extract_strided_slice %321 {offsets = [0, 0], sizes = [8, 8], strides = [1, 1]} : vector<8x32xf32> to vector<8x8xf32>
    %cst_146 = arith.constant dense<0.000000e+00> : vector<8x8xf32>
    %326 = tpu.matmul %323, %324, %cst_146 {dimension_numbers = #tpu.dot_dimension_numbers<[1], [1], [0], [0], [0, 0, 1, 0], [], []>} : vector<8x8xf32>, vector<8x8xf32>, vector<8x8xf32> -> vector<8x8xf32>
    %327 = arith.addf %326, %313 : vector<8x8xf32>
    %cst_147 = arith.constant dense<0xFF800000> : vector<8xf32>
    %328 = vector.multi_reduction <maximumf>, %327, %cst_147 [1] : vector<8x8xf32> to vector<8xf32>
    %329 = vector.shape_cast %328 : vector<8xf32> to vector<8x1xf32>
    %330 = vector.broadcast %329 : vector<8x1xf32> to vector<8x8xf32>
    %331 = arith.subf %327, %330 : vector<8x8xf32>
    %332 = math.exp %331 : vector<8x8xf32>
    %cst_148 = arith.constant dense<0.000000e+00> : vector<8xf32>
    %333 = vector.multi_reduction <add>, %332, %cst_148 [1] : vector<8x8xf32> to vector<8xf32>
    %334 = vector.shape_cast %333 : vector<8xf32> to vector<8x1xf32>
    %335 = tpu.reciprocal %334 {approx = true} : vector<8x1xf32> -> vector<8x1xf32>
    %336 = vector.broadcast %335 : vector<8x1xf32> to vector<8x8xf32>
    %337 = arith.mulf %332, %336 : vector<8x8xf32>
    %cst_149 = arith.constant dense<0.000000e+00> : vector<8x8xf32>
    %338 = tpu.matmul %337, %325, %cst_149 {dimension_numbers = #tpu.dot_dimension_numbers<[1], [0], [0], [1], [0, 0, 1, 1], [], []>} : vector<8x8xf32>, vector<8x8xf32>, vector<8x8xf32> -> vector<8x8xf32>
    %c0_150 = arith.constant 0 : index
    %c0_151 = arith.constant 0 : index
    %339 = vector.load %arg17[%c0_150, %c0_151] : memref<32x32xf32, #tpu.memory_space<vmem>>, vector<8x32xf32>
    %cst_152 = arith.constant dense<0.000000e+00> : vector<8x32xf32>
    %340 = tpu.matmul %338, %339, %cst_152 {dimension_numbers = #tpu.dot_dimension_numbers<[1], [0], [0], [1], [0, 0, 1, 1], [], []>} : vector<8x8xf32>, vector<8x32xf32>, vector<8x32xf32> -> vector<8x32xf32>
    %341 = arith.addf %322, %340 : vector<8x32xf32>
    %342 = vector.extract_strided_slice %319 {offsets = [0, 8], sizes = [8, 8], strides = [1, 1]} : vector<8x32xf32> to vector<8x8xf32>
    %343 = vector.extract_strided_slice %320 {offsets = [0, 8], sizes = [8, 8], strides = [1, 1]} : vector<8x32xf32> to vector<8x8xf32>
    %344 = vector.extract_strided_slice %321 {offsets = [0, 8], sizes = [8, 8], strides = [1, 1]} : vector<8x32xf32> to vector<8x8xf32>
    %cst_153 = arith.constant dense<0.000000e+00> : vector<8x8xf32>
    %345 = tpu.matmul %342, %343, %cst_153 {dimension_numbers = #tpu.dot_dimension_numbers<[1], [1], [0], [0], [0, 0, 1, 0], [], []>} : vector<8x8xf32>, vector<8x8xf32>, vector<8x8xf32> -> vector<8x8xf32>
    %346 = arith.addf %345, %313 : vector<8x8xf32>
    %cst_154 = arith.constant dense<0xFF800000> : vector<8xf32>
    %347 = vector.multi_reduction <maximumf>, %346, %cst_154 [1] : vector<8x8xf32> to vector<8xf32>
    %348 = vector.shape_cast %347 : vector<8xf32> to vector<8x1xf32>
    %349 = vector.broadcast %348 : vector<8x1xf32> to vector<8x8xf32>
    %350 = arith.subf %346, %349 : vector<8x8xf32>
    %351 = math.exp %350 : vector<8x8xf32>
    %cst_155 = arith.constant dense<0.000000e+00> : vector<8xf32>
    %352 = vector.multi_reduction <add>, %351, %cst_155 [1] : vector<8x8xf32> to vector<8xf32>
    %353 = vector.shape_cast %352 : vector<8xf32> to vector<8x1xf32>
    %354 = tpu.reciprocal %353 {approx = true} : vector<8x1xf32> -> vector<8x1xf32>
    %355 = vector.broadcast %354 : vector<8x1xf32> to vector<8x8xf32>
    %356 = arith.mulf %351, %355 : vector<8x8xf32>
    %cst_156 = arith.constant dense<0.000000e+00> : vector<8x8xf32>
    %357 = tpu.matmul %356, %344, %cst_156 {dimension_numbers = #tpu.dot_dimension_numbers<[1], [0], [0], [1], [0, 0, 1, 1], [], []>} : vector<8x8xf32>, vector<8x8xf32>, vector<8x8xf32> -> vector<8x8xf32>
    %c8_157 = arith.constant 8 : index
    %c0_158 = arith.constant 0 : index
    %358 = vector.load %arg17[%c8_157, %c0_158] : memref<32x32xf32, #tpu.memory_space<vmem>>, vector<8x32xf32>
    %cst_159 = arith.constant dense<0.000000e+00> : vector<8x32xf32>
    %359 = tpu.matmul %357, %358, %cst_159 {dimension_numbers = #tpu.dot_dimension_numbers<[1], [0], [0], [1], [0, 0, 1, 1], [], []>} : vector<8x8xf32>, vector<8x32xf32>, vector<8x32xf32> -> vector<8x32xf32>
    %360 = arith.addf %341, %359 : vector<8x32xf32>
    %361 = vector.extract_strided_slice %319 {offsets = [0, 16], sizes = [8, 8], strides = [1, 1]} : vector<8x32xf32> to vector<8x8xf32>
    %362 = vector.extract_strided_slice %320 {offsets = [0, 16], sizes = [8, 8], strides = [1, 1]} : vector<8x32xf32> to vector<8x8xf32>
    %363 = vector.extract_strided_slice %321 {offsets = [0, 16], sizes = [8, 8], strides = [1, 1]} : vector<8x32xf32> to vector<8x8xf32>
    %cst_160 = arith.constant dense<0.000000e+00> : vector<8x8xf32>
    %364 = tpu.matmul %361, %362, %cst_160 {dimension_numbers = #tpu.dot_dimension_numbers<[1], [1], [0], [0], [0, 0, 1, 0], [], []>} : vector<8x8xf32>, vector<8x8xf32>, vector<8x8xf32> -> vector<8x8xf32>
    %365 = arith.addf %364, %313 : vector<8x8xf32>
    %cst_161 = arith.constant dense<0xFF800000> : vector<8xf32>
    %366 = vector.multi_reduction <maximumf>, %365, %cst_161 [1] : vector<8x8xf32> to vector<8xf32>
    %367 = vector.shape_cast %366 : vector<8xf32> to vector<8x1xf32>
    %368 = vector.broadcast %367 : vector<8x1xf32> to vector<8x8xf32>
    %369 = arith.subf %365, %368 : vector<8x8xf32>
    %370 = math.exp %369 : vector<8x8xf32>
    %cst_162 = arith.constant dense<0.000000e+00> : vector<8xf32>
    %371 = vector.multi_reduction <add>, %370, %cst_162 [1] : vector<8x8xf32> to vector<8xf32>
    %372 = vector.shape_cast %371 : vector<8xf32> to vector<8x1xf32>
    %373 = tpu.reciprocal %372 {approx = true} : vector<8x1xf32> -> vector<8x1xf32>
    %374 = vector.broadcast %373 : vector<8x1xf32> to vector<8x8xf32>
    %375 = arith.mulf %370, %374 : vector<8x8xf32>
    %cst_163 = arith.constant dense<0.000000e+00> : vector<8x8xf32>
    %376 = tpu.matmul %375, %363, %cst_163 {dimension_numbers = #tpu.dot_dimension_numbers<[1], [0], [0], [1], [0, 0, 1, 1], [], []>} : vector<8x8xf32>, vector<8x8xf32>, vector<8x8xf32> -> vector<8x8xf32>
    %c16_164 = arith.constant 16 : index
    %c0_165 = arith.constant 0 : index
    %377 = vector.load %arg17[%c16_164, %c0_165] : memref<32x32xf32, #tpu.memory_space<vmem>>, vector<8x32xf32>
    %cst_166 = arith.constant dense<0.000000e+00> : vector<8x32xf32>
    %378 = tpu.matmul %376, %377, %cst_166 {dimension_numbers = #tpu.dot_dimension_numbers<[1], [0], [0], [1], [0, 0, 1, 1], [], []>} : vector<8x8xf32>, vector<8x32xf32>, vector<8x32xf32> -> vector<8x32xf32>
    %379 = arith.addf %360, %378 : vector<8x32xf32>
    %380 = vector.extract_strided_slice %319 {offsets = [0, 24], sizes = [8, 8], strides = [1, 1]} : vector<8x32xf32> to vector<8x8xf32>
    %381 = vector.extract_strided_slice %320 {offsets = [0, 24], sizes = [8, 8], strides = [1, 1]} : vector<8x32xf32> to vector<8x8xf32>
    %382 = vector.extract_strided_slice %321 {offsets = [0, 24], sizes = [8, 8], strides = [1, 1]} : vector<8x32xf32> to vector<8x8xf32>
    %cst_167 = arith.constant dense<0.000000e+00> : vector<8x8xf32>
    %383 = tpu.matmul %380, %381, %cst_167 {dimension_numbers = #tpu.dot_dimension_numbers<[1], [1], [0], [0], [0, 0, 1, 0], [], []>} : vector<8x8xf32>, vector<8x8xf32>, vector<8x8xf32> -> vector<8x8xf32>
    %384 = arith.addf %383, %313 : vector<8x8xf32>
    %cst_168 = arith.constant dense<0xFF800000> : vector<8xf32>
    %385 = vector.multi_reduction <maximumf>, %384, %cst_168 [1] : vector<8x8xf32> to vector<8xf32>
    %386 = vector.shape_cast %385 : vector<8xf32> to vector<8x1xf32>
    %387 = vector.broadcast %386 : vector<8x1xf32> to vector<8x8xf32>
    %388 = arith.subf %384, %387 : vector<8x8xf32>
    %389 = math.exp %388 : vector<8x8xf32>
    %cst_169 = arith.constant dense<0.000000e+00> : vector<8xf32>
    %390 = vector.multi_reduction <add>, %389, %cst_169 [1] : vector<8x8xf32> to vector<8xf32>
    %391 = vector.shape_cast %390 : vector<8xf32> to vector<8x1xf32>
    %392 = tpu.reciprocal %391 {approx = true} : vector<8x1xf32> -> vector<8x1xf32>
    %393 = vector.broadcast %392 : vector<8x1xf32> to vector<8x8xf32>
    %394 = arith.mulf %389, %393 : vector<8x8xf32>
    %cst_170 = arith.constant dense<0.000000e+00> : vector<8x8xf32>
    %395 = tpu.matmul %394, %382, %cst_170 {dimension_numbers = #tpu.dot_dimension_numbers<[1], [0], [0], [1], [0, 0, 1, 1], [], []>} : vector<8x8xf32>, vector<8x8xf32>, vector<8x8xf32> -> vector<8x8xf32>
    %c24_171 = arith.constant 24 : index
    %c0_172 = arith.constant 0 : index
    %396 = vector.load %arg17[%c24_171, %c0_172] : memref<32x32xf32, #tpu.memory_space<vmem>>, vector<8x32xf32>
    %cst_173 = arith.constant dense<0.000000e+00> : vector<8x32xf32>
    %397 = tpu.matmul %395, %396, %cst_173 {dimension_numbers = #tpu.dot_dimension_numbers<[1], [0], [0], [1], [0, 0, 1, 1], [], []>} : vector<8x8xf32>, vector<8x32xf32>, vector<8x32xf32> -> vector<8x32xf32>
    %398 = arith.addf %379, %397 : vector<8x32xf32>
    %c0_174 = arith.constant 0 : index
    %c0_175 = arith.constant 0 : index
    %399 = vector.load %arg16[%c0_174, %c0_175] : memref<1x32xf32, #tpu.memory_space<vmem>>, vector<1x32xf32>
    %400 = vector.broadcast %399 : vector<1x32xf32> to vector<8x32xf32>
    %401 = arith.addf %398, %400 : vector<8x32xf32>
    %402 = arith.addf %307, %401 : vector<8x32xf32>
    %c0_176 = arith.constant 0 : index
    %c0_177 = arith.constant 0 : index
    %403 = vector.load %arg11[%c0_176, %c0_177] : memref<1x32xf32, #tpu.memory_space<vmem>>, vector<1x32xf32>
    %c0_178 = arith.constant 0 : index
    %c0_179 = arith.constant 0 : index
    %404 = vector.load %arg10[%c0_178, %c0_179] : memref<1x32xf32, #tpu.memory_space<vmem>>, vector<1x32xf32>
    %cst_180 = arith.constant dense<0.000000e+00> : vector<8xf32>
    %405 = vector.multi_reduction <add>, %402, %cst_180 [1] : vector<8x32xf32> to vector<8xf32>
    %406 = vector.shape_cast %405 : vector<8xf32> to vector<8x1xf32>
    %cst_181 = arith.constant 3.200000e+01 : f32
    %407 = vector.broadcast %cst_181 : f32 to vector<8x1xf32>
    %408 = arith.divf %406, %407 : vector<8x1xf32>
    %409 = vector.broadcast %408 : vector<8x1xf32> to vector<8x32xf32>
    %410 = arith.subf %402, %409 : vector<8x32xf32>
    %411 = arith.mulf %410, %410 : vector<8x32xf32>
    %cst_182 = arith.constant dense<0.000000e+00> : vector<8xf32>
    %412 = vector.multi_reduction <add>, %411, %cst_182 [1] : vector<8x32xf32> to vector<8xf32>
    %413 = vector.shape_cast %412 : vector<8xf32> to vector<8x1xf32>
    %cst_183 = arith.constant 3.200000e+01 : f32
    %414 = vector.broadcast %cst_183 : f32 to vector<8x1xf32>
    %415 = arith.divf %413, %414 : vector<8x1xf32>
    %cst_184 = arith.constant 9.99999974E-6 : f32
    %416 = vector.broadcast %cst_184 : f32 to vector<8x1xf32>
    %417 = arith.addf %415, %416 : vector<8x1xf32>
    %418 = math.rsqrt %417 : vector<8x1xf32>
    %419 = vector.broadcast %418 : vector<8x1xf32> to vector<8x32xf32>
    %420 = arith.mulf %410, %419 : vector<8x32xf32>
    %421 = vector.broadcast %403 : vector<1x32xf32> to vector<8x32xf32>
    %422 = arith.mulf %420, %421 : vector<8x32xf32>
    %423 = vector.broadcast %404 : vector<1x32xf32> to vector<8x32xf32>
    %424 = arith.addf %422, %423 : vector<8x32xf32>
    %c0_185 = arith.constant 0 : index
    %c0_186 = arith.constant 0 : index
    %425 = vector.load %arg5[%c0_185, %c0_186] : memref<32x96xf32, #tpu.memory_space<vmem>>, vector<32x96xf32>
    %c0_187 = arith.constant 0 : index
    %c0_188 = arith.constant 0 : index
    %426 = vector.load %arg4[%c0_187, %c0_188] : memref<1x96xf32, #tpu.memory_space<vmem>>, vector<1x96xf32>
    %427 = vector.extract_strided_slice %425 {offsets = [0, 0], sizes = [32, 32], strides = [1, 1]} : vector<32x96xf32> to vector<32x32xf32>
    %cst_189 = arith.constant dense<0.000000e+00> : vector<8x32xf32>
    %428 = tpu.matmul %424, %427, %cst_189 {dimension_numbers = #tpu.dot_dimension_numbers<[1], [0], [0], [1], [0, 0, 1, 1], [], []>} : vector<8x32xf32>, vector<32x32xf32>, vector<8x32xf32> -> vector<8x32xf32>
    %429 = vector.extract_strided_slice %426 {offsets = [0, 0], sizes = [1, 32], strides = [1, 1]} : vector<1x96xf32> to vector<1x32xf32>
    %430 = vector.broadcast %429 : vector<1x32xf32> to vector<8x32xf32>
    %431 = arith.addf %428, %430 : vector<8x32xf32>
    %432 = vector.extract_strided_slice %425 {offsets = [0, 32], sizes = [32, 64], strides = [1, 1]} : vector<32x96xf32> to vector<32x64xf32>
    %cst_190 = arith.constant dense<0.000000e+00> : vector<10x64xf32>
    %433 = tpu.matmul %306, %432, %cst_190 {dimension_numbers = #tpu.dot_dimension_numbers<[1], [0], [0], [1], [0, 0, 1, 1], [], []>} : vector<10x32xf32>, vector<32x64xf32>, vector<10x64xf32> -> vector<10x64xf32>
    %434 = vector.extract_strided_slice %426 {offsets = [0, 32], sizes = [1, 64], strides = [1, 1]} : vector<1x96xf32> to vector<1x64xf32>
    %435 = vector.broadcast %434 : vector<1x64xf32> to vector<10x64xf32>
    %436 = arith.addf %433, %435 : vector<10x64xf32>
    %437 = vector.extract_strided_slice %436 {offsets = [0, 0], sizes = [10, 32], strides = [1, 1]} : vector<10x64xf32> to vector<10x32xf32>
    %438 = vector.extract_strided_slice %436 {offsets = [0, 32], sizes = [10, 32], strides = [1, 1]} : vector<10x64xf32> to vector<10x32xf32>
    %cst_191 = arith.constant 0.000000e+00 : f32
    %439 = vector.broadcast %cst_191 : f32 to vector<8x32xf32>
    %440 = vector.extract_strided_slice %431 {offsets = [0, 0], sizes = [8, 8], strides = [1, 1]} : vector<8x32xf32> to vector<8x8xf32>
    %441 = vector.extract_strided_slice %437 {offsets = [0, 0], sizes = [10, 8], strides = [1, 1]} : vector<10x32xf32> to vector<10x8xf32>
    %442 = vector.extract_strided_slice %438 {offsets = [0, 0], sizes = [10, 8], strides = [1, 1]} : vector<10x32xf32> to vector<10x8xf32>
    %cst_192 = arith.constant dense<0.000000e+00> : vector<8x10xf32>
    %443 = tpu.matmul %440, %441, %cst_192 {dimension_numbers = #tpu.dot_dimension_numbers<[1], [1], [0], [0], [0, 0, 1, 0], [], []>} : vector<8x8xf32>, vector<10x8xf32>, vector<8x10xf32> -> vector<8x10xf32>
    %cst_193 = arith.constant dense<0xFF800000> : vector<8xf32>
    %444 = vector.multi_reduction <maximumf>, %443, %cst_193 [1] : vector<8x10xf32> to vector<8xf32>
    %445 = vector.shape_cast %444 : vector<8xf32> to vector<8x1xf32>
    %446 = vector.broadcast %445 : vector<8x1xf32> to vector<8x10xf32>
    %447 = arith.subf %443, %446 : vector<8x10xf32>
    %448 = math.exp %447 : vector<8x10xf32>
    %cst_194 = arith.constant dense<0.000000e+00> : vector<8xf32>
    %449 = vector.multi_reduction <add>, %448, %cst_194 [1] : vector<8x10xf32> to vector<8xf32>
    %450 = vector.shape_cast %449 : vector<8xf32> to vector<8x1xf32>
    %451 = tpu.reciprocal %450 {approx = true} : vector<8x1xf32> -> vector<8x1xf32>
    %452 = vector.broadcast %451 : vector<8x1xf32> to vector<8x10xf32>
    %453 = arith.mulf %448, %452 : vector<8x10xf32>
    %cst_195 = arith.constant dense<0.000000e+00> : vector<8x8xf32>
    %454 = tpu.matmul %453, %442, %cst_195 {dimension_numbers = #tpu.dot_dimension_numbers<[1], [0], [0], [1], [0, 0, 1, 1], [], []>} : vector<8x10xf32>, vector<10x8xf32>, vector<8x8xf32> -> vector<8x8xf32>
    %c0_196 = arith.constant 0 : index
    %c0_197 = arith.constant 0 : index
    %455 = vector.load %arg3[%c0_196, %c0_197] : memref<32x32xf32, #tpu.memory_space<vmem>>, vector<8x32xf32>
    %cst_198 = arith.constant dense<0.000000e+00> : vector<8x32xf32>
    %456 = tpu.matmul %454, %455, %cst_198 {dimension_numbers = #tpu.dot_dimension_numbers<[1], [0], [0], [1], [0, 0, 1, 1], [], []>} : vector<8x8xf32>, vector<8x32xf32>, vector<8x32xf32> -> vector<8x32xf32>
    %457 = arith.addf %439, %456 : vector<8x32xf32>
    %458 = vector.extract_strided_slice %431 {offsets = [0, 8], sizes = [8, 8], strides = [1, 1]} : vector<8x32xf32> to vector<8x8xf32>
    %459 = vector.extract_strided_slice %437 {offsets = [0, 8], sizes = [10, 8], strides = [1, 1]} : vector<10x32xf32> to vector<10x8xf32>
    %460 = vector.extract_strided_slice %438 {offsets = [0, 8], sizes = [10, 8], strides = [1, 1]} : vector<10x32xf32> to vector<10x8xf32>
    %cst_199 = arith.constant dense<0.000000e+00> : vector<8x10xf32>
    %461 = tpu.matmul %458, %459, %cst_199 {dimension_numbers = #tpu.dot_dimension_numbers<[1], [1], [0], [0], [0, 0, 1, 0], [], []>} : vector<8x8xf32>, vector<10x8xf32>, vector<8x10xf32> -> vector<8x10xf32>
    %cst_200 = arith.constant dense<0xFF800000> : vector<8xf32>
    %462 = vector.multi_reduction <maximumf>, %461, %cst_200 [1] : vector<8x10xf32> to vector<8xf32>
    %463 = vector.shape_cast %462 : vector<8xf32> to vector<8x1xf32>
    %464 = vector.broadcast %463 : vector<8x1xf32> to vector<8x10xf32>
    %465 = arith.subf %461, %464 : vector<8x10xf32>
    %466 = math.exp %465 : vector<8x10xf32>
    %cst_201 = arith.constant dense<0.000000e+00> : vector<8xf32>
    %467 = vector.multi_reduction <add>, %466, %cst_201 [1] : vector<8x10xf32> to vector<8xf32>
    %468 = vector.shape_cast %467 : vector<8xf32> to vector<8x1xf32>
    %469 = tpu.reciprocal %468 {approx = true} : vector<8x1xf32> -> vector<8x1xf32>
    %470 = vector.broadcast %469 : vector<8x1xf32> to vector<8x10xf32>
    %471 = arith.mulf %466, %470 : vector<8x10xf32>
    %cst_202 = arith.constant dense<0.000000e+00> : vector<8x8xf32>
    %472 = tpu.matmul %471, %460, %cst_202 {dimension_numbers = #tpu.dot_dimension_numbers<[1], [0], [0], [1], [0, 0, 1, 1], [], []>} : vector<8x10xf32>, vector<10x8xf32>, vector<8x8xf32> -> vector<8x8xf32>
    %c8_203 = arith.constant 8 : index
    %c0_204 = arith.constant 0 : index
    %473 = vector.load %arg3[%c8_203, %c0_204] : memref<32x32xf32, #tpu.memory_space<vmem>>, vector<8x32xf32>
    %cst_205 = arith.constant dense<0.000000e+00> : vector<8x32xf32>
    %474 = tpu.matmul %472, %473, %cst_205 {dimension_numbers = #tpu.dot_dimension_numbers<[1], [0], [0], [1], [0, 0, 1, 1], [], []>} : vector<8x8xf32>, vector<8x32xf32>, vector<8x32xf32> -> vector<8x32xf32>
    %475 = arith.addf %457, %474 : vector<8x32xf32>
    %476 = vector.extract_strided_slice %431 {offsets = [0, 16], sizes = [8, 8], strides = [1, 1]} : vector<8x32xf32> to vector<8x8xf32>
    %477 = vector.extract_strided_slice %437 {offsets = [0, 16], sizes = [10, 8], strides = [1, 1]} : vector<10x32xf32> to vector<10x8xf32>
    %478 = vector.extract_strided_slice %438 {offsets = [0, 16], sizes = [10, 8], strides = [1, 1]} : vector<10x32xf32> to vector<10x8xf32>
    %cst_206 = arith.constant dense<0.000000e+00> : vector<8x10xf32>
    %479 = tpu.matmul %476, %477, %cst_206 {dimension_numbers = #tpu.dot_dimension_numbers<[1], [1], [0], [0], [0, 0, 1, 0], [], []>} : vector<8x8xf32>, vector<10x8xf32>, vector<8x10xf32> -> vector<8x10xf32>
    %cst_207 = arith.constant dense<0xFF800000> : vector<8xf32>
    %480 = vector.multi_reduction <maximumf>, %479, %cst_207 [1] : vector<8x10xf32> to vector<8xf32>
    %481 = vector.shape_cast %480 : vector<8xf32> to vector<8x1xf32>
    %482 = vector.broadcast %481 : vector<8x1xf32> to vector<8x10xf32>
    %483 = arith.subf %479, %482 : vector<8x10xf32>
    %484 = math.exp %483 : vector<8x10xf32>
    %cst_208 = arith.constant dense<0.000000e+00> : vector<8xf32>
    %485 = vector.multi_reduction <add>, %484, %cst_208 [1] : vector<8x10xf32> to vector<8xf32>
    %486 = vector.shape_cast %485 : vector<8xf32> to vector<8x1xf32>
    %487 = tpu.reciprocal %486 {approx = true} : vector<8x1xf32> -> vector<8x1xf32>
    %488 = vector.broadcast %487 : vector<8x1xf32> to vector<8x10xf32>
    %489 = arith.mulf %484, %488 : vector<8x10xf32>
    %cst_209 = arith.constant dense<0.000000e+00> : vector<8x8xf32>
    %490 = tpu.matmul %489, %478, %cst_209 {dimension_numbers = #tpu.dot_dimension_numbers<[1], [0], [0], [1], [0, 0, 1, 1], [], []>} : vector<8x10xf32>, vector<10x8xf32>, vector<8x8xf32> -> vector<8x8xf32>
    %c16_210 = arith.constant 16 : index
    %c0_211 = arith.constant 0 : index
    %491 = vector.load %arg3[%c16_210, %c0_211] : memref<32x32xf32, #tpu.memory_space<vmem>>, vector<8x32xf32>
    %cst_212 = arith.constant dense<0.000000e+00> : vector<8x32xf32>
    %492 = tpu.matmul %490, %491, %cst_212 {dimension_numbers = #tpu.dot_dimension_numbers<[1], [0], [0], [1], [0, 0, 1, 1], [], []>} : vector<8x8xf32>, vector<8x32xf32>, vector<8x32xf32> -> vector<8x32xf32>
    %493 = arith.addf %475, %492 : vector<8x32xf32>
    %494 = vector.extract_strided_slice %431 {offsets = [0, 24], sizes = [8, 8], strides = [1, 1]} : vector<8x32xf32> to vector<8x8xf32>
    %495 = vector.extract_strided_slice %437 {offsets = [0, 24], sizes = [10, 8], strides = [1, 1]} : vector<10x32xf32> to vector<10x8xf32>
    %496 = vector.extract_strided_slice %438 {offsets = [0, 24], sizes = [10, 8], strides = [1, 1]} : vector<10x32xf32> to vector<10x8xf32>
    %cst_213 = arith.constant dense<0.000000e+00> : vector<8x10xf32>
    %497 = tpu.matmul %494, %495, %cst_213 {dimension_numbers = #tpu.dot_dimension_numbers<[1], [1], [0], [0], [0, 0, 1, 0], [], []>} : vector<8x8xf32>, vector<10x8xf32>, vector<8x10xf32> -> vector<8x10xf32>
    %cst_214 = arith.constant dense<0xFF800000> : vector<8xf32>
    %498 = vector.multi_reduction <maximumf>, %497, %cst_214 [1] : vector<8x10xf32> to vector<8xf32>
    %499 = vector.shape_cast %498 : vector<8xf32> to vector<8x1xf32>
    %500 = vector.broadcast %499 : vector<8x1xf32> to vector<8x10xf32>
    %501 = arith.subf %497, %500 : vector<8x10xf32>
    %502 = math.exp %501 : vector<8x10xf32>
    %cst_215 = arith.constant dense<0.000000e+00> : vector<8xf32>
    %503 = vector.multi_reduction <add>, %502, %cst_215 [1] : vector<8x10xf32> to vector<8xf32>
    %504 = vector.shape_cast %503 : vector<8xf32> to vector<8x1xf32>
    %505 = tpu.reciprocal %504 {approx = true} : vector<8x1xf32> -> vector<8x1xf32>
    %506 = vector.broadcast %505 : vector<8x1xf32> to vector<8x10xf32>
    %507 = arith.mulf %502, %506 : vector<8x10xf32>
    %cst_216 = arith.constant dense<0.000000e+00> : vector<8x8xf32>
    %508 = tpu.matmul %507, %496, %cst_216 {dimension_numbers = #tpu.dot_dimension_numbers<[1], [0], [0], [1], [0, 0, 1, 1], [], []>} : vector<8x10xf32>, vector<10x8xf32>, vector<8x8xf32> -> vector<8x8xf32>
    %c24_217 = arith.constant 24 : index
    %c0_218 = arith.constant 0 : index
    %509 = vector.load %arg3[%c24_217, %c0_218] : memref<32x32xf32, #tpu.memory_space<vmem>>, vector<8x32xf32>
    %cst_219 = arith.constant dense<0.000000e+00> : vector<8x32xf32>
    %510 = tpu.matmul %508, %509, %cst_219 {dimension_numbers = #tpu.dot_dimension_numbers<[1], [0], [0], [1], [0, 0, 1, 1], [], []>} : vector<8x8xf32>, vector<8x32xf32>, vector<8x32xf32> -> vector<8x32xf32>
    %511 = arith.addf %493, %510 : vector<8x32xf32>
    %c0_220 = arith.constant 0 : index
    %c0_221 = arith.constant 0 : index
    %512 = vector.load %arg2[%c0_220, %c0_221] : memref<1x32xf32, #tpu.memory_space<vmem>>, vector<1x32xf32>
    %513 = vector.broadcast %512 : vector<1x32xf32> to vector<8x32xf32>
    %514 = arith.addf %511, %513 : vector<8x32xf32>
    %515 = arith.addf %424, %514 : vector<8x32xf32>
    %c0_222 = arith.constant 0 : index
    %c0_223 = arith.constant 0 : index
    %516 = vector.load %arg13[%c0_222, %c0_223] : memref<1x32xf32, #tpu.memory_space<vmem>>, vector<1x32xf32>
    %c0_224 = arith.constant 0 : index
    %c0_225 = arith.constant 0 : index
    %517 = vector.load %arg12[%c0_224, %c0_225] : memref<1x32xf32, #tpu.memory_space<vmem>>, vector<1x32xf32>
    %cst_226 = arith.constant dense<0.000000e+00> : vector<8xf32>
    %518 = vector.multi_reduction <add>, %515, %cst_226 [1] : vector<8x32xf32> to vector<8xf32>
    %519 = vector.shape_cast %518 : vector<8xf32> to vector<8x1xf32>
    %cst_227 = arith.constant 3.200000e+01 : f32
    %520 = vector.broadcast %cst_227 : f32 to vector<8x1xf32>
    %521 = arith.divf %519, %520 : vector<8x1xf32>
    %522 = vector.broadcast %521 : vector<8x1xf32> to vector<8x32xf32>
    %523 = arith.subf %515, %522 : vector<8x32xf32>
    %524 = arith.mulf %523, %523 : vector<8x32xf32>
    %cst_228 = arith.constant dense<0.000000e+00> : vector<8xf32>
    %525 = vector.multi_reduction <add>, %524, %cst_228 [1] : vector<8x32xf32> to vector<8xf32>
    %526 = vector.shape_cast %525 : vector<8xf32> to vector<8x1xf32>
    %cst_229 = arith.constant 3.200000e+01 : f32
    %527 = vector.broadcast %cst_229 : f32 to vector<8x1xf32>
    %528 = arith.divf %526, %527 : vector<8x1xf32>
    %cst_230 = arith.constant 9.99999974E-6 : f32
    %529 = vector.broadcast %cst_230 : f32 to vector<8x1xf32>
    %530 = arith.addf %528, %529 : vector<8x1xf32>
    %531 = math.rsqrt %530 : vector<8x1xf32>
    %532 = vector.broadcast %531 : vector<8x1xf32> to vector<8x32xf32>
    %533 = arith.mulf %523, %532 : vector<8x32xf32>
    %534 = vector.broadcast %516 : vector<1x32xf32> to vector<8x32xf32>
    %535 = arith.mulf %533, %534 : vector<8x32xf32>
    %536 = vector.broadcast %517 : vector<1x32xf32> to vector<8x32xf32>
    %537 = arith.addf %535, %536 : vector<8x32xf32>
    %c0_231 = arith.constant 0 : index
    %c0_232 = arith.constant 0 : index
    %538 = vector.load %arg7[%c0_231, %c0_232] : memref<32x64xf32, #tpu.memory_space<vmem>>, vector<32x64xf32>
    %cst_233 = arith.constant dense<0.000000e+00> : vector<8x64xf32>
    %539 = tpu.matmul %537, %538, %cst_233 {dimension_numbers = #tpu.dot_dimension_numbers<[1], [0], [0], [1], [0, 0, 1, 1], [], []>} : vector<8x32xf32>, vector<32x64xf32>, vector<8x64xf32> -> vector<8x64xf32>
    %c0_234 = arith.constant 0 : index
    %c0_235 = arith.constant 0 : index
    %540 = vector.load %arg6[%c0_234, %c0_235] : memref<1x64xf32, #tpu.memory_space<vmem>>, vector<1x64xf32>
    %541 = vector.broadcast %540 : vector<1x64xf32> to vector<8x64xf32>
    %542 = arith.addf %539, %541 : vector<8x64xf32>
    %cst_236 = arith.constant 0.000000e+00 : f32
    %543 = vector.broadcast %cst_236 : f32 to vector<8x64xf32>
    %544 = arith.maximumf %542, %543 : vector<8x64xf32>
    %c0_237 = arith.constant 0 : index
    %c0_238 = arith.constant 0 : index
    %545 = vector.load %arg9[%c0_237, %c0_238] : memref<64x32xf32, #tpu.memory_space<vmem>>, vector<64x32xf32>
    %cst_239 = arith.constant dense<0.000000e+00> : vector<8x32xf32>
    %546 = tpu.matmul %544, %545, %cst_239 {dimension_numbers = #tpu.dot_dimension_numbers<[1], [0], [0], [1], [0, 0, 1, 1], [], []>} : vector<8x64xf32>, vector<64x32xf32>, vector<8x32xf32> -> vector<8x32xf32>
    %c0_240 = arith.constant 0 : index
    %c0_241 = arith.constant 0 : index
    %547 = vector.load %arg8[%c0_240, %c0_241] : memref<1x32xf32, #tpu.memory_space<vmem>>, vector<1x32xf32>
    %548 = vector.broadcast %547 : vector<1x32xf32> to vector<8x32xf32>
    %549 = arith.addf %546, %548 : vector<8x32xf32>
    %550 = arith.addf %537, %549 : vector<8x32xf32>
    %c0_242 = arith.constant 0 : index
    %c0_243 = arith.constant 0 : index
    %551 = vector.load %arg15[%c0_242, %c0_243] : memref<1x32xf32, #tpu.memory_space<vmem>>, vector<1x32xf32>
    %c0_244 = arith.constant 0 : index
    %c0_245 = arith.constant 0 : index
    %552 = vector.load %arg14[%c0_244, %c0_245] : memref<1x32xf32, #tpu.memory_space<vmem>>, vector<1x32xf32>
    %cst_246 = arith.constant dense<0.000000e+00> : vector<8xf32>
    %553 = vector.multi_reduction <add>, %550, %cst_246 [1] : vector<8x32xf32> to vector<8xf32>
    %554 = vector.shape_cast %553 : vector<8xf32> to vector<8x1xf32>
    %cst_247 = arith.constant 3.200000e+01 : f32
    %555 = vector.broadcast %cst_247 : f32 to vector<8x1xf32>
    %556 = arith.divf %554, %555 : vector<8x1xf32>
    %557 = vector.broadcast %556 : vector<8x1xf32> to vector<8x32xf32>
    %558 = arith.subf %550, %557 : vector<8x32xf32>
    %559 = arith.mulf %558, %558 : vector<8x32xf32>
    %cst_248 = arith.constant dense<0.000000e+00> : vector<8xf32>
    %560 = vector.multi_reduction <add>, %559, %cst_248 [1] : vector<8x32xf32> to vector<8xf32>
    %561 = vector.shape_cast %560 : vector<8xf32> to vector<8x1xf32>
    %cst_249 = arith.constant 3.200000e+01 : f32
    %562 = vector.broadcast %cst_249 : f32 to vector<8x1xf32>
    %563 = arith.divf %561, %562 : vector<8x1xf32>
    %cst_250 = arith.constant 9.99999974E-6 : f32
    %564 = vector.broadcast %cst_250 : f32 to vector<8x1xf32>
    %565 = arith.addf %563, %564 : vector<8x1xf32>
    %566 = math.rsqrt %565 : vector<8x1xf32>
    %567 = vector.broadcast %566 : vector<8x1xf32> to vector<8x32xf32>
    %568 = arith.mulf %558, %567 : vector<8x32xf32>
    %569 = vector.broadcast %551 : vector<1x32xf32> to vector<8x32xf32>
    %570 = arith.mulf %568, %569 : vector<8x32xf32>
    %571 = vector.broadcast %552 : vector<1x32xf32> to vector<8x32xf32>
    %572 = arith.addf %570, %571 : vector<8x32xf32>
    %c0_251 = arith.constant 0 : index
    %c0_252 = arith.constant 0 : index
    %573 = vector.load %arg37[%c0_251, %c0_252] : memref<32x96xf32, #tpu.memory_space<vmem>>, vector<32x96xf32>
    %cst_253 = arith.constant dense<0.000000e+00> : vector<8x96xf32>
    %574 = tpu.matmul %572, %573, %cst_253 {dimension_numbers = #tpu.dot_dimension_numbers<[1], [0], [0], [1], [0, 0, 1, 1], [], []>} : vector<8x32xf32>, vector<32x96xf32>, vector<8x96xf32> -> vector<8x96xf32>
    %c0_254 = arith.constant 0 : index
    %c0_255 = arith.constant 0 : index
    %575 = vector.load %arg36[%c0_254, %c0_255] : memref<1x96xf32, #tpu.memory_space<vmem>>, vector<1x96xf32>
    %576 = vector.broadcast %575 : vector<1x96xf32> to vector<8x96xf32>
    %577 = arith.addf %574, %576 : vector<8x96xf32>
    %578 = vector.extract_strided_slice %577 {offsets = [0, 0], sizes = [8, 32], strides = [1, 1]} : vector<8x96xf32> to vector<8x32xf32>
    %579 = vector.extract_strided_slice %577 {offsets = [0, 32], sizes = [8, 32], strides = [1, 1]} : vector<8x96xf32> to vector<8x32xf32>
    %580 = vector.extract_strided_slice %577 {offsets = [0, 64], sizes = [8, 32], strides = [1, 1]} : vector<8x96xf32> to vector<8x32xf32>
    %cst_256 = arith.constant 0.000000e+00 : f32
    %581 = vector.broadcast %cst_256 : f32 to vector<8x32xf32>
    %582 = vector.extract_strided_slice %578 {offsets = [0, 0], sizes = [8, 8], strides = [1, 1]} : vector<8x32xf32> to vector<8x8xf32>
    %583 = vector.extract_strided_slice %579 {offsets = [0, 0], sizes = [8, 8], strides = [1, 1]} : vector<8x32xf32> to vector<8x8xf32>
    %584 = vector.extract_strided_slice %580 {offsets = [0, 0], sizes = [8, 8], strides = [1, 1]} : vector<8x32xf32> to vector<8x8xf32>
    %cst_257 = arith.constant dense<0.000000e+00> : vector<8x8xf32>
    %585 = tpu.matmul %582, %583, %cst_257 {dimension_numbers = #tpu.dot_dimension_numbers<[1], [1], [0], [0], [0, 0, 1, 0], [], []>} : vector<8x8xf32>, vector<8x8xf32>, vector<8x8xf32> -> vector<8x8xf32>
    %586 = arith.addf %585, %313 : vector<8x8xf32>
    %cst_258 = arith.constant dense<0xFF800000> : vector<8xf32>
    %587 = vector.multi_reduction <maximumf>, %586, %cst_258 [1] : vector<8x8xf32> to vector<8xf32>
    %588 = vector.shape_cast %587 : vector<8xf32> to vector<8x1xf32>
    %589 = vector.broadcast %588 : vector<8x1xf32> to vector<8x8xf32>
    %590 = arith.subf %586, %589 : vector<8x8xf32>
    %591 = math.exp %590 : vector<8x8xf32>
    %cst_259 = arith.constant dense<0.000000e+00> : vector<8xf32>
    %592 = vector.multi_reduction <add>, %591, %cst_259 [1] : vector<8x8xf32> to vector<8xf32>
    %593 = vector.shape_cast %592 : vector<8xf32> to vector<8x1xf32>
    %594 = tpu.reciprocal %593 {approx = true} : vector<8x1xf32> -> vector<8x1xf32>
    %595 = vector.broadcast %594 : vector<8x1xf32> to vector<8x8xf32>
    %596 = arith.mulf %591, %595 : vector<8x8xf32>
    %cst_260 = arith.constant dense<0.000000e+00> : vector<8x8xf32>
    %597 = tpu.matmul %596, %584, %cst_260 {dimension_numbers = #tpu.dot_dimension_numbers<[1], [0], [0], [1], [0, 0, 1, 1], [], []>} : vector<8x8xf32>, vector<8x8xf32>, vector<8x8xf32> -> vector<8x8xf32>
    %c0_261 = arith.constant 0 : index
    %c0_262 = arith.constant 0 : index
    %598 = vector.load %arg35[%c0_261, %c0_262] : memref<32x32xf32, #tpu.memory_space<vmem>>, vector<8x32xf32>
    %cst_263 = arith.constant dense<0.000000e+00> : vector<8x32xf32>
    %599 = tpu.matmul %597, %598, %cst_263 {dimension_numbers = #tpu.dot_dimension_numbers<[1], [0], [0], [1], [0, 0, 1, 1], [], []>} : vector<8x8xf32>, vector<8x32xf32>, vector<8x32xf32> -> vector<8x32xf32>
    %600 = arith.addf %581, %599 : vector<8x32xf32>
    %601 = vector.extract_strided_slice %578 {offsets = [0, 8], sizes = [8, 8], strides = [1, 1]} : vector<8x32xf32> to vector<8x8xf32>
    %602 = vector.extract_strided_slice %579 {offsets = [0, 8], sizes = [8, 8], strides = [1, 1]} : vector<8x32xf32> to vector<8x8xf32>
    %603 = vector.extract_strided_slice %580 {offsets = [0, 8], sizes = [8, 8], strides = [1, 1]} : vector<8x32xf32> to vector<8x8xf32>
    %cst_264 = arith.constant dense<0.000000e+00> : vector<8x8xf32>
    %604 = tpu.matmul %601, %602, %cst_264 {dimension_numbers = #tpu.dot_dimension_numbers<[1], [1], [0], [0], [0, 0, 1, 0], [], []>} : vector<8x8xf32>, vector<8x8xf32>, vector<8x8xf32> -> vector<8x8xf32>
    %605 = arith.addf %604, %313 : vector<8x8xf32>
    %cst_265 = arith.constant dense<0xFF800000> : vector<8xf32>
    %606 = vector.multi_reduction <maximumf>, %605, %cst_265 [1] : vector<8x8xf32> to vector<8xf32>
    %607 = vector.shape_cast %606 : vector<8xf32> to vector<8x1xf32>
    %608 = vector.broadcast %607 : vector<8x1xf32> to vector<8x8xf32>
    %609 = arith.subf %605, %608 : vector<8x8xf32>
    %610 = math.exp %609 : vector<8x8xf32>
    %cst_266 = arith.constant dense<0.000000e+00> : vector<8xf32>
    %611 = vector.multi_reduction <add>, %610, %cst_266 [1] : vector<8x8xf32> to vector<8xf32>
    %612 = vector.shape_cast %611 : vector<8xf32> to vector<8x1xf32>
    %613 = tpu.reciprocal %612 {approx = true} : vector<8x1xf32> -> vector<8x1xf32>
    %614 = vector.broadcast %613 : vector<8x1xf32> to vector<8x8xf32>
    %615 = arith.mulf %610, %614 : vector<8x8xf32>
    %cst_267 = arith.constant dense<0.000000e+00> : vector<8x8xf32>
    %616 = tpu.matmul %615, %603, %cst_267 {dimension_numbers = #tpu.dot_dimension_numbers<[1], [0], [0], [1], [0, 0, 1, 1], [], []>} : vector<8x8xf32>, vector<8x8xf32>, vector<8x8xf32> -> vector<8x8xf32>
    %c8_268 = arith.constant 8 : index
    %c0_269 = arith.constant 0 : index
    %617 = vector.load %arg35[%c8_268, %c0_269] : memref<32x32xf32, #tpu.memory_space<vmem>>, vector<8x32xf32>
    %cst_270 = arith.constant dense<0.000000e+00> : vector<8x32xf32>
    %618 = tpu.matmul %616, %617, %cst_270 {dimension_numbers = #tpu.dot_dimension_numbers<[1], [0], [0], [1], [0, 0, 1, 1], [], []>} : vector<8x8xf32>, vector<8x32xf32>, vector<8x32xf32> -> vector<8x32xf32>
    %619 = arith.addf %600, %618 : vector<8x32xf32>
    %620 = vector.extract_strided_slice %578 {offsets = [0, 16], sizes = [8, 8], strides = [1, 1]} : vector<8x32xf32> to vector<8x8xf32>
    %621 = vector.extract_strided_slice %579 {offsets = [0, 16], sizes = [8, 8], strides = [1, 1]} : vector<8x32xf32> to vector<8x8xf32>
    %622 = vector.extract_strided_slice %580 {offsets = [0, 16], sizes = [8, 8], strides = [1, 1]} : vector<8x32xf32> to vector<8x8xf32>
    %cst_271 = arith.constant dense<0.000000e+00> : vector<8x8xf32>
    %623 = tpu.matmul %620, %621, %cst_271 {dimension_numbers = #tpu.dot_dimension_numbers<[1], [1], [0], [0], [0, 0, 1, 0], [], []>} : vector<8x8xf32>, vector<8x8xf32>, vector<8x8xf32> -> vector<8x8xf32>
    %624 = arith.addf %623, %313 : vector<8x8xf32>
    %cst_272 = arith.constant dense<0xFF800000> : vector<8xf32>
    %625 = vector.multi_reduction <maximumf>, %624, %cst_272 [1] : vector<8x8xf32> to vector<8xf32>
    %626 = vector.shape_cast %625 : vector<8xf32> to vector<8x1xf32>
    %627 = vector.broadcast %626 : vector<8x1xf32> to vector<8x8xf32>
    %628 = arith.subf %624, %627 : vector<8x8xf32>
    %629 = math.exp %628 : vector<8x8xf32>
    %cst_273 = arith.constant dense<0.000000e+00> : vector<8xf32>
    %630 = vector.multi_reduction <add>, %629, %cst_273 [1] : vector<8x8xf32> to vector<8xf32>
    %631 = vector.shape_cast %630 : vector<8xf32> to vector<8x1xf32>
    %632 = tpu.reciprocal %631 {approx = true} : vector<8x1xf32> -> vector<8x1xf32>
    %633 = vector.broadcast %632 : vector<8x1xf32> to vector<8x8xf32>
    %634 = arith.mulf %629, %633 : vector<8x8xf32>
    %cst_274 = arith.constant dense<0.000000e+00> : vector<8x8xf32>
    %635 = tpu.matmul %634, %622, %cst_274 {dimension_numbers = #tpu.dot_dimension_numbers<[1], [0], [0], [1], [0, 0, 1, 1], [], []>} : vector<8x8xf32>, vector<8x8xf32>, vector<8x8xf32> -> vector<8x8xf32>
    %c16_275 = arith.constant 16 : index
    %c0_276 = arith.constant 0 : index
    %636 = vector.load %arg35[%c16_275, %c0_276] : memref<32x32xf32, #tpu.memory_space<vmem>>, vector<8x32xf32>
    %cst_277 = arith.constant dense<0.000000e+00> : vector<8x32xf32>
    %637 = tpu.matmul %635, %636, %cst_277 {dimension_numbers = #tpu.dot_dimension_numbers<[1], [0], [0], [1], [0, 0, 1, 1], [], []>} : vector<8x8xf32>, vector<8x32xf32>, vector<8x32xf32> -> vector<8x32xf32>
    %638 = arith.addf %619, %637 : vector<8x32xf32>
    %639 = vector.extract_strided_slice %578 {offsets = [0, 24], sizes = [8, 8], strides = [1, 1]} : vector<8x32xf32> to vector<8x8xf32>
    %640 = vector.extract_strided_slice %579 {offsets = [0, 24], sizes = [8, 8], strides = [1, 1]} : vector<8x32xf32> to vector<8x8xf32>
    %641 = vector.extract_strided_slice %580 {offsets = [0, 24], sizes = [8, 8], strides = [1, 1]} : vector<8x32xf32> to vector<8x8xf32>
    %cst_278 = arith.constant dense<0.000000e+00> : vector<8x8xf32>
    %642 = tpu.matmul %639, %640, %cst_278 {dimension_numbers = #tpu.dot_dimension_numbers<[1], [1], [0], [0], [0, 0, 1, 0], [], []>} : vector<8x8xf32>, vector<8x8xf32>, vector<8x8xf32> -> vector<8x8xf32>
    %643 = arith.addf %642, %313 : vector<8x8xf32>
    %cst_279 = arith.constant dense<0xFF800000> : vector<8xf32>
    %644 = vector.multi_reduction <maximumf>, %643, %cst_279 [1] : vector<8x8xf32> to vector<8xf32>
    %645 = vector.shape_cast %644 : vector<8xf32> to vector<8x1xf32>
    %646 = vector.broadcast %645 : vector<8x1xf32> to vector<8x8xf32>
    %647 = arith.subf %643, %646 : vector<8x8xf32>
    %648 = math.exp %647 : vector<8x8xf32>
    %cst_280 = arith.constant dense<0.000000e+00> : vector<8xf32>
    %649 = vector.multi_reduction <add>, %648, %cst_280 [1] : vector<8x8xf32> to vector<8xf32>
    %650 = vector.shape_cast %649 : vector<8xf32> to vector<8x1xf32>
    %651 = tpu.reciprocal %650 {approx = true} : vector<8x1xf32> -> vector<8x1xf32>
    %652 = vector.broadcast %651 : vector<8x1xf32> to vector<8x8xf32>
    %653 = arith.mulf %648, %652 : vector<8x8xf32>
    %cst_281 = arith.constant dense<0.000000e+00> : vector<8x8xf32>
    %654 = tpu.matmul %653, %641, %cst_281 {dimension_numbers = #tpu.dot_dimension_numbers<[1], [0], [0], [1], [0, 0, 1, 1], [], []>} : vector<8x8xf32>, vector<8x8xf32>, vector<8x8xf32> -> vector<8x8xf32>
    %c24_282 = arith.constant 24 : index
    %c0_283 = arith.constant 0 : index
    %655 = vector.load %arg35[%c24_282, %c0_283] : memref<32x32xf32, #tpu.memory_space<vmem>>, vector<8x32xf32>
    %cst_284 = arith.constant dense<0.000000e+00> : vector<8x32xf32>
    %656 = tpu.matmul %654, %655, %cst_284 {dimension_numbers = #tpu.dot_dimension_numbers<[1], [0], [0], [1], [0, 0, 1, 1], [], []>} : vector<8x8xf32>, vector<8x32xf32>, vector<8x32xf32> -> vector<8x32xf32>
    %657 = arith.addf %638, %656 : vector<8x32xf32>
    %c0_285 = arith.constant 0 : index
    %c0_286 = arith.constant 0 : index
    %658 = vector.load %arg34[%c0_285, %c0_286] : memref<1x32xf32, #tpu.memory_space<vmem>>, vector<1x32xf32>
    %659 = vector.broadcast %658 : vector<1x32xf32> to vector<8x32xf32>
    %660 = arith.addf %657, %659 : vector<8x32xf32>
    %661 = arith.addf %572, %660 : vector<8x32xf32>
    %c0_287 = arith.constant 0 : index
    %c0_288 = arith.constant 0 : index
    %662 = vector.load %arg29[%c0_287, %c0_288] : memref<1x32xf32, #tpu.memory_space<vmem>>, vector<1x32xf32>
    %c0_289 = arith.constant 0 : index
    %c0_290 = arith.constant 0 : index
    %663 = vector.load %arg28[%c0_289, %c0_290] : memref<1x32xf32, #tpu.memory_space<vmem>>, vector<1x32xf32>
    %cst_291 = arith.constant dense<0.000000e+00> : vector<8xf32>
    %664 = vector.multi_reduction <add>, %661, %cst_291 [1] : vector<8x32xf32> to vector<8xf32>
    %665 = vector.shape_cast %664 : vector<8xf32> to vector<8x1xf32>
    %cst_292 = arith.constant 3.200000e+01 : f32
    %666 = vector.broadcast %cst_292 : f32 to vector<8x1xf32>
    %667 = arith.divf %665, %666 : vector<8x1xf32>
    %668 = vector.broadcast %667 : vector<8x1xf32> to vector<8x32xf32>
    %669 = arith.subf %661, %668 : vector<8x32xf32>
    %670 = arith.mulf %669, %669 : vector<8x32xf32>
    %cst_293 = arith.constant dense<0.000000e+00> : vector<8xf32>
    %671 = vector.multi_reduction <add>, %670, %cst_293 [1] : vector<8x32xf32> to vector<8xf32>
    %672 = vector.shape_cast %671 : vector<8xf32> to vector<8x1xf32>
    %cst_294 = arith.constant 3.200000e+01 : f32
    %673 = vector.broadcast %cst_294 : f32 to vector<8x1xf32>
    %674 = arith.divf %672, %673 : vector<8x1xf32>
    %cst_295 = arith.constant 9.99999974E-6 : f32
    %675 = vector.broadcast %cst_295 : f32 to vector<8x1xf32>
    %676 = arith.addf %674, %675 : vector<8x1xf32>
    %677 = math.rsqrt %676 : vector<8x1xf32>
    %678 = vector.broadcast %677 : vector<8x1xf32> to vector<8x32xf32>
    %679 = arith.mulf %669, %678 : vector<8x32xf32>
    %680 = vector.broadcast %662 : vector<1x32xf32> to vector<8x32xf32>
    %681 = arith.mulf %679, %680 : vector<8x32xf32>
    %682 = vector.broadcast %663 : vector<1x32xf32> to vector<8x32xf32>
    %683 = arith.addf %681, %682 : vector<8x32xf32>
    %c0_296 = arith.constant 0 : index
    %c0_297 = arith.constant 0 : index
    %684 = vector.load %arg23[%c0_296, %c0_297] : memref<32x96xf32, #tpu.memory_space<vmem>>, vector<32x96xf32>
    %c0_298 = arith.constant 0 : index
    %c0_299 = arith.constant 0 : index
    %685 = vector.load %arg22[%c0_298, %c0_299] : memref<1x96xf32, #tpu.memory_space<vmem>>, vector<1x96xf32>
    %686 = vector.extract_strided_slice %684 {offsets = [0, 0], sizes = [32, 32], strides = [1, 1]} : vector<32x96xf32> to vector<32x32xf32>
    %cst_300 = arith.constant dense<0.000000e+00> : vector<8x32xf32>
    %687 = tpu.matmul %683, %686, %cst_300 {dimension_numbers = #tpu.dot_dimension_numbers<[1], [0], [0], [1], [0, 0, 1, 1], [], []>} : vector<8x32xf32>, vector<32x32xf32>, vector<8x32xf32> -> vector<8x32xf32>
    %688 = vector.extract_strided_slice %685 {offsets = [0, 0], sizes = [1, 32], strides = [1, 1]} : vector<1x96xf32> to vector<1x32xf32>
    %689 = vector.broadcast %688 : vector<1x32xf32> to vector<8x32xf32>
    %690 = arith.addf %687, %689 : vector<8x32xf32>
    %691 = vector.extract_strided_slice %684 {offsets = [0, 32], sizes = [32, 64], strides = [1, 1]} : vector<32x96xf32> to vector<32x64xf32>
    %cst_301 = arith.constant dense<0.000000e+00> : vector<10x64xf32>
    %692 = tpu.matmul %306, %691, %cst_301 {dimension_numbers = #tpu.dot_dimension_numbers<[1], [0], [0], [1], [0, 0, 1, 1], [], []>} : vector<10x32xf32>, vector<32x64xf32>, vector<10x64xf32> -> vector<10x64xf32>
    %693 = vector.extract_strided_slice %685 {offsets = [0, 32], sizes = [1, 64], strides = [1, 1]} : vector<1x96xf32> to vector<1x64xf32>
    %694 = vector.broadcast %693 : vector<1x64xf32> to vector<10x64xf32>
    %695 = arith.addf %692, %694 : vector<10x64xf32>
    %696 = vector.extract_strided_slice %695 {offsets = [0, 0], sizes = [10, 32], strides = [1, 1]} : vector<10x64xf32> to vector<10x32xf32>
    %697 = vector.extract_strided_slice %695 {offsets = [0, 32], sizes = [10, 32], strides = [1, 1]} : vector<10x64xf32> to vector<10x32xf32>
    %cst_302 = arith.constant 0.000000e+00 : f32
    %698 = vector.broadcast %cst_302 : f32 to vector<8x32xf32>
    %699 = vector.extract_strided_slice %690 {offsets = [0, 0], sizes = [8, 8], strides = [1, 1]} : vector<8x32xf32> to vector<8x8xf32>
    %700 = vector.extract_strided_slice %696 {offsets = [0, 0], sizes = [10, 8], strides = [1, 1]} : vector<10x32xf32> to vector<10x8xf32>
    %701 = vector.extract_strided_slice %697 {offsets = [0, 0], sizes = [10, 8], strides = [1, 1]} : vector<10x32xf32> to vector<10x8xf32>
    %cst_303 = arith.constant dense<0.000000e+00> : vector<8x10xf32>
    %702 = tpu.matmul %699, %700, %cst_303 {dimension_numbers = #tpu.dot_dimension_numbers<[1], [1], [0], [0], [0, 0, 1, 0], [], []>} : vector<8x8xf32>, vector<10x8xf32>, vector<8x10xf32> -> vector<8x10xf32>
    %cst_304 = arith.constant dense<0xFF800000> : vector<8xf32>
    %703 = vector.multi_reduction <maximumf>, %702, %cst_304 [1] : vector<8x10xf32> to vector<8xf32>
    %704 = vector.shape_cast %703 : vector<8xf32> to vector<8x1xf32>
    %705 = vector.broadcast %704 : vector<8x1xf32> to vector<8x10xf32>
    %706 = arith.subf %702, %705 : vector<8x10xf32>
    %707 = math.exp %706 : vector<8x10xf32>
    %cst_305 = arith.constant dense<0.000000e+00> : vector<8xf32>
    %708 = vector.multi_reduction <add>, %707, %cst_305 [1] : vector<8x10xf32> to vector<8xf32>
    %709 = vector.shape_cast %708 : vector<8xf32> to vector<8x1xf32>
    %710 = tpu.reciprocal %709 {approx = true} : vector<8x1xf32> -> vector<8x1xf32>
    %711 = vector.broadcast %710 : vector<8x1xf32> to vector<8x10xf32>
    %712 = arith.mulf %707, %711 : vector<8x10xf32>
    %cst_306 = arith.constant dense<0.000000e+00> : vector<8x8xf32>
    %713 = tpu.matmul %712, %701, %cst_306 {dimension_numbers = #tpu.dot_dimension_numbers<[1], [0], [0], [1], [0, 0, 1, 1], [], []>} : vector<8x10xf32>, vector<10x8xf32>, vector<8x8xf32> -> vector<8x8xf32>
    %c0_307 = arith.constant 0 : index
    %c0_308 = arith.constant 0 : index
    %714 = vector.load %arg21[%c0_307, %c0_308] : memref<32x32xf32, #tpu.memory_space<vmem>>, vector<8x32xf32>
    %cst_309 = arith.constant dense<0.000000e+00> : vector<8x32xf32>
    %715 = tpu.matmul %713, %714, %cst_309 {dimension_numbers = #tpu.dot_dimension_numbers<[1], [0], [0], [1], [0, 0, 1, 1], [], []>} : vector<8x8xf32>, vector<8x32xf32>, vector<8x32xf32> -> vector<8x32xf32>
    %716 = arith.addf %698, %715 : vector<8x32xf32>
    %717 = vector.extract_strided_slice %690 {offsets = [0, 8], sizes = [8, 8], strides = [1, 1]} : vector<8x32xf32> to vector<8x8xf32>
    %718 = vector.extract_strided_slice %696 {offsets = [0, 8], sizes = [10, 8], strides = [1, 1]} : vector<10x32xf32> to vector<10x8xf32>
    %719 = vector.extract_strided_slice %697 {offsets = [0, 8], sizes = [10, 8], strides = [1, 1]} : vector<10x32xf32> to vector<10x8xf32>
    %cst_310 = arith.constant dense<0.000000e+00> : vector<8x10xf32>
    %720 = tpu.matmul %717, %718, %cst_310 {dimension_numbers = #tpu.dot_dimension_numbers<[1], [1], [0], [0], [0, 0, 1, 0], [], []>} : vector<8x8xf32>, vector<10x8xf32>, vector<8x10xf32> -> vector<8x10xf32>
    %cst_311 = arith.constant dense<0xFF800000> : vector<8xf32>
    %721 = vector.multi_reduction <maximumf>, %720, %cst_311 [1] : vector<8x10xf32> to vector<8xf32>
    %722 = vector.shape_cast %721 : vector<8xf32> to vector<8x1xf32>
    %723 = vector.broadcast %722 : vector<8x1xf32> to vector<8x10xf32>
    %724 = arith.subf %720, %723 : vector<8x10xf32>
    %725 = math.exp %724 : vector<8x10xf32>
    %cst_312 = arith.constant dense<0.000000e+00> : vector<8xf32>
    %726 = vector.multi_reduction <add>, %725, %cst_312 [1] : vector<8x10xf32> to vector<8xf32>
    %727 = vector.shape_cast %726 : vector<8xf32> to vector<8x1xf32>
    %728 = tpu.reciprocal %727 {approx = true} : vector<8x1xf32> -> vector<8x1xf32>
    %729 = vector.broadcast %728 : vector<8x1xf32> to vector<8x10xf32>
    %730 = arith.mulf %725, %729 : vector<8x10xf32>
    %cst_313 = arith.constant dense<0.000000e+00> : vector<8x8xf32>
    %731 = tpu.matmul %730, %719, %cst_313 {dimension_numbers = #tpu.dot_dimension_numbers<[1], [0], [0], [1], [0, 0, 1, 1], [], []>} : vector<8x10xf32>, vector<10x8xf32>, vector<8x8xf32> -> vector<8x8xf32>
    %c8_314 = arith.constant 8 : index
    %c0_315 = arith.constant 0 : index
    %732 = vector.load %arg21[%c8_314, %c0_315] : memref<32x32xf32, #tpu.memory_space<vmem>>, vector<8x32xf32>
    %cst_316 = arith.constant dense<0.000000e+00> : vector<8x32xf32>
    %733 = tpu.matmul %731, %732, %cst_316 {dimension_numbers = #tpu.dot_dimension_numbers<[1], [0], [0], [1], [0, 0, 1, 1], [], []>} : vector<8x8xf32>, vector<8x32xf32>, vector<8x32xf32> -> vector<8x32xf32>
    %734 = arith.addf %716, %733 : vector<8x32xf32>
    %735 = vector.extract_strided_slice %690 {offsets = [0, 16], sizes = [8, 8], strides = [1, 1]} : vector<8x32xf32> to vector<8x8xf32>
    %736 = vector.extract_strided_slice %696 {offsets = [0, 16], sizes = [10, 8], strides = [1, 1]} : vector<10x32xf32> to vector<10x8xf32>
    %737 = vector.extract_strided_slice %697 {offsets = [0, 16], sizes = [10, 8], strides = [1, 1]} : vector<10x32xf32> to vector<10x8xf32>
    %cst_317 = arith.constant dense<0.000000e+00> : vector<8x10xf32>
    %738 = tpu.matmul %735, %736, %cst_317 {dimension_numbers = #tpu.dot_dimension_numbers<[1], [1], [0], [0], [0, 0, 1, 0], [], []>} : vector<8x8xf32>, vector<10x8xf32>, vector<8x10xf32> -> vector<8x10xf32>
    %cst_318 = arith.constant dense<0xFF800000> : vector<8xf32>
    %739 = vector.multi_reduction <maximumf>, %738, %cst_318 [1] : vector<8x10xf32> to vector<8xf32>
    %740 = vector.shape_cast %739 : vector<8xf32> to vector<8x1xf32>
    %741 = vector.broadcast %740 : vector<8x1xf32> to vector<8x10xf32>
    %742 = arith.subf %738, %741 : vector<8x10xf32>
    %743 = math.exp %742 : vector<8x10xf32>
    %cst_319 = arith.constant dense<0.000000e+00> : vector<8xf32>
    %744 = vector.multi_reduction <add>, %743, %cst_319 [1] : vector<8x10xf32> to vector<8xf32>
    %745 = vector.shape_cast %744 : vector<8xf32> to vector<8x1xf32>
    %746 = tpu.reciprocal %745 {approx = true} : vector<8x1xf32> -> vector<8x1xf32>
    %747 = vector.broadcast %746 : vector<8x1xf32> to vector<8x10xf32>
    %748 = arith.mulf %743, %747 : vector<8x10xf32>
    %cst_320 = arith.constant dense<0.000000e+00> : vector<8x8xf32>
    %749 = tpu.matmul %748, %737, %cst_320 {dimension_numbers = #tpu.dot_dimension_numbers<[1], [0], [0], [1], [0, 0, 1, 1], [], []>} : vector<8x10xf32>, vector<10x8xf32>, vector<8x8xf32> -> vector<8x8xf32>
    %c16_321 = arith.constant 16 : index
    %c0_322 = arith.constant 0 : index
    %750 = vector.load %arg21[%c16_321, %c0_322] : memref<32x32xf32, #tpu.memory_space<vmem>>, vector<8x32xf32>
    %cst_323 = arith.constant dense<0.000000e+00> : vector<8x32xf32>
    %751 = tpu.matmul %749, %750, %cst_323 {dimension_numbers = #tpu.dot_dimension_numbers<[1], [0], [0], [1], [0, 0, 1, 1], [], []>} : vector<8x8xf32>, vector<8x32xf32>, vector<8x32xf32> -> vector<8x32xf32>
    %752 = arith.addf %734, %751 : vector<8x32xf32>
    %753 = vector.extract_strided_slice %690 {offsets = [0, 24], sizes = [8, 8], strides = [1, 1]} : vector<8x32xf32> to vector<8x8xf32>
    %754 = vector.extract_strided_slice %696 {offsets = [0, 24], sizes = [10, 8], strides = [1, 1]} : vector<10x32xf32> to vector<10x8xf32>
    %755 = vector.extract_strided_slice %697 {offsets = [0, 24], sizes = [10, 8], strides = [1, 1]} : vector<10x32xf32> to vector<10x8xf32>
    %cst_324 = arith.constant dense<0.000000e+00> : vector<8x10xf32>
    %756 = tpu.matmul %753, %754, %cst_324 {dimension_numbers = #tpu.dot_dimension_numbers<[1], [1], [0], [0], [0, 0, 1, 0], [], []>} : vector<8x8xf32>, vector<10x8xf32>, vector<8x10xf32> -> vector<8x10xf32>
    %cst_325 = arith.constant dense<0xFF800000> : vector<8xf32>
    %757 = vector.multi_reduction <maximumf>, %756, %cst_325 [1] : vector<8x10xf32> to vector<8xf32>
    %758 = vector.shape_cast %757 : vector<8xf32> to vector<8x1xf32>
    %759 = vector.broadcast %758 : vector<8x1xf32> to vector<8x10xf32>
    %760 = arith.subf %756, %759 : vector<8x10xf32>
    %761 = math.exp %760 : vector<8x10xf32>
    %cst_326 = arith.constant dense<0.000000e+00> : vector<8xf32>
    %762 = vector.multi_reduction <add>, %761, %cst_326 [1] : vector<8x10xf32> to vector<8xf32>
    %763 = vector.shape_cast %762 : vector<8xf32> to vector<8x1xf32>
    %764 = tpu.reciprocal %763 {approx = true} : vector<8x1xf32> -> vector<8x1xf32>
    %765 = vector.broadcast %764 : vector<8x1xf32> to vector<8x10xf32>
    %766 = arith.mulf %761, %765 : vector<8x10xf32>
    %cst_327 = arith.constant dense<0.000000e+00> : vector<8x8xf32>
    %767 = tpu.matmul %766, %755, %cst_327 {dimension_numbers = #tpu.dot_dimension_numbers<[1], [0], [0], [1], [0, 0, 1, 1], [], []>} : vector<8x10xf32>, vector<10x8xf32>, vector<8x8xf32> -> vector<8x8xf32>
    %c24_328 = arith.constant 24 : index
    %c0_329 = arith.constant 0 : index
    %768 = vector.load %arg21[%c24_328, %c0_329] : memref<32x32xf32, #tpu.memory_space<vmem>>, vector<8x32xf32>
    %cst_330 = arith.constant dense<0.000000e+00> : vector<8x32xf32>
    %769 = tpu.matmul %767, %768, %cst_330 {dimension_numbers = #tpu.dot_dimension_numbers<[1], [0], [0], [1], [0, 0, 1, 1], [], []>} : vector<8x8xf32>, vector<8x32xf32>, vector<8x32xf32> -> vector<8x32xf32>
    %770 = arith.addf %752, %769 : vector<8x32xf32>
    %c0_331 = arith.constant 0 : index
    %c0_332 = arith.constant 0 : index
    %771 = vector.load %arg20[%c0_331, %c0_332] : memref<1x32xf32, #tpu.memory_space<vmem>>, vector<1x32xf32>
    %772 = vector.broadcast %771 : vector<1x32xf32> to vector<8x32xf32>
    %773 = arith.addf %770, %772 : vector<8x32xf32>
    %774 = arith.addf %683, %773 : vector<8x32xf32>
    %c0_333 = arith.constant 0 : index
    %c0_334 = arith.constant 0 : index
    %775 = vector.load %arg31[%c0_333, %c0_334] : memref<1x32xf32, #tpu.memory_space<vmem>>, vector<1x32xf32>
    %c0_335 = arith.constant 0 : index
    %c0_336 = arith.constant 0 : index
    %776 = vector.load %arg30[%c0_335, %c0_336] : memref<1x32xf32, #tpu.memory_space<vmem>>, vector<1x32xf32>
    %cst_337 = arith.constant dense<0.000000e+00> : vector<8xf32>
    %777 = vector.multi_reduction <add>, %774, %cst_337 [1] : vector<8x32xf32> to vector<8xf32>
    %778 = vector.shape_cast %777 : vector<8xf32> to vector<8x1xf32>
    %cst_338 = arith.constant 3.200000e+01 : f32
    %779 = vector.broadcast %cst_338 : f32 to vector<8x1xf32>
    %780 = arith.divf %778, %779 : vector<8x1xf32>
    %781 = vector.broadcast %780 : vector<8x1xf32> to vector<8x32xf32>
    %782 = arith.subf %774, %781 : vector<8x32xf32>
    %783 = arith.mulf %782, %782 : vector<8x32xf32>
    %cst_339 = arith.constant dense<0.000000e+00> : vector<8xf32>
    %784 = vector.multi_reduction <add>, %783, %cst_339 [1] : vector<8x32xf32> to vector<8xf32>
    %785 = vector.shape_cast %784 : vector<8xf32> to vector<8x1xf32>
    %cst_340 = arith.constant 3.200000e+01 : f32
    %786 = vector.broadcast %cst_340 : f32 to vector<8x1xf32>
    %787 = arith.divf %785, %786 : vector<8x1xf32>
    %cst_341 = arith.constant 9.99999974E-6 : f32
    %788 = vector.broadcast %cst_341 : f32 to vector<8x1xf32>
    %789 = arith.addf %787, %788 : vector<8x1xf32>
    %790 = math.rsqrt %789 : vector<8x1xf32>
    %791 = vector.broadcast %790 : vector<8x1xf32> to vector<8x32xf32>
    %792 = arith.mulf %782, %791 : vector<8x32xf32>
    %793 = vector.broadcast %775 : vector<1x32xf32> to vector<8x32xf32>
    %794 = arith.mulf %792, %793 : vector<8x32xf32>
    %795 = vector.broadcast %776 : vector<1x32xf32> to vector<8x32xf32>
    %796 = arith.addf %794, %795 : vector<8x32xf32>
    %c0_342 = arith.constant 0 : index
    %c0_343 = arith.constant 0 : index
    %797 = vector.load %arg25[%c0_342, %c0_343] : memref<32x64xf32, #tpu.memory_space<vmem>>, vector<32x64xf32>
    %cst_344 = arith.constant dense<0.000000e+00> : vector<8x64xf32>
    %798 = tpu.matmul %796, %797, %cst_344 {dimension_numbers = #tpu.dot_dimension_numbers<[1], [0], [0], [1], [0, 0, 1, 1], [], []>} : vector<8x32xf32>, vector<32x64xf32>, vector<8x64xf32> -> vector<8x64xf32>
    %c0_345 = arith.constant 0 : index
    %c0_346 = arith.constant 0 : index
    %799 = vector.load %arg24[%c0_345, %c0_346] : memref<1x64xf32, #tpu.memory_space<vmem>>, vector<1x64xf32>
    %800 = vector.broadcast %799 : vector<1x64xf32> to vector<8x64xf32>
    %801 = arith.addf %798, %800 : vector<8x64xf32>
    %cst_347 = arith.constant 0.000000e+00 : f32
    %802 = vector.broadcast %cst_347 : f32 to vector<8x64xf32>
    %803 = arith.maximumf %801, %802 : vector<8x64xf32>
    %c0_348 = arith.constant 0 : index
    %c0_349 = arith.constant 0 : index
    %804 = vector.load %arg27[%c0_348, %c0_349] : memref<64x32xf32, #tpu.memory_space<vmem>>, vector<64x32xf32>
    %cst_350 = arith.constant dense<0.000000e+00> : vector<8x32xf32>
    %805 = tpu.matmul %803, %804, %cst_350 {dimension_numbers = #tpu.dot_dimension_numbers<[1], [0], [0], [1], [0, 0, 1, 1], [], []>} : vector<8x64xf32>, vector<64x32xf32>, vector<8x32xf32> -> vector<8x32xf32>
    %c0_351 = arith.constant 0 : index
    %c0_352 = arith.constant 0 : index
    %806 = vector.load %arg26[%c0_351, %c0_352] : memref<1x32xf32, #tpu.memory_space<vmem>>, vector<1x32xf32>
    %807 = vector.broadcast %806 : vector<1x32xf32> to vector<8x32xf32>
    %808 = arith.addf %805, %807 : vector<8x32xf32>
    %809 = arith.addf %796, %808 : vector<8x32xf32>
    %c0_353 = arith.constant 0 : index
    %c0_354 = arith.constant 0 : index
    %810 = vector.load %arg33[%c0_353, %c0_354] : memref<1x32xf32, #tpu.memory_space<vmem>>, vector<1x32xf32>
    %c0_355 = arith.constant 0 : index
    %c0_356 = arith.constant 0 : index
    %811 = vector.load %arg32[%c0_355, %c0_356] : memref<1x32xf32, #tpu.memory_space<vmem>>, vector<1x32xf32>
    %cst_357 = arith.constant dense<0.000000e+00> : vector<8xf32>
    %812 = vector.multi_reduction <add>, %809, %cst_357 [1] : vector<8x32xf32> to vector<8xf32>
    %813 = vector.shape_cast %812 : vector<8xf32> to vector<8x1xf32>
    %cst_358 = arith.constant 3.200000e+01 : f32
    %814 = vector.broadcast %cst_358 : f32 to vector<8x1xf32>
    %815 = arith.divf %813, %814 : vector<8x1xf32>
    %816 = vector.broadcast %815 : vector<8x1xf32> to vector<8x32xf32>
    %817 = arith.subf %809, %816 : vector<8x32xf32>
    %818 = arith.mulf %817, %817 : vector<8x32xf32>
    %cst_359 = arith.constant dense<0.000000e+00> : vector<8xf32>
    %819 = vector.multi_reduction <add>, %818, %cst_359 [1] : vector<8x32xf32> to vector<8xf32>
    %820 = vector.shape_cast %819 : vector<8xf32> to vector<8x1xf32>
    %cst_360 = arith.constant 3.200000e+01 : f32
    %821 = vector.broadcast %cst_360 : f32 to vector<8x1xf32>
    %822 = arith.divf %820, %821 : vector<8x1xf32>
    %cst_361 = arith.constant 9.99999974E-6 : f32
    %823 = vector.broadcast %cst_361 : f32 to vector<8x1xf32>
    %824 = arith.addf %822, %823 : vector<8x1xf32>
    %825 = math.rsqrt %824 : vector<8x1xf32>
    %826 = vector.broadcast %825 : vector<8x1xf32> to vector<8x32xf32>
    %827 = arith.mulf %817, %826 : vector<8x32xf32>
    %828 = vector.broadcast %810 : vector<1x32xf32> to vector<8x32xf32>
    %829 = arith.mulf %827, %828 : vector<8x32xf32>
    %830 = vector.broadcast %811 : vector<1x32xf32> to vector<8x32xf32>
    %831 = arith.addf %829, %830 : vector<8x32xf32>
    %c0_362 = arith.constant 0 : index
    %c0_363 = arith.constant 0 : index
    %832 = vector.load %arg39[%c0_362, %c0_363] : memref<1x32xf32, #tpu.memory_space<vmem>>, vector<1x32xf32>
    %c0_364 = arith.constant 0 : index
    %c0_365 = arith.constant 0 : index
    %833 = vector.load %arg38[%c0_364, %c0_365] : memref<1x32xf32, #tpu.memory_space<vmem>>, vector<1x32xf32>
    %cst_366 = arith.constant dense<0.000000e+00> : vector<8xf32>
    %834 = vector.multi_reduction <add>, %831, %cst_366 [1] : vector<8x32xf32> to vector<8xf32>
    %835 = vector.shape_cast %834 : vector<8xf32> to vector<8x1xf32>
    %cst_367 = arith.constant 3.200000e+01 : f32
    %836 = vector.broadcast %cst_367 : f32 to vector<8x1xf32>
    %837 = arith.divf %835, %836 : vector<8x1xf32>
    %838 = vector.broadcast %837 : vector<8x1xf32> to vector<8x32xf32>
    %839 = arith.subf %831, %838 : vector<8x32xf32>
    %840 = arith.mulf %839, %839 : vector<8x32xf32>
    %cst_368 = arith.constant dense<0.000000e+00> : vector<8xf32>
    %841 = vector.multi_reduction <add>, %840, %cst_368 [1] : vector<8x32xf32> to vector<8xf32>
    %842 = vector.shape_cast %841 : vector<8xf32> to vector<8x1xf32>
    %cst_369 = arith.constant 3.200000e+01 : f32
    %843 = vector.broadcast %cst_369 : f32 to vector<8x1xf32>
    %844 = arith.divf %842, %843 : vector<8x1xf32>
    %cst_370 = arith.constant 9.99999974E-6 : f32
    %845 = vector.broadcast %cst_370 : f32 to vector<8x1xf32>
    %846 = arith.addf %844, %845 : vector<8x1xf32>
    %847 = math.rsqrt %846 : vector<8x1xf32>
    %848 = vector.broadcast %847 : vector<8x1xf32> to vector<8x32xf32>
    %849 = arith.mulf %839, %848 : vector<8x32xf32>
    %850 = vector.broadcast %832 : vector<1x32xf32> to vector<8x32xf32>
    %851 = arith.mulf %849, %850 : vector<8x32xf32>
    %852 = vector.broadcast %833 : vector<1x32xf32> to vector<8x32xf32>
    %853 = arith.addf %851, %852 : vector<8x32xf32>
    %c0_371 = arith.constant 0 : index
    %c0_372 = arith.constant 0 : index
    %854 = vector.load %arg67[%c0_371, %c0_372] : memref<32x128xf32, #tpu.memory_space<vmem>>, vector<32x128xf32>
    %cst_373 = arith.constant dense<0.000000e+00> : vector<8x128xf32>
    %855 = tpu.matmul %853, %854, %cst_373 {dimension_numbers = #tpu.dot_dimension_numbers<[1], [0], [0], [1], [0, 0, 1, 1], [], []>} : vector<8x32xf32>, vector<32x128xf32>, vector<8x128xf32> -> vector<8x128xf32>
    %c0_374 = arith.constant 0 : index
    %c0_375 = arith.constant 0 : index
    %856 = vector.load %arg66[%c0_374, %c0_375] : memref<1x128xf32, #tpu.memory_space<vmem>>, vector<1x128xf32>
    %857 = vector.broadcast %856 : vector<1x128xf32> to vector<8x128xf32>
    %858 = arith.addf %855, %857 : vector<8x128xf32>
    %cst_376 = arith.constant dense<0xFF800000> : vector<8xf32>
    %859 = vector.multi_reduction <maximumf>, %858, %cst_376 [1] : vector<8x128xf32> to vector<8xf32>
    %860 = vector.shape_cast %859 : vector<8xf32> to vector<8x1xf32>
    %861 = vector.broadcast %860 : vector<8x1xf32> to vector<8x128xf32>
    %862 = arith.subf %858, %861 : vector<8x128xf32>
    %863 = math.exp %862 : vector<8x128xf32>
    %cst_377 = arith.constant dense<0.000000e+00> : vector<8xf32>
    %864 = vector.multi_reduction <add>, %863, %cst_377 [1] : vector<8x128xf32> to vector<8xf32>
    %865 = vector.shape_cast %864 : vector<8xf32> to vector<8x1xf32>
    %866 = tpu.reciprocal %865 : vector<8x1xf32> -> vector<8x1xf32>
    %867 = vector.broadcast %866 : vector<8x1xf32> to vector<8x128xf32>
    %868 = arith.mulf %863, %867 : vector<8x128xf32>
    %c0_378 = arith.constant 0 : index
    %c0_379 = arith.constant 0 : index
    %869 = vector.load %arg68[%c0_378, %c0_379] : memref<8x128xf32, #tpu.memory_space<vmem>>, vector<8x128xf32>
    tpu.vector_store %arg68[%c0_378, %c0_379], %868 {strides = array<i32>} : memref<8x128xf32, #tpu.memory_space<vmem>>, vector<8x128xf32>,
    return
  }
}

</mosaic_0001>

<bundles_post_ra>
// kernel: forward.1
= control target key start
LH: loop header
LB: loop body
LE: loop exit
PB: predicated region body
PF: predicated region fallthrough
CT: control target
= control target key end

     0   :  { %s11503_s6 = smov 1   ;;  %s11504_s10 = smov 2   ;;  %s12976_s0 = inlined_call_operand.smem [shape: u32[69], index: -1, kind: input, shape index: {}] }
   0x1   :  { %s11623_s5 = sld [smem:[%s12976_s0]]   ;;  %s11505_s14 = smov 3  }
   0x2   :  { %s11628_s9 = sld [smem:[%s12976_s0 + %s11503_s6]]   ;;  %s11506_s18 = smov 4  }
   0x3   :  { %s11633_s13 = sld [smem:[%s12976_s0 + %s11504_s10]]   ;;  %s11507_s22 = smov 5  }
   0x4   :  { %s11638_s17 = sld [smem:[%s12976_s0 + %s11505_s14]]   ;;  %s11508_s26 = smov 6  }
   0x5   :  { %s11643_s21 = sld [smem:[%s12976_s0 + %s11506_s18]]   ;;  %s11509_s30 = smov 7  }
   0x6   :  { %s11648_s25 = sld [smem:[%s12976_s0 + %s11507_s22]]   ;;  %s11510_s4 = smov 8  }
   0x7   :  { %13010 = sst [smem:[#allocation63_spill]] %s11623_s5  ;;  %s11511_s10 = smov 9  }
   0x8   :  { %13011 = sst [smem:[#allocation64_spill]] %s11628_s9  ;;  %s11512_s15 = smov 10  }
   0x9   :  { %13012 = sst [smem:[#allocation65_spill]] %s11633_s13  ;;  %s11513_s20 = smov 11  }
   0xa   :  { %13013 = sst [smem:[#allocation66_spill]] %s11638_s17  ;;  %s11515_s1 = smov 13  }
   0xb   :  { %13014 = sst [smem:[#allocation67_spill]] %s11643_s21  ;;  %s11516_s7 = smov 14  }
   0xc   :  { %13015 = sst [smem:[#allocation68_spill]] %s11648_s25  ;;  %s11518_s22 = smov 16  }
   0xd   :  { %s11653_s29 = sld [smem:[%s12976_s0 + %s11508_s26]]   ;;  %s11514_s26 = smov 12  }
   0xe   :  { %s11658_s3 = sld [smem:[%s12976_s0 + %s11509_s30]]   ;;  %s11519_s28 = smov 17  }
   0xf   :  { %s11663_s8 = sld [smem:[%s12976_s0 + %s11510_s4]]  }
  0x10   :  { %s11668_s14 = sld [smem:[%s12976_s0 + %s11511_s10]]  }
  0x11   :  { %s11673_s19 = sld [smem:[%s12976_s0 + %s11512_s15]]   ;;  %s11517_s15 = smov 15  }
  0x12   :  { %s11678_s24 = sld [smem:[%s12976_s0 + %s11513_s20]]  }
  0x13   :  { %13016 = sst [smem:[#allocation69_spill]] %s11653_s29 }
  0x14   :  { %13017 = sst [smem:[#allocation70_spill]] %s11658_s3 }
  0x15   :  { %13018 = sst [smem:[#allocation71_spill]] %s11663_s8 }
  0x16   :  { %13019 = sst [smem:[#allocation72_spill]] %s11668_s14 }
  0x17   :  { %13020 = sst [smem:[#allocation73_spill]] %s11673_s19 }
  0x18   :  { %13021 = sst [smem:[#allocation74_spill]] %s11678_s24 }
  0x19   :  { %s11683_s30 = sld [smem:[%s12976_s0 + %s11514_s26]]  }
  0x1a   :  { %s11688_s6 = sld [smem:[%s12976_s0 + %s11515_s1]]  }
  0x1b   :  { %s11693_s12 = sld [smem:[%s12976_s0 + %s11516_s7]]   ;;  %s11520_s7 = smov 18  }
  0x1c   :  { %s11698_s20 = sld [smem:[%s12976_s0 + %s11517_s15]]   ;;  %s11521_s15 = smov 19  }
  0x1d   :  { %s11703_s27 = sld [smem:[%s12976_s0 + %s11518_s22]]   ;;  %s11522_s22 = smov 20  }
  0x1e   :  { %s11708_s4 = sld [smem:[%s12976_s0 + %s11519_s28]]   ;;  %s11523_s28 = smov 21  }
  0x1f   :  { %13022 = sst [smem:[#allocation75_spill]] %s11683_s30 }
  0x20   :  { %13023 = sst [smem:[#allocation76_spill]] %s11688_s6 }
  0x21   :  { %13024 = sst [smem:[#allocation77_spill]] %s11693_s12 }
  0x22   :  { %13025 = sst [smem:[#allocation78_spill]] %s11698_s20 }
  0x23   :  { %13026 = sst [smem:[#allocation79_spill]] %s11703_s27 }
  0x24   :  { %13027 = sst [smem:[#allocation80_spill]] %s11708_s4 }
  0x25   :  { %s11713_s12 = sld [smem:[%s12976_s0 + %s11520_s7]]   ;;  %s11524_s7 = smov 22  }
  0x26   :  { %s11718_s20 = sld [smem:[%s12976_s0 + %s11521_s15]]   ;;  %s11525_s15 = smov 23  }
  0x27   :  { %s11723_s8 = sld [smem:[%s12976_s0 + %s11522_s22]]   ;;  %s11526_s22 = smov 24  }
  0x28   :  { %s11728_s29 = sld [smem:[%s12976_s0 + %s11523_s28]]   ;;  %s11527_s28 = smov 25  }
  0x29   :  { %s11733_s30 = sld [smem:[%s12976_s0 + %s11524_s7]]   ;;  %s11528_s7 = smov 26  }
  0x2a   :  { %s11738_s6 = sld [smem:[%s12976_s0 + %s11525_s15]]   ;;  %s11529_s15 = smov 27  }
  0x2b   :  { %13028 = sst [smem:[#allocation81_spill]] %s11713_s12 }
  0x2c   :  { %13029 = sst [smem:[#allocation82_spill]] %s11718_s20 }
  0x2d   :  { %13030 = sst [smem:[#allocation83_spill]] %s11723_s8 }
  0x2e   :  { %13031 = sst [smem:[#allocation84_spill]] %s11728_s29 }
  0x2f   :  { %13032 = sst [smem:[#allocation85_spill]] %s11733_s30 }
  0x30   :  { %13033 = sst [smem:[#allocation86_spill]] %s11738_s6 }
  0x31   :  { %s11743_s8 = sld [smem:[%s12976_s0 + %s11526_s22]]   ;;  %s11530_s22 = smov 28  }
  0x32   :  { %s11748_s29 = sld [smem:[%s12976_s0 + %s11527_s28]]   ;;  %s11531_s28 = smov 29  }
  0x33   :  { %s11753_s30 = sld [smem:[%s12976_s0 + %s11528_s7]]   ;;  %s11532_s7 = smov 30  }
  0x34   :  { %s11758_s6 = sld [smem:[%s12976_s0 + %s11529_s15]]   ;;  %s11533_s15 = smov 31  }
  0x37   :  { %13034 = sst [smem:[#allocation87_spill]] %s11743_s8 }
  0x38   :  { %13035 = sst [smem:[#allocation88_spill]] %s11748_s29 }
  0x39   :  { %13036 = sst [smem:[#allocation89_spill]] %s11753_s30 }
  0x3a   :  { %13037 = sst [smem:[#allocation90_spill]] %s11758_s6 }
  0x3b   :  { %s11763_s8 = sld [smem:[%s12976_s0 + %s11530_s22]]   ;;  %s11534_s22 = smov 32  }
  0x3c   :  { %s11768_s29 = sld [smem:[%s12976_s0 + %s11531_s28]]   ;;  %s11535_s28 = smov 33  }
  0x3d   :  { %s11773_s30 = sld [smem:[%s12976_s0 + %s11532_s7]]   ;;  %s11536_s7 = smov 34  }
  0x3e   :  { %s11778_s6 = sld [smem:[%s12976_s0 + %s11533_s15]]   ;;  %s11537_s15 = smov 35  }
  0x3f   :  { %s11788_s14 = sld [smem:[%s12976_s0 + %s11535_s28]]   ;;  %s11539_s28 = smov 37  }
  0x40   :  { %s11793_s3 = sld [smem:[%s12976_s0 + %s11536_s7]]   ;;  %s11540_s7 = smov 38  }
  0x41   :  { %13038 = sst [smem:[#allocation91_spill]] %s11763_s8 }
  0x42   :  { %s11783_s8 = sld [smem:[%s12976_s0 + %s11534_s22]]   ;;  %s11538_s22 = smov 36  }
  0x43   :  { %s11798_s13 = sld [smem:[%s12976_s0 + %s11537_s15]]   ;;  %s11541_s15 = smov 39  }
  0x44   :  { %13039 = sst [smem:[#allocation92_spill]] %s11778_s6 }
  0x45   :  { %13040 = sst [smem:[#allocation93_spill]] %s11788_s14 }
  0x46   :  { %s11803_s17 = sld [smem:[%s12976_s0 + %s11538_s22]]   ;;  %s11542_s22 = smov 40  }
  0x47   :  { %s11808_s19 = sld [smem:[%s12976_s0 + %s11539_s28]]   ;;  %s11543_s28 = smov 41  }
  0x48   :  { %s11813_s24 = sld [smem:[%s12976_s0 + %s11540_s7]]   ;;  %s11544_s7 = smov 42  }
  0x49   :  { %13041 = sst [smem:[#allocation94_spill]] %s11798_s13 }
  0x4a   :  { %s11818_s13 = sld [smem:[%s12976_s0 + %s11541_s15]]   ;;  %s11545_s15 = smov 43  }
  0x4b   :  { %s11823_s21 = sld [smem:[%s12976_s0 + %s11542_s22]]   ;;  %s11546_s22 = smov 44  }
  0x4c   :  { %13042 = sst [smem:[#allocation95_spill]] %s11803_s17 }
  0x4d   :  { %13043 = sst [smem:[#allocation96_spill]] %s11808_s19 }
  0x4e   :  { %s11828_s19 = sld [smem:[%s12976_s0 + %s11543_s28]]   ;;  %s11547_s28 = smov 45  }
  0x4f   :  { %s11833_s25 = sld [smem:[%s12976_s0 + %s11544_s7]]   ;;  %s11548_s7 = smov 46  }
  0x50   :  { %13044 = sst [smem:[#allocation97_spill]] %s11818_s13 }
  0x51   :  { %s11838_s27 = sld [smem:[%s12976_s0 + %s11545_s15]]   ;;  %s11549_s15 = smov 47  }
  0x52   :  { %s11843_s4 = sld [smem:[%s12976_s0 + %s11546_s22]]   ;;  %s11550_s22 = smov 48  }
  0x53   :  { %s11848_s12 = sld [smem:[%s12976_s0 + %s11547_s28]]   ;;  %s11551_s28 = smov 49  }
  0x54   :  { %13045 = sst [smem:[#allocation98_spill]] %s11828_s19 }
  0x55   :  { %13046 = sst [smem:[#allocation99_spill]] %s11833_s25 }
  0x56   :  { %s11853_s9 = sld [smem:[%s12976_s0 + %s11548_s7]]   ;;  %s11552_s7 = smov 50  }
  0x57   :  { %13047 = sst [smem:[#allocation100_spill]] %s11838_s27 }
  0x58   :  { %s11858_s20 = sld [smem:[%s12976_s0 + %s11549_s15]]   ;;  %s11553_s15 = smov 51  }
  0x59   :  { %13048 = sst [smem:[#allocation101_spill]] %s11848_s12 }
  0x5a   :  { %s11863_s27 = sld [smem:[%s12976_s0 + %s11550_s22]]   ;;  %s11554_s22 = smov 52  }
  0x5b   :  { %s11868_s12 = sld [smem:[%s12976_s0 + %s11551_s28]]   ;;  %s11555_s28 = smov 53  }
  0x5c   :  { %13049 = sst [smem:[#allocation102_spill]] %s11853_s9 }
  0x5d   :  { %s11873_s19 = sld [smem:[%s12976_s0 + %s11552_s7]]   ;;  %s11556_s7 = smov 54  }
  0x5e   :  { %s11878_s5 = sld [smem:[%s12976_s0 + %s11553_s15]]   ;;  %s11557_s15 = smov 55  }
  0x5f   :  { %s11888_s9 = sld [smem:[%s12976_s0 + %s11555_s28]]   ;;  %s11559_s28 = smov 57  }
  0x60   :  { %13050 = sst [smem:[#allocation103_spill]] %s11863_s27 }
  0x61   :  { %s11883_s27 = sld [smem:[%s12976_s0 + %s11554_s22]]   ;;  %s11558_s22 = smov 56  }
  0x62   :  { %s11903_s25 = sld [smem:[%s12976_s0 + %s11558_s22]]   ;;  %s11562_s22 = smov 60  }
  0x63   :  { %13051 = sst [smem:[#allocation104_spill]] %s11873_s19 }
  0x64   :  { %13052 = sst [smem:[#allocation105_spill]] %s11878_s5 }
  0x65   :  { %13053 = sst [smem:[#allocation106_spill]] %s11888_s9 }
  0x66   :  { %s11893_s19 = sld [smem:[%s12976_s0 + %s11556_s7]]   ;;  %s11560_s7 = smov 58  }
  0x67   :  { %s11898_s5 = sld [smem:[%s12976_s0 + %s11557_s15]]   ;;  %s11561_s15 = smov 59  }
  0x68   :  { %s11908_s9 = sld [smem:[%s12976_s0 + %s11559_s28]]   ;;  %s11563_s28 = smov 61  }
  0x69   :  { %s11923_s13 = sld [smem:[%s12976_s0 + %s11562_s22]]   ;;  %s11566_s22 = smov 64  }
  0x6c   :  { %13054 = sst [smem:[#allocation107_spill]] %s11893_s19 }
  0x6d   :  { %13055 = sst [smem:[#allocation108_spill]] %s11898_s5 }
  0x6e   :  { %13056 = sst [smem:[#allocation109_spill]] %s11908_s9 }
  0x6f   :  { %s11913_s19 = sld [smem:[%s12976_s0 + %s11560_s7]]   ;;  %s11564_s7 = smov 62  }
  0x70   :  { %s11918_s5 = sld [smem:[%s12976_s0 + %s11561_s15]]   ;;  %s11565_s15 = smov 63  }
  0x71   :  { %13058 = sst [smem:[#allocation111_spill]] %s11923_s13 }
  0x72   :  { %s11928_s9 = sld [smem:[%s12976_s0 + %s11563_s28]]   ;;  %s11567_s28 = smov 65  }
  0x73   :  { %s11938_s17 = sld [smem:[%s12976_s0 + %s11565_s15]]   ;;  %s11569_s15 = smov 67  }
  0x74   :  { %s11943_s13 = sld [smem:[%s12976_s0 + %s11566_s22]]   ;;  %s11570_s22 = smov 68  }
  0x75   :  { %13057 = sst [smem:[#allocation110_spill]] %s11913_s19 }
  0x76   :  { %s11933_s19 = sld [smem:[%s12976_s0 + %s11564_s7]]   ;;  %s11568_s7 = smov 66  }
  0x77   :  { %s11948_s14 = sld [smem:[%s12976_s0 + %s11567_s28]]  }
  0x78   :  { %s11963_s6 = sld [smem:[%s12976_s0 + %s11570_s22]]  }
  0x79   :  { %13060 = sst [smem:[#allocation113_spill]] %s11938_s17 }
  0x7a   :  { %s11958_s17 = sld [smem:[%s12976_s0 + %s11569_s15]]  }
  0x7c   :  { %13059 = sst [smem:[#allocation112_spill]] %s11933_s19 }
  0x7d   :  { %s11953_s19 = sld [smem:[%s12976_s0 + %s11568_s7]]  }
  0x7e   :  { %142 = vsyncpa [#allocation3], 0 }
  0x7f   :  { %143 = vsyncpa [#allocation6], 0 }
  0x80   :  { %144 = vsyncpa [#allocation9], 0 }
  0x81   :  { %145 = vsyncpa [#allocation12], 0 }
  0x82   :  { %146 = vsyncpa [#allocation15], 0 }
  0x83   :  { %147 = vsyncpa [#allocation18], 0 }
  0x84   :  { %148 = vsyncpa [#allocation21], 0 }
  0x85   :  { %149 = vsyncpa [#allocation24], 0 }
  0x86   :  { %150 = vsyncpa [#allocation27], 0 }
  0x87   :  { %151 = vsyncpa [#allocation30], 0 }
  0x88   :  { %152 = vsyncpa [#allocation33], 0 }
  0x89   :  { %153 = vsyncpa [#allocation36], 0 }
  0x8a   :  { %154 = vsyncpa [#allocation39], 0 }
  0x8b   :  { %155 = vsyncpa [#allocation42], 0 }
  0x8c   :  { %156 = vsyncpa [#allocation45], 0 }
  0x8d   :  { %157 = vsyncpa [#allocation4], 0  ;;  %s11571_s0 = smov [#allocation5]   ;;  %s11572_s1 = smov [#allocation8]  }
  0x8e   :  { %s232_s28 = sshll.u32 %s11571_s0, 4  ;;  %s252_s2 = sshll.u32 %s11572_s1, 4  ;;  %s233_s28 = int_to_ptr.vmem [resolvable:$true] %s232_s28  ;;  %s253_s2 = int_to_ptr.vmem [resolvable:$true] %s252_s2 }
  0x8f   :  { %s10833_s7 = scalar_lea.hbm %s11773_s30, 16 }
  0x90   :  { %p10834_p0 = scmp.ne.s32.totalorder %s11773_s30, %s10833_s7  ;;  %p10837_p1 = scmp.lt.u32.totalorder %s10833_s7, %s11773_s30 }
  0x92   :  { %p10839_p2 = pnand %p10837_p1, %p10834_p0 }
  0x94   :  { %10842 = shalt.err (!%p10839_p2)
}
  0x95   :  { %s10843_s10 = scalar_lea.vmem %s233_s28, 16  ;;  %s10847_s11 = scalar_lea.vmem %s233_s28, 32 }
  0x96   :  { %p10844_p3 = scmp.ne.s32.totalorder %s233_s28, %s10843_s10  ;;  %p10848_p4 = scmp.lt.s32.totalorder %s233_s28, %s233_s28 }
  0x97   :  { %p10849_p5 = scmp.lt.s32.totalorder %s10847_s11, %s10843_s10 }
  0x99   :  { %p10850_p6 = por %p10849_p5, %p10848_p4 }
  0x9b   :  { %p10851_p7 = pnand %p10850_p6, %p10844_p3 }
  0x9d   :  { %10854 = shalt.err (!%p10851_p7)
}
  0x9e   :  { %235 = dma.hbm_to_vmem [thread:$0]  %s11773_s30, 16, %s233_s28, [#allocation6]  }
  0x9f   :  { %s10855_s15 = scalar_lea.hbm %s11783_s8, 16 }
  0xa0   :  { %p10856_p8 = scmp.ne.s32.totalorder %s11783_s8, %s10855_s15  ;;  %p10859_p9 = scmp.lt.u32.totalorder %s10855_s15, %s11783_s8 }
  0xa2   :  { %p10861_p10 = pnand %p10859_p9, %p10856_p8 }
  0xa4   :  { %10864 = shalt.err (!%p10861_p10)
}
  0xa5   :  { %s10865_s16 = scalar_lea.vmem %s253_s2, 16  ;;  %s10869_s18 = scalar_lea.vmem %s253_s2, 32 }
  0xa6   :  { %p10866_p11 = scmp.ne.s32.totalorder %s253_s2, %s10865_s16  ;;  %p10870_p12 = scmp.lt.s32.totalorder %s253_s2, %s253_s2 }
  0xa7   :  { %p10871_p13 = scmp.lt.s32.totalorder %s10869_s18, %s10865_s16 }
  0xa9   :  { %p10872_p0 = por %p10871_p13, %p10870_p12 }
  0xab   :  { %p10873_p1 = pnand %p10872_p0, %p10866_p11 }
  0xad   :  { %10876 = shalt.err (!%p10873_p1)
}
  0xae   :  { %255 = dma.hbm_to_vmem [thread:$0]  %s11783_s8, 16, %s253_s2, [#allocation9]  }
  0xaf   :  { %s11573_s22 = smov [#allocation11]   ;;  %s11574_s23 = smov [#allocation14]  }
  0xb0   :  { %s272_s30 = sshll.u32 %s11573_s22, 4  ;;  %s296_s26 = sshll.u32 %s11574_s23, 4  ;;  %s273_s30 = int_to_ptr.vmem [resolvable:$true] %s272_s30  ;;  %s297_s26 = int_to_ptr.vmem [resolvable:$true] %s296_s26 }
  0xb1   :  { %s10877_s0 = scalar_lea.hbm %s11793_s3, 16 }
  0xb2   :  { %p10878_p2 = scmp.ne.s32.totalorder %s11793_s3, %s10877_s0  ;;  %p10881_p3 = scmp.lt.u32.totalorder %s10877_s0, %s11793_s3 }
  0xb4   :  { %p10883_p4 = pnand %p10881_p3, %p10878_p2 }
  0xb6   :  { %10886 = shalt.err (!%p10883_p4)
}
  0xb7   :  { %s10887_s28 = scalar_lea.vmem %s273_s30, 16  ;;  %s10891_s1 = scalar_lea.vmem %s273_s30, 32 }
  0xb8   :  { %p10888_p5 = scmp.ne.s32.totalorder %s273_s30, %s10887_s28  ;;  %p10892_p6 = scmp.lt.s32.totalorder %s273_s30, %s273_s30 }
  0xb9   :  { %p10893_p7 = scmp.lt.s32.totalorder %s10891_s1, %s10887_s28 }
  0xbb   :  { %p10894_p8 = por %p10893_p7, %p10892_p6 }
  0xbd   :  { %p10895_p9 = pnand %p10894_p8, %p10888_p5 }
  0xbf   :  { %10898 = shalt.err (!%p10895_p9)
}
  0xc0   :  { %275 = dma.hbm_to_vmem [thread:$0]  %s11793_s3, 16, %s273_s30, [#allocation12]  }
  0xc1   :  { %s10899_s8 = scalar_lea.hbm %s11813_s24, 16 }
  0xc2   :  { %p10900_p10 = scmp.ne.s32.totalorder %s11813_s24, %s10899_s8  ;;  %p10903_p11 = scmp.lt.u32.totalorder %s10899_s8, %s11813_s24 }
  0xc4   :  { %p10905_p12 = pnand %p10903_p11, %p10900_p10 }
  0xc6   :  { %10908 = shalt.err (!%p10905_p12)
}
  0xc7   :  { %s10909_s2 = scalar_lea.vmem %s297_s26, 16  ;;  %s10913_s7 = scalar_lea.vmem %s297_s26, 32 }
  0xc8   :  { %p10910_p13 = scmp.ne.s32.totalorder %s297_s26, %s10909_s2  ;;  %p10914_p0 = scmp.lt.s32.totalorder %s297_s26, %s297_s26 }
  0xc9   :  { %p10915_p1 = scmp.lt.s32.totalorder %s10913_s7, %s10909_s2 }
  0xcb   :  { %p10916_p2 = por %p10915_p1, %p10914_p0 }
  0xcd   :  { %p10917_p3 = pnand %p10916_p2, %p10910_p13 }
  0xcf   :  { %10920 = shalt.err (!%p10917_p3)
}
  0xd0   :  { %299 = dma.hbm_to_vmem [thread:$0]  %s11813_s24, 16, %s297_s26, [#allocation15]  }
  0xd1   :  { %s11575_s10 = smov [#allocation17]   ;;  %s11576_s11 = smov [#allocation20]  }
  0xd2   :  { %s316_s3 = sshll.u32 %s11575_s10, 4  ;;  %s340_s15 = sshll.u32 %s11576_s11, 4  ;;  %s317_s3 = int_to_ptr.vmem [resolvable:$true] %s316_s3  ;;  %s341_s15 = int_to_ptr.vmem [resolvable:$true] %s340_s15 }
  0xd3   :  { %s10921_s16 = scalar_lea.hbm %s11823_s21, 16 }
  0xd4   :  { %p10922_p4 = scmp.ne.s32.totalorder %s11823_s21, %s10921_s16  ;;  %p10925_p5 = scmp.lt.u32.totalorder %s10921_s16, %s11823_s21 }
  0xd6   :  { %p10927_p6 = pnand %p10925_p5, %p10922_p4 }
  0xd8   :  { %10930 = shalt.err (!%p10927_p6)
}
  0xd9   :  { %s10931_s18 = scalar_lea.vmem %s317_s3, 16  ;;  %s10935_s22 = scalar_lea.vmem %s317_s3, 32 }
  0xda   :  { %p10932_p7 = scmp.ne.s32.totalorder %s317_s3, %s10931_s18  ;;  %p10936_p8 = scmp.lt.s32.totalorder %s317_s3, %s317_s3 }
  0xdb   :  { %p10937_p9 = scmp.lt.s32.totalorder %s10935_s22, %s10931_s18 }
  0xdd   :  { %p10938_p10 = por %p10937_p9, %p10936_p8 }
  0xdf   :  { %p10939_p11 = pnand %p10938_p10, %p10932_p7 }
  0xe1   :  { %10942 = shalt.err (!%p10939_p11)
}
  0xe2   :  { %319 = dma.hbm_to_vmem [thread:$0]  %s11823_s21, 16, %s317_s3, [#allocation18]  }
  0xe3   :  { %s10943_s24 = scalar_lea.hbm %s11843_s4, 16 }
  0xe4   :  { %p10944_p12 = scmp.ne.s32.totalorder %s11843_s4, %s10943_s24  ;;  %p10947_p13 = scmp.lt.u32.totalorder %s10943_s24, %s11843_s4 }
  0xe6   :  { %p10949_p0 = pnand %p10947_p13, %p10944_p12 }
  0xe8   :  { %10952 = shalt.err (!%p10949_p0)
}
  0xe9   :  { %s10953_s30 = scalar_lea.vmem %s341_s15, 16  ;;  %s10957_s23 = scalar_lea.vmem %s341_s15, 32 }
  0xea   :  { %p10954_p1 = scmp.ne.s32.totalorder %s341_s15, %s10953_s30  ;;  %p10958_p2 = scmp.lt.s32.totalorder %s341_s15, %s341_s15 }
  0xeb   :  { %p10959_p3 = scmp.lt.s32.totalorder %s10957_s23, %s10953_s30 }
  0xed   :  { %p10960_p4 = por %p10959_p3, %p10958_p2 }
  0xef   :  { %p10961_p5 = pnand %p10960_p4, %p10954_p1 }
  0xf1   :  { %10964 = shalt.err (!%p10961_p5)
}
  0xf2   :  { %343 = dma.hbm_to_vmem [thread:$0]  %s11843_s4, 16, %s341_s15, [#allocation21]  }
  0xf3   :  { %s11577_s26 = smov [#allocation23]   ;;  %s11578_s0 = smov [#allocation26]  }
  0xf4   :  { %s362_s21 = sshll.u32 %s11577_s26, 4  ;;  %s382_s28 = sshll.u32 %s11578_s0, 4  ;;  %s363_s21 = int_to_ptr.vmem [resolvable:$true] %s362_s21  ;;  %s383_s28 = int_to_ptr.vmem [resolvable:$true] %s382_s28 }
  0xf5   :  { %s10965_s1 = scalar_lea.hbm %s11858_s20, 16 }
  0xf6   :  { %p10966_p6 = scmp.ne.s32.totalorder %s11858_s20, %s10965_s1  ;;  %p10969_p7 = scmp.lt.u32.totalorder %s10965_s1, %s11858_s20 }
  0xf8   :  { %p10971_p8 = pnand %p10969_p7, %p10966_p6 }
  0xfa   :  { %10974 = shalt.err (!%p10971_p8)
}
  0xfb   :  { %s10975_s8 = scalar_lea.vmem %s363_s21, 16  ;;  %s10979_s2 = scalar_lea.vmem %s363_s21, 32 }
  0xfc   :  { %p10976_p9 = scmp.ne.s32.totalorder %s363_s21, %s10975_s8  ;;  %p10980_p10 = scmp.lt.s32.totalorder %s363_s21, %s363_s21 }
  0xfd   :  { %p10981_p11 = scmp.lt.s32.totalorder %s10979_s2, %s10975_s8 }
  0xff   :  { %p10982_p12 = por %p10981_p11, %p10980_p10 }
 0x101   :  { %p10983_p13 = pnand %p10982_p12, %p10976_p9 }
 0x103   :  { %10986 = shalt.err (!%p10983_p13)
}
 0x104   :  { %365 = dma.hbm_to_vmem [thread:$0]  %s11858_s20, 16, %s363_s21, [#allocation24]  }
 0x105   :  { %s10987_s4 = scalar_lea.hbm %s11868_s12, 16 }
 0x106   :  { %p10988_p0 = scmp.ne.s32.totalorder %s11868_s12, %s10987_s4  ;;  %p10991_p1 = scmp.lt.u32.totalorder %s10987_s4, %s11868_s12 }
 0x108   :  { %p10993_p2 = pnand %p10991_p1, %p10988_p0 }
 0x10a   :  { %10996 = shalt.err (!%p10993_p2)
}
 0x10b   :  { %s10997_s7 = scalar_lea.vmem %s383_s28, 16  ;;  %s11001_s10 = scalar_lea.vmem %s383_s28, 32 }
 0x10c   :  { %p10998_p3 = scmp.ne.s32.totalorder %s383_s28, %s10997_s7  ;;  %p11002_p4 = scmp.lt.s32.totalorder %s383_s28, %s383_s28 }
 0x10d   :  { %p11003_p5 = scmp.lt.s32.totalorder %s11001_s10, %s10997_s7 }
 0x10f   :  { %p11004_p6 = por %p11003_p5, %p11002_p4 }
 0x111   :  { %p11005_p7 = pnand %p11004_p6, %p10998_p3 }
 0x113   :  { %11008 = shalt.err (!%p11005_p7)
}
 0x114   :  { %385 = dma.hbm_to_vmem [thread:$0]  %s11868_s12, 16, %s383_s28, [#allocation27]  }
 0x115   :  { %s11579_s3 = smov [#allocation29]   ;;  %s11580_s11 = smov [#allocation32]  }
 0x116   :  { %s404_s20 = sshll.u32 %s11579_s3, 4  ;;  %s428_s15 = sshll.u32 %s11580_s11, 4  ;;  %s405_s20 = int_to_ptr.vmem [resolvable:$true] %s404_s20  ;;  %s429_s15 = int_to_ptr.vmem [resolvable:$true] %s428_s15 }
 0x117   :  { %s11009_s16 = scalar_lea.hbm %s11883_s27, 16 }
 0x118   :  { %p11010_p8 = scmp.ne.s32.totalorder %s11883_s27, %s11009_s16  ;;  %p11013_p9 = scmp.lt.u32.totalorder %s11009_s16, %s11883_s27 }
 0x11a   :  { %p11015_p10 = pnand %p11013_p9, %p11010_p8 }
 0x11c   :  { %11018 = shalt.err (!%p11015_p10)
}
 0x11d   :  { %s11019_s18 = scalar_lea.vmem %s405_s20, 16  ;;  %s11023_s22 = scalar_lea.vmem %s405_s20, 32 }
 0x11e   :  { %p11020_p11 = scmp.ne.s32.totalorder %s405_s20, %s11019_s18  ;;  %p11024_p12 = scmp.lt.s32.totalorder %s405_s20, %s405_s20 }
 0x11f   :  { %p11025_p13 = scmp.lt.s32.totalorder %s11023_s22, %s11019_s18 }
 0x121   :  { %p11026_p0 = por %p11025_p13, %p11024_p12 }
 0x123   :  { %p11027_p1 = pnand %p11026_p0, %p11020_p11 }
 0x125   :  { %11030 = shalt.err (!%p11027_p1)
}
 0x126   :  { %407 = dma.hbm_to_vmem [thread:$0]  %s11883_s27, 16, %s405_s20, [#allocation30]  }
 0x127   :  { %s11031_s12 = scalar_lea.hbm %s11903_s25, 16 }
 0x128   :  { %p11032_p2 = scmp.ne.s32.totalorder %s11903_s25, %s11031_s12  ;;  %p11035_p3 = scmp.lt.u32.totalorder %s11031_s12, %s11903_s25 }
 0x12a   :  { %p11037_p4 = pnand %p11035_p3, %p11032_p2 }
 0x12c   :  { %11040 = shalt.err (!%p11037_p4)
}
 0x12d   :  { %s11041_s24 = scalar_lea.vmem %s429_s15, 16  ;;  %s11045_s30 = scalar_lea.vmem %s429_s15, 32 }
 0x12e   :  { %p11042_p5 = scmp.ne.s32.totalorder %s429_s15, %s11041_s24  ;;  %p11046_p6 = scmp.lt.s32.totalorder %s429_s15, %s429_s15 }
 0x12f   :  { %p11047_p7 = scmp.lt.s32.totalorder %s11045_s30, %s11041_s24 }
 0x131   :  { %p11048_p8 = por %p11047_p7, %p11046_p6 }
 0x133   :  { %p11049_p9 = pnand %p11048_p8, %p11042_p5 }
 0x135   :  { %11052 = shalt.err (!%p11049_p9)
}
 0x136   :  { %431 = dma.hbm_to_vmem [thread:$0]  %s11903_s25, 16, %s429_s15, [#allocation33]  }
 0x137   :  { %s11581_s23 = smov [#allocation35]   ;;  %s11582_s26 = smov [#allocation38]  }
 0x138   :  { %s450_s27 = sshll.u32 %s11581_s23, 4  ;;  %s470_s21 = sshll.u32 %s11582_s26, 4  ;;  %s451_s27 = int_to_ptr.vmem [resolvable:$true] %s450_s27  ;;  %s471_s21 = int_to_ptr.vmem [resolvable:$true] %s470_s21 }
 0x139   :  { %s11053_s0 = scalar_lea.hbm %s11918_s5, 16 }
 0x13a   :  { %p11054_p10 = scmp.ne.s32.totalorder %s11918_s5, %s11053_s0  ;;  %p11057_p11 = scmp.lt.u32.totalorder %s11053_s0, %s11918_s5 }
 0x13c   :  { %p11059_p12 = pnand %p11057_p11, %p11054_p10 }
 0x13e   :  { %11062 = shalt.err (!%p11059_p12)
}
 0x13f   :  { %s11063_s28 = scalar_lea.vmem %s451_s27, 16  ;;  %s11067_s1 = scalar_lea.vmem %s451_s27, 32 }
 0x140   :  { %p11064_p13 = scmp.ne.s32.totalorder %s451_s27, %s11063_s28  ;;  %p11068_p0 = scmp.lt.s32.totalorder %s451_s27, %s451_s27 }
 0x141   :  { %p11069_p1 = scmp.lt.s32.totalorder %s11067_s1, %s11063_s28 }
 0x143   :  { %p11070_p2 = por %p11069_p1, %p11068_p0 }
 0x145   :  { %p11071_p3 = pnand %p11070_p2, %p11064_p13 }
 0x147   :  { %11074 = shalt.err (!%p11071_p3)
}
 0x148   :  { %453 = dma.hbm_to_vmem [thread:$0]  %s11918_s5, 16, %s451_s27, [#allocation36]  }
 0x149   :  { %s11075_s25 = scalar_lea.hbm %s11928_s9, 16 }
 0x14a   :  { %p11076_p4 = scmp.ne.s32.totalorder %s11928_s9, %s11075_s25  ;;  %p11079_p5 = scmp.lt.u32.totalorder %s11075_s25, %s11928_s9 }
 0x14c   :  { %p11081_p6 = pnand %p11079_p5, %p11076_p4 }
 0x14e   :  { %11084 = shalt.err (!%p11081_p6)
}
 0x14f   :  { %s11085_s8 = scalar_lea.vmem %s471_s21, 16  ;;  %s11089_s2 = scalar_lea.vmem %s471_s21, 32 }
 0x150   :  { %p11086_p7 = scmp.ne.s32.totalorder %s471_s21, %s11085_s8  ;;  %p11090_p8 = scmp.lt.s32.totalorder %s471_s21, %s471_s21 }
 0x151   :  { %p11091_p9 = scmp.lt.s32.totalorder %s11089_s2, %s11085_s8 }
 0x153   :  { %p11092_p10 = por %p11091_p9, %p11090_p8 }
 0x155   :  { %p11093_p11 = pnand %p11092_p10, %p11086_p7 }
 0x157   :  { %11096 = shalt.err (!%p11093_p11)
}
 0x158   :  { %473 = dma.hbm_to_vmem [thread:$0]  %s11928_s9, 16, %s471_s21, [#allocation39]  }
 0x159   :  { %s11583_s4 = smov [#allocation41]   ;;  %s11584_s7 = smov [#allocation2]  }
 0x15a   :  { %s492_s5 = sshll.u32 %s11583_s4, 4  ;;  %s222_s10 = sshll.u32 %s11584_s7, 4  ;;  %s493_s5 = int_to_ptr.vmem [resolvable:$true] %s492_s5  ;;  %s223_s10 = int_to_ptr.vmem [resolvable:$true] %s222_s10 }
 0x15b   :  { %s11097_s3 = scalar_lea.hbm %s11943_s13, 16 }
 0x15c   :  { %p11098_p12 = scmp.ne.s32.totalorder %s11943_s13, %s11097_s3  ;;  %p11101_p13 = scmp.lt.u32.totalorder %s11097_s3, %s11943_s13 }
 0x15e   :  { %p11103_p0 = pnand %p11101_p13, %p11098_p12 }
 0x160   :  { %11106 = shalt.err (!%p11103_p0)
}
 0x161   :  { %s11107_s20 = scalar_lea.vmem %s493_s5, 16  ;;  %s11111_s11 = scalar_lea.vmem %s493_s5, 32 }
 0x162   :  { %p11108_p1 = scmp.ne.s32.totalorder %s493_s5, %s11107_s20  ;;  %p11112_p2 = scmp.lt.s32.totalorder %s493_s5, %s493_s5 }
 0x163   :  { %p11113_p3 = scmp.lt.s32.totalorder %s11111_s11, %s11107_s20 }
 0x165   :  { %p11114_p4 = por %p11113_p3, %p11112_p2 }
 0x167   :  { %p11115_p5 = pnand %p11114_p4, %p11108_p1 }
 0x169   :  { %11118 = shalt.err (!%p11115_p5)
}
 0x16a   :  { %495 = dma.hbm_to_vmem [thread:$0]  %s11943_s13, 16, %s493_s5, [#allocation42]  }
 0x16b   :  { %s11119_s9 = scalar_lea.hbm %s11768_s29, 16 }
 0x16c   :  { %p11120_p6 = scmp.ne.s32.totalorder %s11768_s29, %s11119_s9  ;;  %p11123_p7 = scmp.lt.u32.totalorder %s11119_s9, %s11768_s29 }
 0x16e   :  { %p11125_p8 = pnand %p11123_p7, %p11120_p6 }
 0x170   :  { %11128 = shalt.err (!%p11125_p8)
}
 0x171   :  { %s11129_s15 = scalar_lea.vmem %s223_s10, 16  ;;  %s11133_s16 = scalar_lea.vmem %s223_s10, 32 }
 0x172   :  { %p11130_p9 = scmp.ne.s32.totalorder %s223_s10, %s11129_s15  ;;  %p11134_p10 = scmp.lt.s32.totalorder %s223_s10, %s223_s10 }
 0x173   :  { %p11135_p11 = scmp.lt.s32.totalorder %s11133_s16, %s11129_s15 }
 0x175   :  { %p11136_p12 = por %p11135_p11, %p11134_p10 }
 0x177   :  { %p11137_p13 = pnand %p11136_p12, %p11130_p9 }
 0x179   :  { %11140 = shalt.err (!%p11137_p13)
}
 0x17a   :  { %s13061_s18 = sld [smem:[#allocation92_spill]]  ;;  %s11585_s22 = smov [#allocation7]  }
 0x17b   :  { %225 = dma.hbm_to_vmem [thread:$0]  %s11768_s29, 16, %s223_s10, [#allocation3]  }
 0x17c   :  { %s242_s13 = sshll.u32 %s11585_s22, 4  ;;  %s11586_s12 = smov [#allocation10]   ;;  %s243_s13 = int_to_ptr.vmem [resolvable:$true] %s242_s13 }
 0x17d   :  { %s262_s24 = sshll.u32 %s11586_s12, 4  ;;  %s263_s24 = int_to_ptr.vmem [resolvable:$true] %s262_s24 }
 0x180   :  { %s11141_s30 = scalar_lea.hbm %s13061_s18, 16 }
 0x181   :  { %p11142_p0 = scmp.ne.s32.totalorder %s13061_s18, %s11141_s30  ;;  %p11145_p1 = scmp.lt.u32.totalorder %s11141_s30, %s13061_s18 }
 0x183   :  { %p11147_p2 = pnand %p11145_p1, %p11142_p0 }
 0x185   :  { %11150 = shalt.err (!%p11147_p2)
}
 0x186   :  { %s11151_s23 = scalar_lea.vmem %s243_s13, 16  ;;  %s11155_s27 = scalar_lea.vmem %s243_s13, 32 }
 0x187   :  { %p11152_p3 = scmp.ne.s32.totalorder %s243_s13, %s11151_s23  ;;  %p11156_p4 = scmp.lt.s32.totalorder %s243_s13, %s243_s13 }
 0x188   :  { %p11157_p5 = scmp.lt.s32.totalorder %s11155_s27, %s11151_s23 }
 0x18a   :  { %p11158_p6 = por %p11157_p5, %p11156_p4 }
 0x18c   :  { %p11159_p7 = pnand %p11158_p6, %p11152_p3 }
 0x18e   :  { %11162 = shalt.err (!%p11159_p7)
}
 0x18f   :  { %s13062_s29 = sld [smem:[#allocation93_spill]] }
 0x190   :  { %245 = dma.hbm_to_vmem [thread:$0]  %s13061_s18, 16, %s243_s13, [#allocation6]  }
 0x195   :  { %s11163_s26 = scalar_lea.hbm %s13062_s29, 16 }
 0x196   :  { %p11164_p8 = scmp.ne.s32.totalorder %s13062_s29, %s11163_s26  ;;  %p11167_p9 = scmp.lt.u32.totalorder %s11163_s26, %s13062_s29 }
 0x198   :  { %p11169_p10 = pnand %p11167_p9, %p11164_p8 }
 0x19a   :  { %11172 = shalt.err (!%p11169_p10)
}
 0x19b   :  { %s11173_s21 = scalar_lea.vmem %s263_s24, 16  ;;  %s11177_s0 = scalar_lea.vmem %s263_s24, 32 }
 0x19c   :  { %p11174_p11 = scmp.ne.s32.totalorder %s263_s24, %s11173_s21  ;;  %p11178_p12 = scmp.lt.s32.totalorder %s263_s24, %s263_s24 }
 0x19d   :  { %p11179_p13 = scmp.lt.s32.totalorder %s11177_s0, %s11173_s21 }
 0x19f   :  { %p11180_p0 = por %p11179_p13, %p11178_p12 }
 0x1a1   :  { %p11181_p1 = pnand %p11180_p0, %p11174_p11 }
 0x1a3   :  { %11184 = shalt.err (!%p11181_p1)
}
 0x1a4   :  { %s13063_s28 = sld [smem:[#allocation95_spill]]  ;;  %s11587_s1 = smov [#allocation13]  }
 0x1a5   :  { %265 = dma.hbm_to_vmem [thread:$0]  %s13062_s29, 16, %s263_s24, [#allocation9]  }
 0x1a6   :  { %s284_s25 = sshll.u32 %s11587_s1, 4  ;;  %s11588_s8 = smov [#allocation16]   ;;  %s285_s25 = int_to_ptr.vmem [resolvable:$true] %s284_s25 }
 0x1a7   :  { %s306_s2 = sshll.u32 %s11588_s8, 4  ;;  %s307_s2 = int_to_ptr.vmem [resolvable:$true] %s306_s2 }
 0x1aa   :  { %s11185_s4 = scalar_lea.hbm %s13063_s28, 16 }
 0x1ab   :  { %p11186_p2 = scmp.ne.s32.totalorder %s13063_s28, %s11185_s4  ;;  %p11189_p3 = scmp.lt.u32.totalorder %s11185_s4, %s13063_s28 }
 0x1ad   :  { %p11191_p4 = pnand %p11189_p3, %p11186_p2 }
 0x1af   :  { %11194 = shalt.err (!%p11191_p4)
}
 0x1b0   :  { %s11195_s5 = scalar_lea.vmem %s285_s25, 16  ;;  %s11199_s7 = scalar_lea.vmem %s285_s25, 32 }
 0x1b1   :  { %p11196_p5 = scmp.ne.s32.totalorder %s285_s25, %s11195_s5  ;;  %p11200_p6 = scmp.lt.s32.totalorder %s285_s25, %s285_s25 }
 0x1b2   :  { %p11201_p7 = scmp.lt.s32.totalorder %s11199_s7, %s11195_s5 }
 0x1b4   :  { %p11202_p8 = por %p11201_p7, %p11200_p6 }
 0x1b6   :  { %p11203_p9 = pnand %p11202_p8, %p11196_p5 }
 0x1b8   :  { %11206 = shalt.err (!%p11203_p9)
}
 0x1b9   :  { %s13064_s10 = sld [smem:[#allocation97_spill]] }
 0x1ba   :  { %287 = dma.hbm_to_vmem [thread:$0]  %s13063_s28, 16, %s285_s25, [#allocation12]  }
 0x1bf   :  { %s11207_s3 = scalar_lea.hbm %s13064_s10, 16 }
 0x1c0   :  { %p11208_p10 = scmp.ne.s32.totalorder %s13064_s10, %s11207_s3  ;;  %p11211_p11 = scmp.lt.u32.totalorder %s11207_s3, %s13064_s10 }
 0x1c2   :  { %p11213_p12 = pnand %p11211_p11, %p11208_p10 }
 0x1c4   :  { %11216 = shalt.err (!%p11213_p12)
}
 0x1c5   :  { %s11217_s20 = scalar_lea.vmem %s307_s2, 16  ;;  %s11221_s11 = scalar_lea.vmem %s307_s2, 32 }
 0x1c6   :  { %p11218_p13 = scmp.ne.s32.totalorder %s307_s2, %s11217_s20  ;;  %p11222_p0 = scmp.lt.s32.totalorder %s307_s2, %s307_s2 }
 0x1c7   :  { %p11223_p1 = scmp.lt.s32.totalorder %s11221_s11, %s11217_s20 }
 0x1c9   :  { %p11224_p2 = por %p11223_p1, %p11222_p0 }
 0x1cb   :  { %p11225_p3 = pnand %p11224_p2, %p11218_p13 }
 0x1cd   :  { %11228 = shalt.err (!%p11225_p3)
}
 0x1ce   :  { %s13065_s9 = sld [smem:[#allocation99_spill]]  ;;  %s11589_s15 = smov [#allocation19]  }
 0x1cf   :  { %309 = dma.hbm_to_vmem [thread:$0]  %s13064_s10, 16, %s307_s2, [#allocation15]  }
 0x1d0   :  { %s328_s16 = sshll.u32 %s11589_s15, 4  ;;  %s11590_s18 = smov [#allocation22]   ;;  %s329_s16 = int_to_ptr.vmem [resolvable:$true] %s328_s16 }
 0x1d1   :  { %s352_s22 = sshll.u32 %s11590_s18, 4  ;;  %s353_s22 = int_to_ptr.vmem [resolvable:$true] %s352_s22 }
 0x1d4   :  { %s11229_s13 = scalar_lea.hbm %s13065_s9, 16 }
 0x1d5   :  { %p11230_p4 = scmp.ne.s32.totalorder %s13065_s9, %s11229_s13  ;;  %p11233_p5 = scmp.lt.u32.totalorder %s11229_s13, %s13065_s9 }
 0x1d7   :  { %p11235_p6 = pnand %p11233_p5, %p11230_p4 }
 0x1d9   :  { %11238 = shalt.err (!%p11235_p6)
}
 0x1da   :  { %s11239_s12 = scalar_lea.vmem %s329_s16, 16  ;;  %s11243_s24 = scalar_lea.vmem %s329_s16, 32 }
 0x1db   :  { %p11240_p7 = scmp.ne.s32.totalorder %s329_s16, %s11239_s12  ;;  %p11244_p8 = scmp.lt.s32.totalorder %s329_s16, %s329_s16 }
 0x1dc   :  { %p11245_p9 = scmp.lt.s32.totalorder %s11243_s24, %s11239_s12 }
 0x1de   :  { %p11246_p10 = por %p11245_p9, %p11244_p8 }
 0x1e0   :  { %p11247_p11 = pnand %p11246_p10, %p11240_p7 }
 0x1e2   :  { %11250 = shalt.err (!%p11247_p11)
}
 0x1e3   :  { %s13066_s30 = sld [smem:[#allocation102_spill]] }
 0x1e4   :  { %331 = dma.hbm_to_vmem [thread:$0]  %s13065_s9, 16, %s329_s16, [#allocation18]  }
 0x1e9   :  { %s11251_s23 = scalar_lea.hbm %s13066_s30, 16 }
 0x1ea   :  { %p11252_p12 = scmp.ne.s32.totalorder %s13066_s30, %s11251_s23  ;;  %p11255_p13 = scmp.lt.u32.totalorder %s11251_s23, %s13066_s30 }
 0x1ec   :  { %p11257_p0 = pnand %p11255_p13, %p11252_p12 }
 0x1ee   :  { %11260 = shalt.err (!%p11257_p0)
}
 0x1ef   :  { %s11261_s27 = scalar_lea.vmem %s353_s22, 16  ;;  %s11265_s29 = scalar_lea.vmem %s353_s22, 32 }
 0x1f0   :  { %p11262_p1 = scmp.ne.s32.totalorder %s353_s22, %s11261_s27  ;;  %p11266_p2 = scmp.lt.s32.totalorder %s353_s22, %s353_s22 }
 0x1f1   :  { %p11267_p3 = scmp.lt.s32.totalorder %s11265_s29, %s11261_s27 }
 0x1f3   :  { %p11268_p4 = por %p11267_p3, %p11266_p2 }
 0x1f5   :  { %p11269_p5 = pnand %p11268_p4, %p11262_p1 }
 0x1f7   :  { %11272 = shalt.err (!%p11269_p5)
}
 0x1f8   :  { %s13067_s26 = sld [smem:[#allocation103_spill]]  ;;  %s11591_s21 = smov [#allocation25]  }
 0x1f9   :  { %355 = dma.hbm_to_vmem [thread:$0]  %s13066_s30, 16, %s353_s22, [#allocation21]  }
 0x1fa   :  { %s372_s0 = sshll.u32 %s11591_s21, 4  ;;  %s11592_s28 = smov [#allocation28]   ;;  %s373_s0 = int_to_ptr.vmem [resolvable:$true] %s372_s0 }
 0x1fb   :  { %s392_s1 = sshll.u32 %s11592_s28, 4  ;;  %s393_s1 = int_to_ptr.vmem [resolvable:$true] %s392_s1 }
 0x1fe   :  { %s11273_s25 = scalar_lea.hbm %s13067_s26, 16 }
 0x1ff   :  { %p11274_p6 = scmp.ne.s32.totalorder %s13067_s26, %s11273_s25  ;;  %p11277_p7 = scmp.lt.u32.totalorder %s11273_s25, %s13067_s26 }
 0x201   :  { %p11279_p8 = pnand %p11277_p7, %p11274_p6 }
 0x203   :  { %11282 = shalt.err (!%p11279_p8)
}
 0x204   :  { %s11283_s8 = scalar_lea.vmem %s373_s0, 16  ;;  %s11287_s2 = scalar_lea.vmem %s373_s0, 32 }
 0x205   :  { %p11284_p9 = scmp.ne.s32.totalorder %s373_s0, %s11283_s8  ;;  %p11288_p10 = scmp.lt.s32.totalorder %s373_s0, %s373_s0 }
 0x206   :  { %p11289_p11 = scmp.lt.s32.totalorder %s11287_s2, %s11283_s8 }
 0x208   :  { %p11290_p12 = por %p11289_p11, %p11288_p10 }
 0x20a   :  { %p11291_p13 = pnand %p11290_p12, %p11284_p9 }
 0x20c   :  { %11294 = shalt.err (!%p11291_p13)
}
 0x20d   :  { %s13068_s4 = sld [smem:[#allocation104_spill]] }
 0x20e   :  { %375 = dma.hbm_to_vmem [thread:$0]  %s13067_s26, 16, %s373_s0, [#allocation24]  }
 0x213   :  { %s11295_s5 = scalar_lea.hbm %s13068_s4, 16 }
 0x214   :  { %p11296_p0 = scmp.ne.s32.totalorder %s13068_s4, %s11295_s5  ;;  %p11299_p1 = scmp.lt.u32.totalorder %s11295_s5, %s13068_s4 }
 0x216   :  { %p11301_p2 = pnand %p11299_p1, %p11296_p0 }
 0x218   :  { %11304 = shalt.err (!%p11301_p2)
}
 0x219   :  { %s11305_s7 = scalar_lea.vmem %s393_s1, 16  ;;  %s11309_s10 = scalar_lea.vmem %s393_s1, 32 }
 0x21a   :  { %p11306_p3 = scmp.ne.s32.totalorder %s393_s1, %s11305_s7  ;;  %p11310_p4 = scmp.lt.s32.totalorder %s393_s1, %s393_s1 }
 0x21b   :  { %p11311_p5 = scmp.lt.s32.totalorder %s11309_s10, %s11305_s7 }
 0x21d   :  { %p11312_p6 = por %p11311_p5, %p11310_p4 }
 0x21f   :  { %p11313_p7 = pnand %p11312_p6, %p11306_p3 }
 0x221   :  { %11316 = shalt.err (!%p11313_p7)
}
 0x222   :  { %s13069_s3 = sld [smem:[#allocation107_spill]]  ;;  %s11593_s20 = smov [#allocation31]  }
 0x223   :  { %395 = dma.hbm_to_vmem [thread:$0]  %s13068_s4, 16, %s393_s1, [#allocation27]  }
 0x224   :  { %s416_s11 = sshll.u32 %s11593_s20, 4  ;;  %s11594_s9 = smov [#allocation34]   ;;  %s417_s11 = int_to_ptr.vmem [resolvable:$true] %s416_s11 }
 0x225   :  { %s440_s15 = sshll.u32 %s11594_s9, 4  ;;  %s441_s15 = int_to_ptr.vmem [resolvable:$true] %s440_s15 }
 0x228   :  { %s11317_s16 = scalar_lea.hbm %s13069_s3, 16 }
 0x229   :  { %p11318_p8 = scmp.ne.s32.totalorder %s13069_s3, %s11317_s16  ;;  %p11321_p9 = scmp.lt.u32.totalorder %s11317_s16, %s13069_s3 }
 0x22b   :  { %p11323_p10 = pnand %p11321_p9, %p11318_p8 }
 0x22d   :  { %11326 = shalt.err (!%p11323_p10)
}
 0x22e   :  { %s11327_s18 = scalar_lea.vmem %s417_s11, 16  ;;  %s11331_s22 = scalar_lea.vmem %s417_s11, 32 }
 0x22f   :  { %p11328_p11 = scmp.ne.s32.totalorder %s417_s11, %s11327_s18  ;;  %p11332_p12 = scmp.lt.s32.totalorder %s417_s11, %s417_s11 }
 0x230   :  { %p11333_p13 = scmp.lt.s32.totalorder %s11331_s22, %s11327_s18 }
 0x232   :  { %p11334_p0 = por %p11333_p13, %p11332_p12 }
 0x234   :  { %p11335_p1 = pnand %p11334_p0, %p11328_p11 }
 0x236   :  { %11338 = shalt.err (!%p11335_p1)
}
 0x237   :  { %s13070_s13 = sld [smem:[#allocation110_spill]] }
 0x238   :  { %419 = dma.hbm_to_vmem [thread:$0]  %s13069_s3, 16, %s417_s11, [#allocation30]  }
 0x23d   :  { %s11339_s12 = scalar_lea.hbm %s13070_s13, 16 }
 0x23e   :  { %p11340_p2 = scmp.ne.s32.totalorder %s13070_s13, %s11339_s12  ;;  %p11343_p3 = scmp.lt.u32.totalorder %s11339_s12, %s13070_s13 }
 0x240   :  { %p11345_p4 = pnand %p11343_p3, %p11340_p2 }
 0x242   :  { %11348 = shalt.err (!%p11345_p4)
}
 0x243   :  { %s11349_s24 = scalar_lea.vmem %s441_s15, 16  ;;  %s11353_s30 = scalar_lea.vmem %s441_s15, 32 }
 0x244   :  { %p11350_p5 = scmp.ne.s32.totalorder %s441_s15, %s11349_s24  ;;  %p11354_p6 = scmp.lt.s32.totalorder %s441_s15, %s441_s15 }
 0x245   :  { %p11355_p7 = scmp.lt.s32.totalorder %s11353_s30, %s11349_s24 }
 0x247   :  { %p11356_p8 = por %p11355_p7, %p11354_p6 }
 0x249   :  { %p11357_p9 = pnand %p11356_p8, %p11350_p5 }
 0x24b   :  { %11360 = shalt.err (!%p11357_p9)
}
 0x24c   :  { %s13071_s23 = sld [smem:[#allocation111_spill]]  ;;  %s11595_s27 = smov [#allocation37]  }
 0x24d   :  { %443 = dma.hbm_to_vmem [thread:$0]  %s13070_s13, 16, %s441_s15, [#allocation33]  }
 0x24e   :  { %s460_s29 = sshll.u32 %s11595_s27, 4  ;;  %s11596_s26 = smov [#allocation40]   ;;  %s461_s29 = int_to_ptr.vmem [resolvable:$true] %s460_s29 }
 0x24f   :  { %s480_s21 = sshll.u32 %s11596_s26, 4  ;;  %s481_s21 = int_to_ptr.vmem [resolvable:$true] %s480_s21 }
 0x252   :  { %s11361_s0 = scalar_lea.hbm %s13071_s23, 16 }
 0x253   :  { %p11362_p10 = scmp.ne.s32.totalorder %s13071_s23, %s11361_s0  ;;  %p11365_p11 = scmp.lt.u32.totalorder %s11361_s0, %s13071_s23 }
 0x255   :  { %p11367_p12 = pnand %p11365_p11, %p11362_p10 }
 0x257   :  { %11370 = shalt.err (!%p11367_p12)
}
 0x258   :  { %s11371_s28 = scalar_lea.vmem %s461_s29, 16  ;;  %s11375_s1 = scalar_lea.vmem %s461_s29, 32 }
 0x259   :  { %p11372_p13 = scmp.ne.s32.totalorder %s461_s29, %s11371_s28  ;;  %p11376_p0 = scmp.lt.s32.totalorder %s461_s29, %s461_s29 }
 0x25a   :  { %p11377_p1 = scmp.lt.s32.totalorder %s11375_s1, %s11371_s28 }
 0x25c   :  { %p11378_p2 = por %p11377_p1, %p11376_p0 }
 0x25e   :  { %p11379_p3 = pnand %p11378_p2, %p11372_p13 }
 0x260   :  { %11382 = shalt.err (!%p11379_p3)
}
 0x261   :  { %s13072_s25 = sld [smem:[#allocation112_spill]] }
 0x262   :  { %463 = dma.hbm_to_vmem [thread:$0]  %s13071_s23, 16, %s461_s29, [#allocation36]  }
 0x267   :  { %s11383_s8 = scalar_lea.hbm %s13072_s25, 16 }
 0x268   :  { %p11384_p4 = scmp.ne.s32.totalorder %s13072_s25, %s11383_s8  ;;  %p11387_p5 = scmp.lt.u32.totalorder %s11383_s8, %s13072_s25 }
 0x26a   :  { %p11389_p6 = pnand %p11387_p5, %p11384_p4 }
 0x26c   :  { %11392 = shalt.err (!%p11389_p6)
}
 0x26d   :  { %s11393_s2 = scalar_lea.vmem %s481_s21, 16  ;;  %s11397_s4 = scalar_lea.vmem %s481_s21, 32 }
 0x26e   :  { %p11394_p7 = scmp.ne.s32.totalorder %s481_s21, %s11393_s2  ;;  %p11398_p8 = scmp.lt.s32.totalorder %s481_s21, %s481_s21 }
 0x26f   :  { %p11399_p9 = scmp.lt.s32.totalorder %s11397_s4, %s11393_s2 }
 0x271   :  { %p11400_p10 = por %p11399_p9, %p11398_p8 }
 0x273   :  { %p11401_p11 = pnand %p11400_p10, %p11394_p7 }
 0x275   :  { %11404 = shalt.err (!%p11401_p11)
}
 0x276   :  { %483 = dma.hbm_to_vmem [thread:$0]  %s13072_s25, 16, %s481_s21, [#allocation39]  }
 0x277   :  { %s11597_s5 = smov [#allocation43]   ;;  %s11598_s10 = smov [#allocation44]  }
 0x278   :  { %s502_s7 = sshll.u32 %s11597_s5, 4  ;;  %s512_s3 = sshll.u32 %s11598_s10, 4  ;;  %s503_s7 = int_to_ptr.vmem [resolvable:$true] %s502_s7  ;;  %s513_s3 = int_to_ptr.vmem [resolvable:$true] %s512_s3 }
 0x279   :  { %s11405_s20 = scalar_lea.hbm %s11948_s14, 16 }
 0x27a   :  { %p11406_p12 = scmp.ne.s32.totalorder %s11948_s14, %s11405_s20  ;;  %p11409_p13 = scmp.lt.u32.totalorder %s11405_s20, %s11948_s14 }
 0x27c   :  { %p11411_p0 = pnand %p11409_p13, %p11406_p12 }
 0x27e   :  { %11414 = shalt.err (!%p11411_p0)
}
 0x27f   :  { %s11415_s11 = scalar_lea.vmem %s503_s7, 16  ;;  %s11419_s9 = scalar_lea.vmem %s503_s7, 32 }
 0x280   :  { %p11416_p1 = scmp.ne.s32.totalorder %s503_s7, %s11415_s11  ;;  %p11420_p2 = scmp.lt.s32.totalorder %s503_s7, %s503_s7 }
 0x281   :  { %p11421_p3 = scmp.lt.s32.totalorder %s11419_s9, %s11415_s11 }
 0x283   :  { %p11422_p4 = por %p11421_p3, %p11420_p2 }
 0x285   :  { %p11423_p5 = pnand %p11422_p4, %p11416_p1 }
 0x287   :  { %11426 = shalt.err (!%p11423_p5)
}
 0x288   :  { %505 = dma.hbm_to_vmem [thread:$0]  %s11948_s14, 16, %s503_s7, [#allocation42]  }
 0x289   :  { %s11427_s15 = scalar_lea.hbm %s11953_s19, 16 }
 0x28a   :  { %p11428_p6 = scmp.ne.s32.totalorder %s11953_s19, %s11427_s15  ;;  %p11431_p7 = scmp.lt.u32.totalorder %s11427_s15, %s11953_s19 }
 0x28c   :  { %p11433_p8 = pnand %p11431_p7, %p11428_p6 }
 0x28e   :  { %11436 = shalt.err (!%p11433_p8)
}
 0x28f   :  { %s11437_s16 = scalar_lea.vmem %s513_s3, 16  ;;  %s11441_s18 = scalar_lea.vmem %s513_s3, 32 }
 0x290   :  { %p11438_p9 = scmp.ne.s32.totalorder %s513_s3, %s11437_s16  ;;  %p11442_p10 = scmp.lt.s32.totalorder %s513_s3, %s513_s3 }
 0x291   :  { %p11443_p11 = scmp.lt.s32.totalorder %s11441_s18, %s11437_s16 }
 0x293   :  { %p11444_p12 = por %p11443_p11, %p11442_p10 }
 0x295   :  { %p11445_p13 = pnand %p11444_p12, %p11438_p9 }
 0x297   :  { %11448 = shalt.err (!%p11445_p13)
}
 0x298   :  { %515 = dma.hbm_to_vmem [thread:$0]  %s11953_s19, 16, %s513_s3, [#allocation45]  }
 0x299   :  { %11471 = dma.done.wait [#allocation3], 16  }
 0x29a   :  { %11472 = vsyncadd [#allocation3], 4294967280 }
 0x29b   :  { %11473 = dma.done.wait [#allocation6], 32  }
 0x29c   :  { %11474 = vsyncadd [#allocation6], 4294967264 }
 0x29d   :  { %11475 = dma.done.wait [#allocation9], 32  }
 0x29e   :  { %11476 = vsyncadd [#allocation9], 4294967264 }
 0x29f   :  { %11477 = dma.done.wait [#allocation12], 32  }
 0x2a0   :  { %11478 = vsyncadd [#allocation12], 4294967264 }
 0x2a1   :  { %11479 = dma.done.wait [#allocation15], 32  }
 0x2a2   :  { %11480 = vsyncadd [#allocation15], 4294967264 }
 0x2a3   :  { %11481 = dma.done.wait [#allocation18], 32  }
 0x2a4   :  { %11482 = vsyncadd [#allocation18], 4294967264 }
 0x2a5   :  { %11483 = dma.done.wait [#allocation21], 32  }
 0x2a6   :  { %11484 = vsyncadd [#allocation21], 4294967264 }
 0x2a7   :  { %11485 = dma.done.wait [#allocation24], 32  }
 0x2a8   :  { %11486 = vsyncadd [#allocation24], 4294967264 }
 0x2a9   :  { %11487 = dma.done.wait [#allocation27], 32  }
 0x2aa   :  { %11488 = vsyncadd [#allocation27], 4294967264 }
 0x2ab   :  { %11489 = dma.done.wait [#allocation30], 32  }
 0x2ac   :  { %11490 = vsyncadd [#allocation30], 4294967264 }
 0x2ad   :  { %11491 = dma.done.wait [#allocation33], 32  }
 0x2ae   :  { %11492 = vsyncadd [#allocation33], 4294967264 }
 0x2af   :  { %11493 = dma.done.wait [#allocation36], 32  }
 0x2b0   :  { %11494 = vsyncadd [#allocation36], 4294967264 }
 0x2b1   :  { %11495 = dma.done.wait [#allocation39], 32  }
 0x2b2   :  { %11496 = vsyncadd [#allocation39], 4294967264 }
 0x2b3   :  { %11497 = dma.done.wait [#allocation42], 32  }
 0x2b4   :  { %11498 = vsyncadd [#allocation42], 4294967264 }
 0x2b5   :  { %11499 = dma.done.wait [#allocation45], 16  }
 0x2b6   :  { %11500 = vsyncadd [#allocation45], 4294967280  ;;  %s13073_s14 = sld [smem:[#allocation105_spill]]  ;;  %s13074_s19 = sld [smem:[#allocation63_spill]]  ;;  %vm615_vm0 = vcmask 261120   ;;  %vm703_vm1 = vcmask 64512  }
 0x2b7   :  { %v8893_v8 = vld [vmem:[#allocation28] ss:$0 sm:$0xff]  ;;  %s11599_s22 = smov 120   ;;  %s11600_s13 = smov 96   ;;  %vm12117_vm2 = vmpackc.low %vm703_vm1, %vm703_vm1  ;;  %vm791_vm3 = vcmask 74752   ;;  %vm787_vm4 = vcmask 80896  }
 0x2b8   :  { %s11601_s12 = smov 88   ;;  %s11602_s24 = smov 112   ;;  %vm822_vm5 = vcmask 1041408   ;;  %vm11610_vm6 = vmmov 1   ;;  %vm1851_vm8 = vcmask 254976   ;;  %vm2001_vm9 = vcmask 523264  }
 0x2b9   :  { %s11603_s30 = smov 80   ;;  %s11604_s23 = smov 56   ;;  %vm12173_vm7 = vmpackc.low %vm822_vm5, %vm11610_vm6  ;;  %vm11612_vm10 = vmmov 0  }
 0x2ba   :  { %s11605_s27 = smov 72   ;;  %s11606_s29 = smov 64  }
 0x2bb   :  { %s11607_s26 = smov 104   ;;  %s11608_s21 = smov 48  }
 0x2bc   :  { %v604_v0 = vld [vmem:[%s13073_s14] sm:$0xff]  ;;  %v605_v1 = vld [vmem:[%s13073_s14 + $0x8] sm:$0xff]  ;;  %v606_v2 = vld [vmem:[%s13073_s14 + $0x10] sm:$0xff]  ;;  %s11609_s0 = smov 40   ;;  %s13079_s28 = sld [smem:[#allocation98_spill]] }
 0x2bd   :  { %v10067_v3 = vpack.c.bf16 %v605_v1, %v604_v0  ;;  %v607_v4 = vld [vmem:[%s13073_s14 + $0x18] sm:$0xff]  ;;  %v12082_v5 = vld [vmem:[%s13074_s19] sm:$0xff]  ;;  %v12087_v7 = vld [vmem:[%s13074_s19 + $0x8] sm:$0x3]  ;;  %s13080_s1 = sld [smem:[#allocation100_spill]]  ;;  %s13081_s25 = sld [smem:[#allocation101_spill]] }
 0x2be   :  { %v10071_v6 = vpack.c.bf16 %v607_v4, %v606_v2  ;;  %9432 = vmatprep.mubr.msk.f32.mxu0 %vm615_vm0, %v12082_v5  ;;  %s13082_s8 = sld [smem:[#allocation113_spill]]  ;;  %s13083_s2 = sld [smem:[#allocation106_spill]] }
 0x2bf   :  { %10068 = vmatprep.subr.bf16.mxu0 %v10067_v3  ;;  %s13084_s4 = sld [smem:[#allocation108_spill]]  ;;  %s13085_s5 = sld [smem:[#allocation109_spill]] }
 0x2c0   :  { %10070 = vmatpush3.bf16.msra.mxu0 %v10067_v3  ;;  %s13086_s7 = sld [smem:[#allocation82_spill]]  ;;  %s13087_s10 = sld [smem:[#allocation64_spill]] }
 0x2c1   :  { %10072 = vmatprep.subr.bf16.mxu0 %v10071_v6  ;;  %s13088_s3 = sld [smem:[#allocation81_spill]]  ;;  %s13089_s20 = sld [smem:[#allocation80_spill]] }
 0x2c2   :  { %s13090_s11 = sld [smem:[#allocation79_spill]]  ;;  %s13091_s9 = sld [smem:[#allocation68_spill]] }
 0x2c3   :  { %s13092_s15 = sld [smem:[#allocation67_spill]]  ;;  %s13093_s16 = sld [smem:[#allocation74_spill]] }
 0x2c4   :  { %10074 = vmatpush3.bf16.msra.mxu0 %v10071_v6  ;;  %s13094_s18 = sld [smem:[#allocation73_spill]]  ;;  %s13095_s14 = sld [smem:[#allocation66_spill]] }
 0x2c5   :  { %s13096_s19 = sld [smem:[#allocation65_spill]] }
 0x2c7   :  { %9433 = vmatmul.mubr.msk.f32.vlgmr.msra.gmra.mrb[0].mxu0 %vm615_vm0, %v12087_v7 }
 0x39a   :  { %v9434_v9 = vpop.f32.mrb[0].mxu0 }
 0x39b   :  { %v12091_v10 = vadd.f32 %v9434_v9, %v8893_v8  ;;  %v688_v11 = vpop.f32.mrb[1].mxu0 }
 0x39c   :  { %v12093_v12 = vadd.f32 %v8893_v8, %v688_v11 }
 0x39e   :  { %901 = vrot.lane.b32.xlu1 %v12093_v12, %s11599_s22  ;;  %9439 = vmatprep.mubr.msk.f32.mxu1 %vm703_vm1, %v12093_v12  ;;  %v12101_v13 = vpack.i.bf16 %v12091_v10, %v12093_v12 }
 0x3a0   :  { %10498 = vrot.lane.b32.xlu0 %v12101_v13, %s11600_s13 }
 0x3a2   :  { %903 = vrot.lane.b32.xlu1 %v12091_v10, %s11599_s22 }
 0x3a4   :  { %10503 = vrot.lane.b32.xlu0 %v12101_v13, %s11601_s12 }
 0x3a6   :  { %1265 = vrot.lane.b32.xlu1 %v12093_v12, %s11602_s24 }
 0x3a8   :  { %10508 = vrot.lane.b32.xlu0 %v12101_v13, %s11603_s30 }
 0x3ac   :  { %1267 = vrot.lane.b32.xlu0 %v12091_v10, %s11602_s24 }
 0x410   :  { %v902_v24 = vpop.permute.xlu1 %901 }
 0x412   :  { %v10499_v14 = vpop.permute.xlu0 %10498 }
 0x413   :  { %v10501_v15 = vunpack.i.h.bf16 %v10499_v14  ;;  %v10500_v16 = vunpack.i.l.bf16 %v10499_v14 }
 0x414   :  { %v904_v28 = vpop.permute.xlu1 %903 }
 0x415   :  { %v10075_v18 = vpack.c.bf16 %v10501_v15, %v10500_v16 }
 0x416   :  { %v10504_v19 = vpop.permute.xlu0 %10503 }
 0x417   :  { %v10506_v20 = vunpack.i.h.bf16 %v10504_v19  ;;  %v10505_v21 = vunpack.i.l.bf16 %v10504_v19  ;;  %10077 = vmatprep.subr.msk.bf16.mxu1 %vm12117_vm2, %v10075_v18 }
 0x418   :  { %10080 = vmatpush3.bf16.xpose.msk.msra.mxu1 %vm12117_vm2, %v10075_v18  ;;  %v1266_v29 = vpop.permute.xlu1 %1265 }
 0x419   :  { %v10087_v22 = vpack.c.bf16 %v10506_v20, %v10505_v21 }
 0x41a   :  { %v10509_v23 = vpop.permute.xlu0 %10508 }
 0x41b   :  { %v10511_v25 = vunpack.i.h.bf16 %v10509_v23  ;;  %v10510_v26 = vunpack.i.l.bf16 %v10509_v23  ;;  %10089 = vmatprep.subr.msk.bf16.mxu1 %vm12117_vm2, %v10087_v22 }
 0x41d   :  { %v10099_v27 = vpack.c.bf16 %v10511_v25, %v10510_v26 }
 0x41e   :  { %v1268_v30 = vpop.permute.xlu0 %1267 }
 0x41f   :  { %9440 = vmatmul.mubr.msk.f32.vlgmr.msra.gmra.mrb[0].mxu1 %vm703_vm1, %v12091_v10 }
 0x420   :  { %10092 = vmatpush3.bf16.xpose.msk.msra.mxu1 %vm12117_vm2, %v10087_v22  ;;  %9453 = vmatprep.mubr.msk.f32.mxu1 %vm703_vm1, %v902_v24 }
 0x421   :  { %10101 = vmatprep.subr.msk.bf16.mxu1 %vm12117_vm2, %v10099_v27 }
 0x427   :  { %9454 = vmatmul.mubr.msk.f32.vlgmr.msra.gmra.mrb[2].mxu1 %vm703_vm1, %v904_v28 }
 0x428   :  { %10104 = vmatpush3.bf16.xpose.msk.msra.mxu1 %vm12117_vm2, %v10099_v27  ;;  %9477 = vmatprep.mubr.msk.f32.mxu1 %vm703_vm1, %v1266_v29 }
 0x42f   :  { %9478 = vmatmul.mubr.msk.f32.vlgmr.msra.gmra.mrb[4].mxu1 %vm703_vm1, %v1268_v30 }
 0x4f2   :  { %v9441_v31 = vpop.f32.mrb[0].mxu1 }
 0x4f3   :  { %v778_v32 = vpop.f32.mrb[1].mxu1  ;;  %v792_v33 = vsel %vm791_vm3, %v9441_v31, -inf }
 0x4f4   :  { %793 = vmax.xlane.f32.xlu0 %v792_v33  ;;  %v788_v34 = vsel %vm787_vm4, %v778_v32, -inf }
 0x4f5   :  { %789 = vmax.xlane.f32.xlu1 %v788_v34 }
 0x4fa   :  { %v9455_v35 = vpop.f32.mrb[2].mxu1 }
 0x4fb   :  { %v983_v36 = vpop.f32.mrb[3].mxu1  ;;  %v995_v37 = vsel %vm791_vm3, %v9455_v35, -inf }
 0x4fc   :  { %996 = vmax.xlane.f32.xlu1 %v995_v37  ;;  %v992_v38 = vsel %vm787_vm4, %v983_v36, -inf }
 0x4fd   :  { %993 = vmax.xlane.f32.xlu0 %v992_v38 }
 0x502   :  { %v12143_v39 = vpop.f32.mrb[4].mxu1 }
 0x503   :  { %v12145_v40 = vpop.f32.mrb[5].mxu1  ;;  %v1359_v62 = vsel %vm791_vm3, %v12143_v39, -inf }
 0x504   :  { %v1356_v61 = vsel %vm787_vm4, %v12145_v40, -inf }
 0x581   :  { %v794_v41 = vpop.xlane.xlu0 %793 }
 0x582   :  { %v796_v42 = vsub.f32 %v9441_v31, %v794_v41  ;;  %v790_v43 = vpop.xlane.xlu1 %789  ;;  %v1102_v41 = vld [vmem:[%s13079_s28 + $0x8] sm:$0xff] }
 0x583   :  { %v795_v44 = vsub.f32 %v778_v32, %v790_v43 }
 0x584   :  { %v799_v45 = vmul.f32 1.442695, %v796_v42 }
 0x585   :  { %v797_v46 = vmul.f32 1.442695, %v795_v44 }
 0x586   :  { %10667 = vpow2.f32 %v799_v45 }
 0x587   :  { %10669 = vpow2.f32 %v797_v46 }
 0x589   :  { %v997_v47 = vpop.xlane.xlu1 %996 }
 0x58a   :  { %v999_v48 = vsub.f32 %v9455_v35, %v997_v47  ;;  %v994_v49 = vpop.xlane.xlu0 %993 }
 0x58b   :  { %v998_v50 = vsub.f32 %v983_v36, %v994_v49 }
 0x58c   :  { %v1002_v51 = vmul.f32 1.442695, %v999_v48 }
 0x58d   :  { %v1000_v52 = vmul.f32 1.442695, %v998_v50 }
 0x58e   :  { %10671 = vpow2.f32 %v1002_v51 }
 0x58f   :  { %10673 = vpow2.f32 %v1000_v52 }
 0x590   :  { %v10668_v53 = vpop.eup %10667 }
 0x591   :  { %v10670_v54 = vpop.eup %10669  ;;  %v804_v55 = vsel %vm791_vm3, %v10668_v53, 0.0 }
 0x592   :  { %805 = vadd.xlane.f32.xlu1 %v804_v55  ;;  %v801_v56 = vsel %vm787_vm4, %v10670_v54, 0.0 }
 0x593   :  { %802 = vadd.xlane.f32.xlu0 %v801_v56 }
 0x598   :  { %v12149_v57 = vpop.eup %10671 }
 0x599   :  { %v10674_v58 = vpop.eup %10673  ;;  %v1007_v59 = vsel %vm791_vm3, %v12149_v57, 0.0 }
 0x59a   :  { %1008 = vadd.xlane.f32.xlu1 %v1007_v59  ;;  %v1004_v60 = vsel %vm787_vm4, %v10674_v58, 0.0  ;;  %v1466_v59 = vld [vmem:[%s13079_s28 + $0x10] sm:$0xff] }
 0x59b   :  { %1005 = vadd.xlane.f32.xlu0 %v1004_v60 }
 0x5ab   :  { %10518 = vrot.lane.b32.xlu1 %v12101_v13, %s11604_s23 }
 0x5af   :  { %10523 = vrot.lane.b32.xlu1 %v12101_v13, %s11605_s27 }
 0x5b1   :  { %10513 = vrot.lane.b32.xlu0 %v12101_v13, %s11606_s29 }
 0x5b3   :  { %1552 = vrot.lane.b32.xlu1 %v12091_v10, %s11607_s26 }
 0x5b5   :  { %1550 = vrot.lane.b32.xlu0 %v12093_v12, %s11607_s26 }
 0x5d4   :  { %1357 = vmax.xlane.f32.xlu0 %v1356_v61 }
 0x5d7   :  { %1360 = vmax.xlane.f32.xlu1 %v1359_v62 }
 0x5e8   :  { %10528 = vrot.lane.b32.xlu1 %v12101_v13, %s11608_s21 }
 0x5ec   :  { %10533 = vrot.lane.b32.xlu1 %v12101_v13, %s11609_s0 }
 0x61f   :  { %v806_v0 = vpop.xlane.xlu1 %805 }
 0x620   :  { %v803_v63 = vpop.xlane.xlu0 %802 }
 0x621   :  { %10675 = vrcp.f32 %v803_v63 }
 0x622   :  { %10677 = vrcp.f32 %v806_v0 }
 0x627   :  { %v1009_v1 = vpop.xlane.xlu1 %1008 }
 0x628   :  { %v1006_v2 = vpop.xlane.xlu0 %1005 }
 0x629   :  { %10679 = vrcp.f32 %v1006_v2 }
 0x62a   :  { %10681 = vrcp.f32 %v1009_v1 }
 0x62b   :  { %v10676_v3 = vpop.eup %10675  ;;  %v10519_v4 = vpop.permute.xlu1 %10518 }
 0x62c   :  { %v10514_v6 = vpop.permute.xlu0 %10513  ;;  %v809_v8 = vmul.f32 %v10676_v3, %v10670_v54  ;;  %v10521_v9 = vunpack.i.h.bf16 %v10519_v4  ;;  %v10520_v10 = vunpack.i.l.bf16 %v10519_v4  ;;  %v10678_v16 = vpop.eup %10677 }
 0x62d   :  { %v10516_v11 = vunpack.i.h.bf16 %v10514_v6  ;;  %v10515_v12 = vunpack.i.l.bf16 %v10514_v6  ;;  %v810_v24 = vmul.f32 %v10678_v16, %v10668_v53 }
 0x62e   :  { %9446 = vmatprep.mubr.msk.f32.mxu0 %vm787_vm4, %v809_v8  ;;  %v10093_v21 = vpack.c.bf16 %v10521_v9, %v10520_v10 }
 0x62f   :  { %v10081_v14 = vpack.c.bf16 %v10516_v11, %v10515_v12  ;;  %v10524_v15 = vpop.permute.xlu1 %10523 }
 0x630   :  { %v10526_v18 = vunpack.i.h.bf16 %v10524_v15  ;;  %v10525_v19 = vunpack.i.l.bf16 %v10524_v15  ;;  %v1551_v20 = vpop.permute.xlu0 %1550  ;;  %v1751_v15 = vld [vmem:[%s13079_s28 + $0x18] sm:$0xff] }
 0x631   :  { %10083 = vmatprep.subr.msk.bf16.mxu0 %vm12173_vm7, %v10081_v14  ;;  %9496 = vmatprep.mubr.msk.f32.mxu1 %vm703_vm1, %v1551_v20 }
 0x632   :  { %v10111_v22 = vpack.c.bf16 %v10526_v18, %v10525_v19  ;;  %10086 = vmatpush3.bf16.msk.msra.mxu0 %vm12173_vm7, %v10081_v14 }
 0x633   :  { %v10680_v23 = vpop.eup %10679  ;;  %10095 = vmatprep.subr.msk.bf16.mxu0 %vm12173_vm7, %v10093_v21  ;;  %v1553_v28 = vpop.permute.xlu1 %1552 }
 0x634   :  { %v10682_v25 = vpop.eup %10681  ;;  %10113 = vmatprep.subr.msk.bf16.mxu1 %vm12117_vm2, %v10111_v22  ;;  %v1012_v26 = vmul.f32 %v10680_v23, %v10674_v58 }
 0x635   :  { %9447 = vmatmul.mubr.msk.f32.vlgmr.msra.gmra.mrb[2].mxu0 %vm787_vm4, %v810_v24  ;;  %10116 = vmatpush3.bf16.xpose.msk.msra.mxu1 %vm12117_vm2, %v10111_v22  ;;  %v1013_v27 = vmul.f32 %v10682_v25, %v12149_v57  ;;  %v8932_v25 = vld [vmem:[#allocation17] ss:$0 sm:$0xff] }
 0x636   :  { %10098 = vmatpush3.bf16.msk.msra.mxu0 %vm12173_vm7, %v10093_v21  ;;  %9460 = vmatprep.mubr.msk.f32.mxu0 %vm787_vm4, %v1012_v26 }
 0x637   :  { %9463 = vmatprep.subr.mxu0 %v1102_v41 }
 0x639   :  { %9461 = vmatmul.mubr.msk.f32.vlgmr.msra.gmra.mrb[4].mxu0 %vm787_vm4, %v1013_v27 }
 0x63a   :  { %9464 = vmatpush3.msra.mxu0 %v1102_v41 }
 0x63c   :  { %9497 = vmatmul.mubr.msk.f32.vlgmr.msra.gmra.mrb[6].mxu1 %vm703_vm1, %v1553_v28 }
 0x661   :  { %v1358_v29 = vpop.xlane.xlu0 %1357 }
 0x662   :  { %v1362_v30 = vsub.f32 %v12145_v40, %v1358_v29  ;;  %v900_v40 = vld [vmem:[%s13079_s28] sm:$0xff]  ;;  %s13097_s28 = sld [smem:[#allocation70_spill]] }
 0x663   :  { %9468 = vmatprep.subr.mxu0 %v900_v40 }
 0x664   :  { %v1364_v31 = vmul.f32 1.442695, %v1362_v30  ;;  %v1361_v32 = vpop.xlane.xlu1 %1360 }
 0x665   :  { %v1363_v33 = vsub.f32 %v12143_v39, %v1361_v32 }
 0x666   :  { %10683 = vpow2.f32 %v1364_v31 }
 0x667   :  { %v1366_v34 = vmul.f32 1.442695, %v1363_v33 }
 0x668   :  { %v10529_v43 = vpop.permute.xlu1 %10528 }
 0x669   :  { %10685 = vpow2.f32 %v1366_v34  ;;  %v10531_v46 = vunpack.i.h.bf16 %v10529_v43  ;;  %v10530_v47 = vunpack.i.l.bf16 %v10529_v43  ;;  %v1892_v43 = vld [vmem:[%s13080_s1] sm:$0xff] }
 0x66b   :  { %v10105_v50 = vpack.c.bf16 %v10531_v46, %v10530_v47  ;;  %v1895_v46 = vld [vmem:[%s13080_s1 + $0x18] sm:$0xff] }
 0x66c   :  { %v10534_v55 = vpop.permute.xlu1 %10533 }
 0x66d   :  { %v10536_v60 = vunpack.i.h.bf16 %v10534_v55  ;;  %v10535_v61 = vunpack.i.l.bf16 %v10534_v55  ;;  %v1991_v55 = vld [vmem:[%s13081_s25 + $0x28] sm:$0xff] }
 0x66f   :  { %v10117_v63 = vpack.c.bf16 %v10536_v60, %v10535_v61 }
 0x670   :  { %v10684_v35 = vpop.eup %10683 }
 0x671   :  { %v1368_v36 = vsel %vm787_vm4, %v10684_v35, 0.0 }
 0x672   :  { %1369 = vadd.xlane.f32.xlu0 %v1368_v36 }
 0x673   :  { %v10686_v37 = vpop.eup %10685 }
 0x674   :  { %v1371_v38 = vsel %vm791_vm3, %v10686_v37, 0.0 }
 0x676   :  { %1372 = vadd.xlane.f32.xlu0 %v1371_v38 }
 0x6ff   :  { %v1370_v42 = vpop.xlane.xlu0 %1369 }
 0x700   :  { %10687 = vrcp.f32 %v1370_v42 }
 0x703   :  { %v1373_v39 = vpop.xlane.xlu0 %1372 }
 0x704   :  { %10689 = vrcp.f32 %v1373_v39  ;;  %v1894_v39 = vld [vmem:[%s13080_s1 + $0x10] sm:$0xff] }
 0x705   :  { %v10127_v47 = vpack.c.bf16 %v1895_v46, %v1894_v39  ;;  %v2132_v39 = vld [vmem:[%s13082_s8 + $0x18] sm:$0xff] }
 0x708   :  { %v9448_v44 = vpop.f32.mrb[2].mxu0 }
 0x709   :  { %v891_v45 = vpop.f32.mrb[3].mxu0 }
 0x70a   :  { %v10688_v54 = vpop.eup %10687 }
 0x70b   :  { %v1376_v58 = vmul.f32 %v10688_v54, %v10684_v35  ;;  %v1990_v54 = vld [vmem:[%s13081_s25 + $0x20] sm:$0xff] }
 0x70c   :  { %v9462_v48 = vpop.f32.mrb[4].mxu0 }
 0x70d   :  { %v1093_v49 = vpop.f32.mrb[5].mxu0 }
 0x70e   :  { %9465 = vmatprep.mubr.msk.f32.mxu0 %vm703_vm1, %v1093_v49  ;;  %v10690_v57 = vpop.eup %10689  ;;  %v1987_v49 = vld [vmem:[%s13081_s25 + $0x8] sm:$0xff] }
 0x70f   :  { %9466 = vmatmul.mubr.msk.f32.vlgmr.msra.gmra.mrb[6].mxu0 %vm703_vm1, %v9462_v48  ;;  %v9498_v51 = vpop.f32.mrb[6].mxu1  ;;  %v1377_v62 = vmul.f32 %v10690_v57, %v10686_v37  ;;  %v1986_v48 = vld [vmem:[%s13081_s25] sm:$0xff] }
 0x710   :  { %9469 = vmatpush3.msra.mxu0 %v900_v40  ;;  %9470 = vmatprep.mubr.msk.f32.mxu0 %vm703_vm1, %v891_v45  ;;  %v1632_v52 = vpop.f32.mrb[7].mxu1  ;;  %v1644_v56 = vsel %vm791_vm3, %v9498_v51, -inf }
 0x711   :  { %10107 = vmatprep.subr.msk.bf16.mxu0 %vm12173_vm7, %v10105_v50  ;;  %v1641_v53 = vsel %vm787_vm4, %v1632_v52, -inf }
 0x712   :  { %1642 = vmax.xlane.f32.xlu0 %v1641_v53 }
 0x716   :  { %1645 = vmax.xlane.f32.xlu0 %v1644_v56  ;;  %v10139_v56 = vpack.c.bf16 %v1991_v55, %v1990_v54  ;;  %v8942_v55 = vld [vmem:[#allocation25] ss:$0 sm:$0xff] }
 0x717   :  { %9471 = vmatmul.mubr.msk.f32.vlgmr.msra.gmra.mrb[6].mxu0 %vm703_vm1, %v9448_v44  ;;  %v1893_v44 = vld [vmem:[%s13080_s1 + $0x8] sm:$0xff]  ;;  %s13098_s1 = sld [smem:[#allocation72_spill]] }
 0x718   :  { %10110 = vmatpush3.bf16.msk.msra.mxu0 %vm12173_vm7, %v10105_v50  ;;  %9484 = vmatprep.mubr.msk.f32.mxu0 %vm787_vm4, %v1376_v58  ;;  %v10123_v45 = vpack.c.bf16 %v1893_v44, %v1892_v43  ;;  %v1988_v50 = vld [vmem:[%s13081_s25 + $0x10] sm:$0xff] }
 0x719   :  { %9487 = vmatprep.subr.mxu0 %v1466_v59  ;;  %v2131_v43 = vld [vmem:[%s13082_s8 + $0x10] sm:$0xff] }
 0x71a   :  { %10124 = vmatprep.subr.bf16.mxu1 %v10123_v45 }
 0x71b   :  { %9485 = vmatmul.mubr.msk.f32.vlgmr.msra.gmra.mrb[8].mxu0 %vm787_vm4, %v1377_v62  ;;  %10126 = vmatpush3.bf16.msra.mxu1 %v10123_v45  ;;  %v10151_v45 = vpack.c.bf16 %v2132_v39, %v2131_v43 }
 0x71c   :  { %9488 = vmatpush3.msra.mxu0 %v1466_v59  ;;  %10128 = vmatprep.subr.bf16.mxu1 %v10127_v47 }
 0x71d   :  { %10119 = vmatprep.subr.msk.bf16.mxu0 %vm12173_vm7, %v10117_v63 }
 0x71f   :  { %10130 = vmatpush3.bf16.msra.mxu1 %v10127_v47 }
 0x79f   :  { %v1643_v0 = vpop.xlane.xlu0 %1642 }
 0x7a0   :  { %v1647_v1 = vsub.f32 %v1632_v52, %v1643_v0  ;;  %v1989_v52 = vld [vmem:[%s13081_s25 + $0x18] sm:$0xff] }
 0x7a1   :  { %v10135_v53 = vpack.c.bf16 %v1989_v52, %v1988_v50  ;;  %v8933_v0 = vld [vmem:[#allocation23] ss:$0 sm:$0xff] }
 0x7a2   :  { %v1649_v2 = vmul.f32 1.442695, %v1647_v1 }
 0x7a3   :  { %v1646_v3 = vpop.xlane.xlu0 %1645 }
 0x7a4   :  { %10691 = vpow2.f32 %v1649_v2  ;;  %v1648_v4 = vsub.f32 %v9498_v51, %v1646_v3  ;;  %v10131_v51 = vpack.c.bf16 %v1987_v49, %v1986_v48  ;;  %v8934_v2 = vld [vmem:[#allocation22] ss:$0 sm:$0xff] }
 0x7a6   :  { %v1651_v6 = vmul.f32 1.442695, %v1648_v4 }
 0x7a8   :  { %10693 = vpow2.f32 %v1651_v6 }
 0x7ae   :  { %v10692_v8 = vpop.eup %10691 }
 0x7af   :  { %v1653_v9 = vsel %vm787_vm4, %v10692_v8, 0.0 }
 0x7b0   :  { %1654 = vadd.xlane.f32.xlu0 %v1653_v9 }
 0x7b2   :  { %v10694_v10 = vpop.eup %10693 }
 0x7b3   :  { %v1656_v11 = vsel %vm791_vm3, %v10694_v10, 0.0 }
 0x7b4   :  { %1657 = vadd.xlane.f32.xlu0 %v1656_v11  ;;  %v1992_v11 = vld [vmem:[%s13081_s25 + $0x30] sm:$0xff] }
 0x7ee   :  { %v9486_v12 = vpop.f32.mrb[8].mxu0 }
 0x7ef   :  { %v1457_v14 = vpop.f32.mrb[9].mxu0 }
 0x7f0   :  { %9489 = vmatprep.mubr.msk.f32.mxu0 %vm703_vm1, %v1457_v14 }
 0x7f1   :  { %9490 = vmatmul.mubr.msk.f32.vlgmr.msra.gmra.mrb[6].mxu0 %vm703_vm1, %v9486_v12  ;;  %v1993_v12 = vld [vmem:[%s13081_s25 + $0x38] sm:$0xff]  ;;  %s13099_s25 = sld [smem:[#allocation76_spill]] }
 0x7f2   :  { %10122 = vmatpush3.bf16.msk.msra.mxu0 %vm12173_vm7, %v10117_v63  ;;  %v10143_v14 = vpack.c.bf16 %v1993_v12, %v1992_v11 }
 0x7f3   :  { %9506 = vmatprep.subr.mxu0 %v1751_v15 }
 0x83d   :  { %v1655_v16 = vpop.xlane.xlu0 %1654 }
 0x83e   :  { %10695 = vrcp.f32 %v1655_v16 }
 0x841   :  { %v1658_v18 = vpop.xlane.xlu0 %1657 }
 0x842   :  { %10697 = vrcp.f32 %v1658_v18 }
 0x848   :  { %v10696_v19 = vpop.eup %10695 }
 0x849   :  { %v1661_v20 = vmul.f32 %v10696_v19, %v10692_v8 }
 0x84b   :  { %9503 = vmatprep.mubr.msk.f32.mxu0 %vm787_vm4, %v1661_v20 }
 0x84c   :  { %v10698_v21 = vpop.eup %10697 }
 0x84d   :  { %v1662_v22 = vmul.f32 %v10698_v21, %v10694_v10 }
 0x84f   :  { %9504 = vmatmul.mubr.msk.f32.vlgmr.msra.gmra.mrb[10].mxu0 %vm787_vm4, %v1662_v22 }
 0x850   :  { %9507 = vmatpush3.msra.mxu0 %v1751_v15  ;;  %v8935_v15 = vld [vmem:[#allocation19] ss:$0 sm:$0xff] }
 0x851   :  { %10132 = vmatprep.subr.bf16.mxu0 %v10131_v51 }
 0x922   :  { %v9505_v23 = vpop.f32.mrb[10].mxu0 }
 0x923   :  { %v1742_v24 = vpop.f32.mrb[11].mxu0 }
 0x924   :  { %9508 = vmatprep.mubr.msk.f32.mxu0 %vm703_vm1, %v1742_v24 }
 0x925   :  { %9509 = vmatmul.mubr.msk.f32.vlgmr.msra.gmra.mrb[6].mxu0 %vm703_vm1, %v9505_v23  ;;  %v8938_v23 = vld [vmem:[#allocation20] ss:$0 sm:$0xff] }
 0x926   :  { %10134 = vmatpush3.bf16.msra.mxu0 %v10131_v51 }
 0x927   :  { %10136 = vmatprep.subr.bf16.mxu0 %v10135_v53 }
 0x92a   :  { %10138 = vmatpush3.bf16.msra.mxu0 %v10135_v53  ;;  %v8941_v53 = vld [vmem:[#allocation26] ss:$0 sm:$0xff] }
 0x92b   :  { %10140 = vmatprep.subr.bf16.mxu0 %v10139_v56 }
 0x92e   :  { %10142 = vmatpush3.bf16.msra.mxu0 %v10139_v56 }
 0x92f   :  { %10144 = vmatprep.subr.bf16.mxu0 %v10143_v14 }
 0x932   :  { %10146 = vmatpush3.bf16.msra.mxu0 %v10143_v14 }
 0x9f8   :  { %v9510_v26 = vpop.f32.mrb[6].mxu0 }
 0x9f9   :  { %v1843_v27 = vadd.f32 %v9510_v26, %v8932_v25  ;;  %v1824_v28 = vpop.f32.mrb[7].mxu0 }
 0x9fa   :  { %v1842_v29 = vadd.f32 %v8932_v25, %v1824_v28 }
 0x9fb   :  { %v1845_v30 = vadd.f32 %v1843_v27, %v12087_v7 }
 0x9fc   :  { %v1844_v31 = vadd.f32 %v1842_v29, %v12082_v5 }
 0x9fd   :  { %v1852_v32 = vsel %vm1851_vm8, %v1845_v30, 0.0 }
 0x9fe   :  { %1853 = vadd.xlane.f32.xlu1 %v1852_v32  ;;  %v1848_v33 = vsel %vm615_vm0, %v1844_v31, 0.0 }
 0x9ff   :  { %1849 = vadd.xlane.f32.xlu0 %v1848_v33 }
 0xa8b   :  { %v1854_v34 = vpop.xlane.xlu1 %1853 }
 0xa8c   :  { %v1857_v35 = vmul.f32 0.03125, %v1854_v34  ;;  %v1850_v36 = vpop.xlane.xlu0 %1849 }
 0xa8d   :  { %v1856_v37 = vmul.f32 0.03125, %v1850_v36 }
 0xa8e   :  { %v1859_v38 = vsub.f32 %v1845_v30, %v1857_v35 }
 0xa8f   :  { %v1858_v41 = vsub.f32 %v1844_v31, %v1856_v37 }
 0xa90   :  { %v1861_v7 = vmul.f32 %v1859_v38, %v1859_v38 }
 0xa91   :  { %v1860_v40 = vmul.f32 %v1858_v41, %v1858_v41 }
 0xa92   :  { %v1865_v42 = vsel %vm1851_vm8, %v1861_v7, 0.0  ;;  %v2129_v7 = vld [vmem:[%s13082_s8] sm:$0xff] }
 0xa93   :  { %v1862_v5 = vsel %vm615_vm0, %v1860_v40, 0.0 }
 0xa94   :  { %1863 = vadd.xlane.f32.xlu0 %v1862_v5 }
 0xa98   :  { %1866 = vadd.xlane.f32.xlu0 %v1865_v42  ;;  %v2130_v42 = vld [vmem:[%s13082_s8 + $0x8] sm:$0xff]  ;;  %s13100_s8 = sld [smem:[#allocation75_spill]] }
 0xa99   :  { %v10147_v44 = vpack.c.bf16 %v2130_v42, %v2129_v7 }
 0xa9b   :  { %10148 = vmatprep.subr.bf16.mxu1 %v10147_v44 }
 0xb21   :  { %v1864_v57 = vpop.xlane.xlu0 %1863 }
 0xb22   :  { %v1868_v58 = vmul.f32 0.03125, %v1864_v57 }
 0xb24   :  { %v1870_v59 = vadd.f32 1e-05, %v1868_v58 }
 0xb25   :  { %v1867_v60 = vpop.xlane.xlu0 %1866 }
 0xb26   :  { %10699 = vrsqrt.f32 %v1870_v59  ;;  %v1869_v61 = vmul.f32 0.03125, %v1867_v60 }
 0xb28   :  { %v1871_v62 = vadd.f32 1e-05, %v1869_v61 }
 0xb2a   :  { %10701 = vrsqrt.f32 %v1871_v62  ;;  %v8943_v62 = vld [vmem:[#allocation40] ss:$0 sm:$0xff] }
 0xb30   :  { %v10700_v63 = vpop.eup %10699 }
 0xb31   :  { %v1874_v1 = vmul.f32 %v10700_v63, %v1858_v41 }
 0xb33   :  { %v1882_v3 = vmul.f32 %v8933_v0, %v1874_v1 }
 0xb34   :  { %v10702_v4 = vpop.eup %10701 }
 0xb35   :  { %v1875_v6 = vmul.f32 %v10702_v4, %v1859_v38  ;;  %v1890_v8 = vadd.f32 %v8934_v2, %v1882_v3 }
 0xb37   :  { %v1883_v9 = vmul.f32 %v8933_v0, %v1875_v6  ;;  %9519 = vmatprep.mubr.msk.f32.mxu1 %vm615_vm0, %v1890_v8 }
 0xb39   :  { %v1891_v10 = vadd.f32 %v8934_v2, %v1883_v9 }
 0xb3b   :  { %9520 = vmatmul.mubr.msk.f32.vlgmr.msra.gmra.mrb[8].mxu1 %vm615_vm0, %v1891_v10 }
 0xb3c   :  { %10150 = vmatpush3.bf16.msra.mxu1 %v10147_v44 }
 0xb3d   :  { %10152 = vmatprep.subr.bf16.mxu1 %v10151_v45 }
 0xb40   :  { %10154 = vmatpush3.bf16.msra.mxu1 %v10151_v45 }
 0xc0e   :  { %v9521_v16 = vpop.f32.mrb[8].mxu1 }
 0xc0f   :  { %v1981_v18 = vadd.f32 %v9521_v16, %v8935_v15  ;;  %v1975_v19 = vpop.f32.mrb[9].mxu1 }
 0xc10   :  { %v1976_v20 = vadd.f32 %v8935_v15, %v1975_v19 }
 0xc11   :  { %v1985_v22 = vmax.f32 %v1981_v18, 0.0 }
 0xc12   :  { %v1984_v21 = vmax.f32 %v1976_v20, 0.0 }
 0xc14   :  { %9538 = vmatprep.mubr.msk.f32.mxu0 %vm2001_vm9, %v1984_v21 }
 0xc15   :  { %9539 = vmatmul.mubr.msk.f32.vlgmr.msra.gmra.mrb[12].mxu0 %vm2001_vm9, %v1985_v22 }
 0xce8   :  { %v9540_v24 = vpop.f32.mrb[12].mxu0 }
 0xce9   :  { %v2074_v25 = vpop.f32.mrb[13].mxu0  ;;  %v2080_v26 = vadd.f32 %v9540_v24, %v8938_v23 }
 0xcea   :  { %v2075_v27 = vadd.f32 %v8938_v23, %v2074_v25 }
 0xceb   :  { %v2084_v30 = vadd.f32 %v2080_v26, %v1891_v10 }
 0xcec   :  { %v2083_v28 = vadd.f32 %v2075_v27, %v1890_v8 }
 0xced   :  { %v2090_v31 = vsel %vm1851_vm8, %v2084_v30, 0.0 }
 0xcee   :  { %v2087_v29 = vsel %vm615_vm0, %v2083_v28, 0.0 }
 0xcef   :  { %2088 = vadd.xlane.f32.xlu0 %v2087_v29 }
 0xcf3   :  { %2091 = vadd.xlane.f32.xlu0 %v2090_v31 }
 0xd7c   :  { %v2089_v32 = vpop.xlane.xlu0 %2088 }
 0xd7d   :  { %v2093_v33 = vmul.f32 0.03125, %v2089_v32 }
 0xd7f   :  { %v2095_v34 = vsub.f32 %v2083_v28, %v2093_v33 }
 0xd80   :  { %v2092_v35 = vpop.xlane.xlu0 %2091 }
 0xd81   :  { %v2094_v36 = vmul.f32 0.03125, %v2092_v35  ;;  %v2097_v37 = vmul.f32 %v2095_v34, %v2095_v34 }
 0xd83   :  { %v2096_v38 = vsub.f32 %v2084_v30, %v2094_v36  ;;  %v2099_v41 = vsel %vm615_vm0, %v2097_v37, 0.0 }
 0xd84   :  { %2100 = vadd.xlane.f32.xlu0 %v2099_v41 }
 0xd85   :  { %v2098_v40 = vmul.f32 %v2096_v38, %v2096_v38 }
 0xd87   :  { %v2102_v5 = vsel %vm1851_vm8, %v2098_v40, 0.0 }
 0xd88   :  { %2103 = vadd.xlane.f32.xlu0 %v2102_v5 }
 0xe11   :  { %v2101_v46 = vpop.xlane.xlu0 %2100 }
 0xe12   :  { %v2105_v47 = vmul.f32 0.03125, %v2101_v46 }
 0xe14   :  { %v2107_v48 = vadd.f32 1e-05, %v2105_v47 }
 0xe15   :  { %v2104_v49 = vpop.xlane.xlu0 %2103 }
 0xe16   :  { %10703 = vrsqrt.f32 %v2107_v48  ;;  %v2106_v50 = vmul.f32 0.03125, %v2104_v49 }
 0xe18   :  { %v2108_v51 = vadd.f32 1e-05, %v2106_v50 }
 0xe1a   :  { %10705 = vrsqrt.f32 %v2108_v51 }
 0xe20   :  { %v10704_v52 = vpop.eup %10703 }
 0xe21   :  { %v2111_v54 = vmul.f32 %v10704_v52, %v2095_v34 }
 0xe23   :  { %v2119_v56 = vmul.f32 %v8941_v53, %v2111_v54 }
 0xe24   :  { %v10706_v57 = vpop.eup %10705 }
 0xe25   :  { %v2112_v58 = vmul.f32 %v10706_v57, %v2096_v38  ;;  %v12257_v59 = vadd.f32 %v8942_v55, %v2119_v56 }
 0xe27   :  { %v2120_v60 = vmul.f32 %v8941_v53, %v2112_v58  ;;  %9549 = vmatprep.mubr.msk.f32.mxu1 %vm615_vm0, %v12257_v59 }
 0xe29   :  { %v12261_v61 = vadd.f32 %v8942_v55, %v2120_v60 }
 0xe2b   :  { %9550 = vmatmul.mubr.msk.f32.vlgmr.msra.gmra.mrb[10].mxu1 %vm615_vm0, %v12261_v61 }
 0xefe   :  { %v9551_v63 = vpop.f32.mrb[10].mxu1 }
 0xeff   :  { %v12265_v0 = vadd.f32 %v9551_v63, %v8943_v62  ;;  %v2212_v1 = vpop.f32.mrb[11].mxu1 }
 0xf00   :  { %v12267_v2 = vadd.f32 %v8943_v62, %v2212_v1 }
 0xf02   :  { %9556 = vmatprep.mubr.msk.f32.mxu1 %vm703_vm1, %v12267_v2  ;;  %v12273_v3 = vpack.i.bf16 %v12265_v0, %v12267_v2 }
 0xf04   :  { %10543 = vrot.lane.b32.xlu1 %v12273_v3, %s11601_s12  ;;  %10538 = vrot.lane.b32.xlu0 %v12273_v3, %s11600_s13 }
 0xf08   :  { %10548 = vrot.lane.b32.xlu1 %v12273_v3, %s11603_s30  ;;  %2421 = vrot.lane.b32.xlu0 %v12267_v2, %s11599_s22 }
 0xf0c   :  { %2787 = vrot.lane.b32.xlu1 %v12265_v0, %s11602_s24  ;;  %2423 = vrot.lane.b32.xlu0 %v12265_v0, %s11599_s22 }
 0xf10   :  { %2785 = vrot.lane.b32.xlu0 %v12267_v2, %s11602_s24 }
 0xf76   :  { %v10544_v4 = vpop.permute.xlu1 %10543  ;;  %v10539_v6 = vpop.permute.xlu0 %10538 }
 0xf77   :  { %v10546_v8 = vunpack.i.h.bf16 %v10544_v4  ;;  %v10545_v9 = vunpack.i.l.bf16 %v10544_v4  ;;  %v10541_v10 = vunpack.i.h.bf16 %v10539_v6  ;;  %v10540_v11 = vunpack.i.l.bf16 %v10539_v6 }
 0xf79   :  { %v10155_v12 = vpack.c.bf16 %v10541_v10, %v10540_v11  ;;  %v10167_v14 = vpack.c.bf16 %v10546_v8, %v10545_v9 }
 0xf7a   :  { %v10549_v15 = vpop.permute.xlu1 %10548  ;;  %v2422_v19 = vpop.permute.xlu0 %2421 }
 0xf7b   :  { %10157 = vmatprep.subr.msk.bf16.mxu1 %vm12117_vm2, %v10155_v12  ;;  %v10551_v16 = vunpack.i.h.bf16 %v10549_v15  ;;  %v10550_v18 = vunpack.i.l.bf16 %v10549_v15 }
 0xf7c   :  { %10160 = vmatpush3.bf16.xpose.msk.msra.mxu1 %vm12117_vm2, %v10155_v12 }
 0xf7d   :  { %10169 = vmatprep.subr.msk.bf16.mxu1 %vm12117_vm2, %v10167_v14  ;;  %v10179_v20 = vpack.c.bf16 %v10551_v16, %v10550_v18 }
 0xf7e   :  { %v2424_v21 = vpop.permute.xlu0 %2423  ;;  %v2788_v23 = vpop.permute.xlu1 %2787 }
 0xf82   :  { %v2786_v22 = vpop.permute.xlu0 %2785 }
 0xf83   :  { %9557 = vmatmul.mubr.msk.f32.vlgmr.msra.gmra.mrb[12].mxu1 %vm703_vm1, %v12265_v0 }
 0xf84   :  { %10172 = vmatpush3.bf16.xpose.msk.msra.mxu1 %vm12117_vm2, %v10167_v14  ;;  %9570 = vmatprep.mubr.msk.f32.mxu1 %vm703_vm1, %v2422_v19 }
 0xf85   :  { %10181 = vmatprep.subr.msk.bf16.mxu1 %vm12117_vm2, %v10179_v20 }
 0xf8b   :  { %9571 = vmatmul.mubr.msk.f32.vlgmr.msra.gmra.mrb[14].mxu1 %vm703_vm1, %v2424_v21 }
 0xf8c   :  { %10184 = vmatpush3.bf16.xpose.msk.msra.mxu1 %vm12117_vm2, %v10179_v20  ;;  %9594 = vmatprep.mubr.msk.f32.mxu1 %vm703_vm1, %v2786_v22 }
 0xf93   :  { %9595 = vmatmul.mubr.msk.f32.vlgmr.msra.gmra.mrb[16].mxu1 %vm703_vm1, %v2788_v23 }
0x1056   :  { %v9558_v24 = vpop.f32.mrb[12].mxu1 }
0x1057   :  { %v2301_v25 = vpop.f32.mrb[13].mxu1  ;;  %v2313_v26 = vsel %vm791_vm3, %v9558_v24, -inf }
0x1058   :  { %2314 = vmax.xlane.f32.xlu1 %v2313_v26  ;;  %v2310_v27 = vsel %vm787_vm4, %v2301_v25, -inf }
0x1059   :  { %2311 = vmax.xlane.f32.xlu0 %v2310_v27 }
0x105e   :  { %v9572_v28 = vpop.f32.mrb[14].mxu1 }
0x105f   :  { %v2503_v29 = vpop.f32.mrb[15].mxu1  ;;  %v2515_v31 = vsel %vm791_vm3, %v9572_v28, -inf }
0x1060   :  { %v2512_v30 = vsel %vm787_vm4, %v2503_v29, -inf }
0x1061   :  { %2513 = vmax.xlane.f32.xlu0 %v2512_v30 }
0x1065   :  { %2516 = vmax.xlane.f32.xlu0 %v2515_v31 }
0x1066   :  { %v12311_v32 = vpop.f32.mrb[16].mxu1 }
0x1067   :  { %v12313_v33 = vpop.f32.mrb[17].mxu1  ;;  %v2879_v53 = vsel %vm791_vm3, %v12311_v32, -inf }
0x1068   :  { %v2876_v52 = vsel %vm787_vm4, %v12313_v33, -inf }
0x10e5   :  { %v2315_v34 = vpop.xlane.xlu1 %2314 }
0x10e6   :  { %v2317_v35 = vsub.f32 %v9558_v24, %v2315_v34  ;;  %v2312_v36 = vpop.xlane.xlu0 %2311 }
0x10e7   :  { %v2316_v37 = vsub.f32 %v2301_v25, %v2312_v36 }
0x10e8   :  { %v2320_v38 = vmul.f32 1.442695, %v2317_v35  ;;  %v2622_v35 = vld [vmem:[%s13083_s2 + $0x8] sm:$0xff] }
0x10e9   :  { %v2318_v41 = vmul.f32 1.442695, %v2316_v37 }
0x10ea   :  { %10707 = vpow2.f32 %v2320_v38 }
0x10eb   :  { %10709 = vpow2.f32 %v2318_v41 }
0x10ee   :  { %v2514_v40 = vpop.xlane.xlu0 %2513 }
0x10ef   :  { %v2518_v5 = vsub.f32 %v2503_v29, %v2514_v40 }
0x10f1   :  { %v2520_v7 = vmul.f32 1.442695, %v2518_v5 }
0x10f2   :  { %v2517_v42 = vpop.xlane.xlu0 %2516 }
0x10f3   :  { %10711 = vpow2.f32 %v2520_v7  ;;  %v2519_v43 = vsub.f32 %v9572_v28, %v2517_v42 }
0x10f4   :  { %v10708_v44 = vpop.eup %10707 }
0x10f5   :  { %v10710_v39 = vpop.eup %10709  ;;  %v2522_v45 = vmul.f32 1.442695, %v2519_v43  ;;  %v2325_v46 = vsel %vm791_vm3, %v10708_v44, 0.0 }
0x10f6   :  { %2326 = vadd.xlane.f32.xlu0 %v2325_v46  ;;  %v2322_v47 = vsel %vm787_vm4, %v10710_v39, 0.0 }
0x10f7   :  { %10713 = vpow2.f32 %v2522_v45  ;;  %2323 = vadd.xlane.f32.xlu1 %v2322_v47 }
0x10fd   :  { %v10712_v48 = vpop.eup %10711 }
0x10fe   :  { %v2524_v49 = vsel %vm787_vm4, %v10712_v48, 0.0 }
0x10ff   :  { %2525 = vadd.xlane.f32.xlu1 %v2524_v49 }
0x1101   :  { %v10714_v50 = vpop.eup %10713 }
0x1102   :  { %v2527_v51 = vsel %vm791_vm3, %v10714_v50, 0.0 }
0x1103   :  { %2528 = vadd.xlane.f32.xlu0 %v2527_v51  ;;  %v2986_v51 = vld [vmem:[%s13083_s2 + $0x10] sm:$0xff] }
0x1110   :  { %10553 = vrot.lane.b32.xlu1 %v12273_v3, %s11606_s29 }
0x1114   :  { %10563 = vrot.lane.b32.xlu1 %v12273_v3, %s11605_s27 }
0x1118   :  { %3070 = vrot.lane.b32.xlu1 %v12267_v2, %s11607_s26 }
0x1119   :  { %10558 = vrot.lane.b32.xlu0 %v12273_v3, %s11604_s23 }
0x111d   :  { %3072 = vrot.lane.b32.xlu0 %v12265_v0, %s11607_s26 }
0x113c   :  { %2877 = vmax.xlane.f32.xlu1 %v2876_v52  ;;  %2880 = vmax.xlane.f32.xlu0 %v2879_v53 }
0x1183   :  { %v2327_v55 = vpop.xlane.xlu0 %2326 }
0x1184   :  { %v2324_v54 = vpop.xlane.xlu1 %2323 }
0x1185   :  { %10715 = vrcp.f32 %v2324_v54 }
0x1186   :  { %10717 = vrcp.f32 %v2327_v55 }
0x118c   :  { %v2526_v56 = vpop.xlane.xlu1 %2525 }
0x118d   :  { %10719 = vrcp.f32 %v2526_v56 }
0x118f   :  { %v10716_v57 = vpop.eup %10715 }
0x1190   :  { %v10554_v58 = vpop.permute.xlu1 %10553  ;;  %v2529_v60 = vpop.xlane.xlu0 %2528  ;;  %v2330_v62 = vmul.f32 %v10716_v57, %v10710_v39 }
0x1191   :  { %v10556_v63 = vunpack.i.h.bf16 %v10554_v58  ;;  %v10555_v0 = vunpack.i.l.bf16 %v10554_v58  ;;  %10721 = vrcp.f32 %v2529_v60  ;;  %v10718_v2 = vpop.eup %10717 }
0x1192   :  { %9563 = vmatprep.mubr.msk.f32.mxu0 %vm787_vm4, %v2330_v62  ;;  %v2331_v16 = vmul.f32 %v10718_v2, %v10708_v44 }
0x1193   :  { %v10161_v1 = vpack.c.bf16 %v10556_v63, %v10555_v0 }
0x1194   :  { %v10564_v4 = vpop.permute.xlu1 %10563  ;;  %v10559_v6 = vpop.permute.xlu0 %10558 }
0x1195   :  { %v10566_v8 = vunpack.i.h.bf16 %v10564_v4  ;;  %v10565_v9 = vunpack.i.l.bf16 %v10564_v4  ;;  %v10561_v10 = vunpack.i.h.bf16 %v10559_v6  ;;  %v10560_v11 = vunpack.i.l.bf16 %v10559_v6  ;;  %10163 = vmatprep.subr.msk.bf16.mxu0 %vm12173_vm7, %v10161_v1 }
0x1196   :  { %10166 = vmatpush3.bf16.msk.msra.mxu0 %vm12173_vm7, %v10161_v1 }
0x1197   :  { %v10720_v12 = vpop.eup %10719  ;;  %v10191_v14 = vpack.c.bf16 %v10566_v8, %v10565_v9  ;;  %v10173_v15 = vpack.c.bf16 %v10561_v10, %v10560_v11  ;;  %v3271_v11 = vld [vmem:[%s13083_s2 + $0x18] sm:$0xff] }
0x1198   :  { %v3071_v18 = vpop.permute.xlu1 %3070  ;;  %v2532_v19 = vmul.f32 %v10720_v12, %v10712_v48  ;;  %v3073_v22 = vpop.permute.xlu0 %3072 }
0x1199   :  { %9564 = vmatmul.mubr.msk.f32.vlgmr.msra.gmra.mrb[14].mxu0 %vm787_vm4, %v2331_v16  ;;  %10175 = vmatprep.subr.msk.bf16.mxu0 %vm12173_vm7, %v10173_v15 }
0x119a   :  { %10193 = vmatprep.subr.msk.bf16.mxu1 %vm12117_vm2, %v10191_v14  ;;  %9613 = vmatprep.mubr.msk.f32.mxu1 %vm703_vm1, %v3071_v18 }
0x119b   :  { %v10722_v20 = vpop.eup %10721  ;;  %10178 = vmatpush3.bf16.msk.msra.mxu0 %vm12173_vm7, %v10173_v15  ;;  %9577 = vmatprep.mubr.msk.f32.mxu0 %vm787_vm4, %v2532_v19  ;;  %v8982_v19 = vld [vmem:[#allocation29] ss:$0 sm:$0xff] }
0x119c   :  { %10196 = vmatpush3.bf16.xpose.msk.msra.mxu1 %vm12117_vm2, %v10191_v14  ;;  %v2533_v21 = vmul.f32 %v10722_v20, %v10714_v50  ;;  %9580 = vmatprep.subr.mxu0 %v2622_v35 }
0x119e   :  { %9578 = vmatmul.mubr.msk.f32.vlgmr.msra.gmra.mrb[16].mxu0 %vm787_vm4, %v2533_v21 }
0x119f   :  { %9581 = vmatpush3.msra.mxu0 %v2622_v35 }
0x11a3   :  { %9614 = vmatmul.mubr.msk.f32.vlgmr.msra.gmra.mrb[18].mxu1 %vm703_vm1, %v3073_v22 }
0x11c9   :  { %v2878_v23 = vpop.xlane.xlu1 %2877  ;;  %v2881_v24 = vpop.xlane.xlu0 %2880 }
0x11ca   :  { %v2882_v25 = vsub.f32 %v12313_v33, %v2878_v23  ;;  %v2883_v26 = vsub.f32 %v12311_v32, %v2881_v24  ;;  %v2420_v33 = vld [vmem:[%s13083_s2] sm:$0xff]  ;;  %s13101_s2 = sld [smem:[#allocation69_spill]] }
0x11cb   :  { %9585 = vmatprep.subr.mxu0 %v2420_v33 }
0x11cc   :  { %v2884_v27 = vmul.f32 1.442695, %v2882_v25  ;;  %v2886_v28 = vmul.f32 1.442695, %v2883_v26 }
0x11ce   :  { %10723 = vpow2.f32 %v2884_v27 }
0x11cf   :  { %10725 = vpow2.f32 %v2886_v28 }
0x11d8   :  { %v10724_v29 = vpop.eup %10723 }
0x11d9   :  { %v10726_v30 = vpop.eup %10725  ;;  %v2888_v31 = vsel %vm787_vm4, %v10724_v29, 0.0 }
0x11da   :  { %2889 = vadd.xlane.f32.xlu0 %v2888_v31  ;;  %v2891_v34 = vsel %vm791_vm3, %v10726_v30, 0.0 }
0x11db   :  { %2892 = vadd.xlane.f32.xlu1 %v2891_v34 }
0x11f0   :  { %10568 = vrot.lane.b32.xlu0 %v12273_v3, %s11608_s21 }
0x1267   :  { %v2890_v32 = vpop.xlane.xlu0 %2889 }
0x1268   :  { %v2893_v41 = vpop.xlane.xlu1 %2892  ;;  %10727 = vrcp.f32 %v2890_v32 }
0x1269   :  { %10729 = vrcp.f32 %v2893_v41  ;;  %v3412_v41 = vld [vmem:[%s13084_s4 + $0x10] sm:$0xff] }
0x126b   :  { %v10569_v37 = vpop.permute.xlu0 %10568 }
0x126c   :  { %v9565_v36 = vpop.f32.mrb[14].mxu0  ;;  %v10571_v40 = vunpack.i.h.bf16 %v10569_v37  ;;  %v10570_v5 = vunpack.i.l.bf16 %v10569_v37  ;;  %v3411_v37 = vld [vmem:[%s13084_s4 + $0x8] sm:$0xff] }
0x126d   :  { %v2411_v38 = vpop.f32.mrb[15].mxu0 }
0x126e   :  { %v10185_v43 = vpack.c.bf16 %v10571_v40, %v10570_v5  ;;  %v3413_v40 = vld [vmem:[%s13084_s4 + $0x18] sm:$0xff] }
0x126f   :  { %v10207_v5 = vpack.c.bf16 %v3413_v40, %v3412_v41 }
0x1271   :  { %v9579_v7 = vpop.f32.mrb[16].mxu0 }
0x1272   :  { %v2613_v42 = vpop.f32.mrb[17].mxu0  ;;  %v10728_v46 = vpop.eup %10727 }
0x1273   :  { %9582 = vmatprep.mubr.msk.f32.mxu0 %vm703_vm1, %v2613_v42  ;;  %v10730_v47 = vpop.eup %10729  ;;  %v2896_v49 = vmul.f32 %v10728_v46, %v10724_v29  ;;  %v3504_v42 = vld [vmem:[%s13085_s5] sm:$0xff] }
0x1274   :  { %9583 = vmatmul.mubr.msk.f32.vlgmr.msra.gmra.mrb[18].mxu0 %vm703_vm1, %v9579_v7  ;;  %v2897_v50 = vmul.f32 %v10730_v47, %v10726_v30  ;;  %v11611_v7 = vmov 0.0|0.0   ;;  %v3508_v47 = vld [vmem:[%s13085_s5 + $0x20] sm:$0xff] }
0x1275   :  { %9586 = vmatpush3.msra.mxu0 %v2420_v33  ;;  %9587 = vmatprep.mubr.msk.f32.mxu0 %vm703_vm1, %v2411_v38 }
0x1276   :  { %v9615_v44 = vpop.f32.mrb[18].mxu1  ;;  %10187 = vmatprep.subr.msk.bf16.mxu0 %vm12173_vm7, %v10185_v43 }
0x1277   :  { %v3152_v39 = vpop.f32.mrb[19].mxu1  ;;  %v3164_v48 = vsel %vm791_vm3, %v9615_v44, -inf }
0x1278   :  { %v3161_v45 = vsel %vm787_vm4, %v3152_v39, -inf }
0x1279   :  { %3162 = vmax.xlane.f32.xlu1 %v3161_v45  ;;  %v3507_v45 = vld [vmem:[%s13085_s5 + $0x18] sm:$0xff] }
0x127c   :  { %9588 = vmatmul.mubr.msk.f32.vlgmr.msra.gmra.mrb[18].mxu0 %vm703_vm1, %v9565_v36  ;;  %v3410_v36 = vld [vmem:[%s13084_s4] sm:$0xff]  ;;  %s13102_s4 = sld [smem:[#allocation71_spill]] }
0x127d   :  { %3165 = vmax.xlane.f32.xlu1 %v3164_v48  ;;  %10190 = vmatpush3.bf16.msk.msra.mxu0 %vm12173_vm7, %v10185_v43  ;;  %v10203_v38 = vpack.c.bf16 %v3411_v37, %v3410_v36  ;;  %v3505_v43 = vld [vmem:[%s13085_s5 + $0x8] sm:$0xff] }
0x127e   :  { %9601 = vmatprep.mubr.msk.f32.mxu0 %vm787_vm4, %v2896_v49  ;;  %9604 = vmatprep.subr.mxu0 %v2986_v51  ;;  %v3509_v48 = vld [vmem:[%s13085_s5 + $0x28] sm:$0xff] }
0x127f   :  { %10204 = vmatprep.subr.bf16.mxu1 %v10203_v38  ;;  %v10219_v49 = vpack.c.bf16 %v3509_v48, %v3508_v47 }
0x1280   :  { %9602 = vmatmul.mubr.msk.f32.vlgmr.msra.gmra.mrb[20].mxu0 %vm787_vm4, %v2897_v50  ;;  %10206 = vmatpush3.bf16.msra.mxu1 %v10203_v38 }
0x1281   :  { %9605 = vmatpush3.msra.mxu0 %v2986_v51  ;;  %10208 = vmatprep.subr.bf16.mxu1 %v10207_v5 }
0x1284   :  { %10210 = vmatpush3.bf16.msra.mxu1 %v10207_v5 }
0x1285   :  { %10227 = vmatprep.subr.bf16.mxu1 %v11611_v7 }
0x1306   :  { %v3163_v52 = vpop.xlane.xlu1 %3162 }
0x1307   :  { %v3167_v53 = vsub.f32 %v3152_v39, %v3163_v52  ;;  %v10211_v39 = vpack.c.bf16 %v3505_v43, %v3504_v42 }
0x1309   :  { %v3169_v56 = vmul.f32 1.442695, %v3167_v53 }
0x130a   :  { %v3166_v54 = vpop.xlane.xlu1 %3165 }
0x130b   :  { %v3168_v55 = vsub.f32 %v9615_v44, %v3166_v54  ;;  %v3506_v44 = vld [vmem:[%s13085_s5 + $0x10] sm:$0xff] }
0x130c   :  { %v10215_v46 = vpack.c.bf16 %v3507_v45, %v3506_v44 }
0x130d   :  { %v3171_v57 = vmul.f32 1.442695, %v3168_v55 }
0x130f   :  { %10731 = vpow2.f32 %v3171_v57  ;;  %v8983_v57 = vld [vmem:[#allocation35] ss:$0 sm:$0xff] }
0x1310   :  { %10733 = vpow2.f32 %v3169_v56 }
0x1319   :  { %v10732_v58 = vpop.eup %10731 }
0x131a   :  { %v3176_v60 = vsel %vm791_vm3, %v10732_v58, 0.0  ;;  %v10734_v62 = vpop.eup %10733 }
0x131b   :  { %3177 = vadd.xlane.f32.xlu1 %v3176_v60  ;;  %v3173_v63 = vsel %vm787_vm4, %v10734_v62, 0.0  ;;  %v8984_v60 = vld [vmem:[#allocation34] ss:$0 sm:$0xff] }
0x131f   :  { %3174 = vadd.xlane.f32.xlu1 %v3173_v63 }
0x1330   :  { %10573 = vrot.lane.b32.xlu1 %v12273_v3, %s11609_s0 }
0x1353   :  { %v9603_v0 = vpop.f32.mrb[20].mxu0 }
0x1354   :  { %v2977_v1 = vpop.f32.mrb[21].mxu0 }
0x1355   :  { %9606 = vmatprep.mubr.msk.f32.mxu0 %vm703_vm1, %v2977_v1 }
0x1356   :  { %9607 = vmatmul.mubr.msk.f32.vlgmr.msra.gmra.mrb[18].mxu0 %vm703_vm1, %v9603_v0 }
0x13a8   :  { %v3178_v2 = vpop.xlane.xlu1 %3177 }
0x13a9   :  { %10735 = vrcp.f32 %v3178_v2  ;;  %v3697_v2 = vld [vmem:[%s13086_s7] sm:$0xff] }
0x13ac   :  { %v3175_v4 = vpop.xlane.xlu1 %3174 }
0x13ad   :  { %10737 = vrcp.f32 %v3175_v4  ;;  %v3698_v4 = vld [vmem:[%s13086_s7 + $0x8] sm:$0xff] }
0x13b0   :  { %v10574_v6 = vpop.permute.xlu1 %10573 }
0x13b1   :  { %v10576_v8 = vunpack.i.h.bf16 %v10574_v6  ;;  %v10575_v9 = vunpack.i.l.bf16 %v10574_v6 }
0x13b3   :  { %v10197_v10 = vpack.c.bf16 %v10576_v8, %v10575_v9  ;;  %v10736_v12 = vpop.eup %10735  ;;  %v10228_v8 = vpack.c.bf16 %v3698_v4, %v3697_v2  ;;  %v3945_v2 = vld [vmem:[%s13089_s20] sm:$0xff] }
0x13b4   :  { %v3182_v15 = vmul.f32 %v10736_v12, %v10732_v58 }
0x13b5   :  { %10199 = vmatprep.subr.msk.bf16.mxu0 %vm12173_vm7, %v10197_v10 }
0x13b6   :  { %10202 = vmatpush3.bf16.msk.msra.mxu0 %vm12173_vm7, %v10197_v10  ;;  %v3699_v10 = vld [vmem:[%s13086_s7 + $0x10] sm:$0xff] }
0x13b7   :  { %v10738_v3 = vpop.eup %10737  ;;  %9623 = vmatprep.subr.mxu0 %v3271_v11 }
0x13b8   :  { %v3181_v14 = vmul.f32 %v10738_v3, %v10734_v62  ;;  %v11613_v3 = vmov 0.0  }
0x13ba   :  { %9620 = vmatprep.mubr.msk.f32.mxu0 %vm787_vm4, %v3181_v14  ;;  %v12420_v14 = vld [vmem:[%s13087_s10] sm:$0xff]  ;;  %s13105_s10 = sld [smem:[#allocation77_spill]] }
0x13bb   :  { %9621 = vmatmul.mubr.msk.f32.vlgmr.msra.gmra.mrb[22].mxu0 %vm787_vm4, %v3182_v15  ;;  %v3510_v15 = vld [vmem:[%s13085_s5 + $0x30] sm:$0xff] }
0x13bc   :  { %9624 = vmatpush3.msra.mxu0 %v3271_v11  ;;  %v3700_v11 = vld [vmem:[%s13086_s7 + $0x18] sm:$0xff]  ;;  %s13104_s7 = sld [smem:[#allocation78_spill]] }
0x13bd   :  { %10212 = vmatprep.subr.bf16.mxu0 %v10211_v39  ;;  %v10231_v12 = vpack.c.bf16 %v3700_v11, %v3699_v10 }
0x148e   :  { %v9622_v16 = vpop.f32.mrb[22].mxu0 }
0x148f   :  { %v3262_v18 = vpop.f32.mrb[23].mxu0 }
0x1490   :  { %9625 = vmatprep.mubr.msk.f32.mxu0 %vm703_vm1, %v3262_v18 }
0x1491   :  { %9626 = vmatmul.mubr.msk.f32.vlgmr.msra.gmra.mrb[18].mxu0 %vm703_vm1, %v9622_v16  ;;  %v3511_v16 = vld [vmem:[%s13085_s5 + $0x38] sm:$0xff]  ;;  %s13103_s5 = sld [smem:[#allocation96_spill]] }
0x1492   :  { %10214 = vmatpush3.bf16.msra.mxu0 %v10211_v39  ;;  %v10223_v18 = vpack.c.bf16 %v3511_v16, %v3510_v15 }
0x1493   :  { %10216 = vmatprep.subr.bf16.mxu0 %v10215_v46 }
0x1496   :  { %10218 = vmatpush3.bf16.msra.mxu0 %v10215_v46 }
0x1497   :  { %10220 = vmatprep.subr.bf16.mxu0 %v10219_v49 }
0x149a   :  { %10222 = vmatpush3.bf16.msra.mxu0 %v10219_v49 }
0x149b   :  { %10224 = vmatprep.subr.bf16.mxu0 %v10223_v18 }
0x149e   :  { %10226 = vmatpush3.bf16.msra.mxu0 %v10223_v18 }
0x149f   :  { %9679 = vmatprep.subr.mxu0 %v11613_v3 }
0x1564   :  { %v9627_v20 = vpop.f32.mrb[18].mxu0 }
0x1565   :  { %v3363_v21 = vadd.f32 %v9627_v20, %v8982_v19  ;;  %v3344_v22 = vpop.f32.mrb[19].mxu0 }
0x1566   :  { %v3362_v23 = vadd.f32 %v8982_v19, %v3344_v22  ;;  %v8985_v19 = vld [vmem:[#allocation31] ss:$0 sm:$0xff] }
0x1567   :  { %v3365_v24 = vadd.f32 %v3363_v21, %v12261_v61 }
0x1568   :  { %v3364_v25 = vadd.f32 %v3362_v23, %v12257_v59 }
0x1569   :  { %v3371_v26 = vsel %vm1851_vm8, %v3365_v24, 0.0 }
0x156a   :  { %3372 = vadd.xlane.f32.xlu1 %v3371_v26  ;;  %v3368_v27 = vsel %vm615_vm0, %v3364_v25, 0.0  ;;  %v8995_v26 = vld [vmem:[%s13088_s3] ss:$0 sm:$0xff]  ;;  %s13106_s3 = sld [smem:[#allocation94_spill]] }
0x156b   :  { %3369 = vadd.xlane.f32.xlu0 %v3368_v27 }
0x15f7   :  { %v3373_v28 = vpop.xlane.xlu1 %3372 }
0x15f8   :  { %v3375_v29 = vmul.f32 0.03125, %v3373_v28  ;;  %v3370_v30 = vpop.xlane.xlu0 %3369 }
0x15f9   :  { %v3374_v31 = vmul.f32 0.03125, %v3370_v30 }
0x15fa   :  { %v3377_v34 = vsub.f32 %v3365_v24, %v3375_v29 }
0x15fb   :  { %v3376_v35 = vsub.f32 %v3364_v25, %v3374_v31 }
0x15fc   :  { %v3379_v59 = vmul.f32 %v3377_v34, %v3377_v34 }
0x15fd   :  { %v3378_v33 = vmul.f32 %v3376_v35, %v3376_v35 }
0x15fe   :  { %v3383_v32 = vsel %vm1851_vm8, %v3379_v59, 0.0 }
0x15ff   :  { %v3380_v61 = vsel %vm615_vm0, %v3378_v33, 0.0 }
0x1600   :  { %3381 = vadd.xlane.f32.xlu0 %v3380_v61  ;;  %v3691_v61 = vlaneseq }
0x1602   :  { %v3692_v59 = vshrl.u32 %v3691_v61, 7 }
0x1604   :  { %3384 = vadd.xlane.f32.xlu0 %v3383_v32  ;;  %v3694_v32 = vand.u32 127, %v3691_v61 }
0x1606   :  { %vm3695_vm11 = vcmp.gt.s32.totalorder %v3694_v32, %v3692_v59 }
0x1607   :  { %v12459_v36 = vsel %vm3695_vm11, -1e+30, %v11613_v3 }
0x168d   :  { %v3382_v50 = vpop.xlane.xlu0 %3381 }
0x168e   :  { %v3386_v51 = vmul.f32 0.03125, %v3382_v50 }
0x1690   :  { %v3388_v52 = vadd.f32 1e-05, %v3386_v51 }
0x1691   :  { %v3385_v53 = vpop.xlane.xlu0 %3384 }
0x1692   :  { %10739 = vrsqrt.f32 %v3388_v52  ;;  %v3387_v54 = vmul.f32 0.03125, %v3385_v53 }
0x1694   :  { %v3389_v55 = vadd.f32 1e-05, %v3387_v54 }
0x1696   :  { %10741 = vrsqrt.f32 %v3389_v55  ;;  %v4111_v55 = vld [vmem:[%s13089_s20 + $0x8] sm:$0xff] }
0x169c   :  { %v10740_v56 = vpop.eup %10739 }
0x169d   :  { %v3392_v58 = vmul.f32 %v10740_v56, %v3376_v35 }
0x169f   :  { %v3400_v62 = vmul.f32 %v8983_v57, %v3392_v58 }
0x16a0   :  { %v10742_v63 = vpop.eup %10741 }
0x16a1   :  { %v3393_v0 = vmul.f32 %v10742_v63, %v3377_v34  ;;  %v12404_v1 = vadd.f32 %v8984_v60, %v3400_v62 }
0x16a3   :  { %v3401_v6 = vmul.f32 %v8983_v57, %v3393_v0  ;;  %9636 = vmatprep.mubr.msk.f32.mxu1 %vm615_vm0, %v12404_v1 }
0x16a5   :  { %v12410_v9 = vadd.f32 %v8984_v60, %v3401_v6 }
0x16a7   :  { %9637 = vmatmul.mubr.msk.f32.vlgmr.msra.gmra.mrb[20].mxu1 %vm615_vm0, %v12410_v9 }
0x16a8   :  { %10229 = vmatpush3.bf16.msra.mxu1 %v10228_v8  ;;  %9666 = vmatprep.mubr.msk.f32.mxu1 %vm11612_vm10, %v11613_v3 }
0x16a9   :  { %10230 = vmatprep.subr.bf16.mxu1 %v11611_v7 }
0x16ac   :  { %10232 = vmatpush3.bf16.msra.mxu1 %v10231_v12 }
0x16ad   :  { %9669 = vmatprep.subr.mxu1 %v11613_v3 }
0x16af   :  { %9667 = vmatmul.mubr.msk.f32.vlgmr.msra.gmra.mrb[22].mxu1 %vm615_vm0, %v12420_v14 }
0x16b0   :  { %9671 = vmatprep.mubr.msk.f32.mxu1 %vm11612_vm10, %v11613_v3 }
0x177a   :  { %v9638_v20 = vpop.f32.mrb[20].mxu1 }
0x177b   :  { %v3499_v21 = vadd.f32 %v9638_v20, %v8985_v19  ;;  %v3493_v22 = vpop.f32.mrb[21].mxu1 }
0x177c   :  { %v3494_v23 = vadd.f32 %v8985_v19, %v3493_v22 }
0x177d   :  { %v3503_v25 = vmax.f32 %v3499_v21, 0.0 }
0x177e   :  { %v3502_v24 = vmax.f32 %v3494_v23, 0.0 }
0x1780   :  { %9655 = vmatprep.mubr.msk.f32.mxu0 %vm2001_vm9, %v3502_v24 }
0x1781   :  { %9656 = vmatmul.mubr.msk.f32.vlgmr.msra.gmra.mrb[24].mxu0 %vm2001_vm9, %v3503_v25 }
0x1782   :  { %v3777_v27 = vpop.f32.mrb[22].mxu1  ;;  %9681 = vmatprep.mubr.msk.f32.mxu0 %vm11612_vm10, %v11613_v3 }
0x1783   :  { %v12435_v28 = vadd.f32 %v8995_v26, %v3777_v27  ;;  %v9668_v29 = vpop.f32.mrb[23].mxu1 }
0x1785   :  { %3948 = vrot.lane.b32.xlu1 %v12435_v28, %s11601_s12  ;;  %3782 = vrot.lane.b32.xlu0 %v12435_v28, %s11600_s13 }
0x1789   :  { %3946 = vrot.lane.b32.xlu0 %v12435_v28, %s11599_s22 }
0x17f7   :  { %v3949_v30 = vpop.permute.xlu1 %3948  ;;  %v3783_v31 = vpop.permute.xlu0 %3782 }
0x17f8   :  { %9670 = vmatpush3.xpose.msk.msra.mxu1 %vm703_vm1, %v3783_v31  ;;  %9680 = vmatpush3.xpose.msk.msra.mxu0 %vm703_vm1, %v3949_v30 }
0x17f9   :  { %9674 = vmatprep.subr.mxu1 %v11613_v3  ;;  %9689 = vmatprep.subr.mxu0 %v11613_v3 }
0x17fb   :  { %9672 = vmatmul.mubr.msk.f32.vlgmr.msra.gmra.mrb[24].mxu1 %vm703_vm1, %v12435_v28  ;;  %v3947_v34 = vpop.permute.xlu0 %3946 }
0x17fc   :  { %9682 = vmatmul.mubr.msk.f32.vlgmr.msra.gmra.mrb[26].mxu0 %vm703_vm1, %v3947_v34  ;;  %9676 = vmatprep.mubr.msk.f32.mxu1 %vm11612_vm10, %v11613_v3 }
0x17fd   :  { %9691 = vmatprep.mubr.msk.f32.mxu0 %vm11612_vm10, %v11613_v3  ;;  %9690 = vmatpush3.msra.mxu0 %v4111_v55 }
0x17fe   :  { %9699 = vmatprep.subr.mxu0 %v11613_v3 }
0x1854   :  { %v12454_v35 = vpop.f32.mrb[24].mxu0 }
0x1855   :  { %v12456_v33 = vpop.f32.mrb[25].mxu0 }
0x18ce   :  { %v3854_v37 = vpop.f32.mrb[24].mxu1 }
0x18cf   :  { %v3855_v38 = vadd.f32 %v3854_v37, %v12459_v36  ;;  %v9673_v41 = vpop.f32.mrb[25].mxu1  ;;  %v4020_v40 = vpop.f32.mrb[26].mxu0 }
0x18d0   :  { %v4021_v5 = vadd.f32 %v4020_v40, %v12459_v36  ;;  %v9683_v42 = vpop.f32.mrb[27].mxu0  ;;  %v8988_v41 = vld [vmem:[#allocation32] ss:$0 sm:$0xff] }
0x18d1   :  { %v3858_v43 = vsel %vm703_vm1, %v3855_v38, -inf  ;;  %v3592_v42 = vadd.f32 %v8988_v41, %v12456_v33 }
0x18d2   :  { %3859 = vmax.xlane.f32.xlu0 %v3858_v43  ;;  %v4024_v44 = vsel %vm703_vm1, %v4021_v5, -inf }
0x18d3   :  { %4025 = vmax.xlane.f32.xlu1 %v4024_v44 }
0x18e4   :  { %3869 = vrot.lane.b32.xlu1 %v12435_v28, %s11606_s29 }
0x18e8   :  { %4260 = vrot.lane.b32.xlu1 %v12435_v28, %s11603_s30 }
0x18ec   :  { %4258 = vrot.lane.b32.xlu1 %v12435_v28, %s11602_s24 }
0x195f   :  { %v3860_v39 = vpop.xlane.xlu0 %3859 }
0x1960   :  { %v3861_v45 = vsub.f32 %v3855_v38, %v3860_v39  ;;  %v4026_v46 = vpop.xlane.xlu1 %4025  ;;  %v4423_v38 = vld [vmem:[%s13089_s20 + $0x10] sm:$0xff] }
0x1961   :  { %v4027_v47 = vsub.f32 %v4021_v5, %v4026_v46 }
0x1962   :  { %v3862_v48 = vmul.f32 1.442695, %v3861_v45  ;;  %v3597_v45 = vadd.f32 %v12454_v35, %v8988_v41 }
0x1963   :  { %v4028_v49 = vmul.f32 1.442695, %v4027_v47  ;;  %v3600_v47 = vadd.f32 %v3592_v42, %v12404_v1 }
0x1964   :  { %10743 = vpow2.f32 %v3862_v48  ;;  %v3870_v50 = vpop.permute.xlu1 %3869 }
0x1965   :  { %9675 = vmatpush3.msra.mxu1 %v3870_v50  ;;  %10745 = vpow2.f32 %v4028_v49  ;;  %v3604_v48 = vsel %vm615_vm0, %v3600_v47, 0.0  ;;  %v3601_v49 = vadd.f32 %v3597_v45, %v12410_v9 }
0x1966   :  { %9684 = vmatprep.subr.mxu1 %v11613_v3 }
0x1967   :  { %v3607_v50 = vsel %vm1851_vm8, %v3601_v49, 0.0 }
0x1968   :  { %v4261_v8 = vpop.permute.xlu1 %4260 }
0x196c   :  { %v4259_v12 = vpop.permute.xlu1 %4258 }
0x196e   :  { %v10744_v51 = vpop.eup %10743 }
0x196f   :  { %v3864_v52 = vsel %vm703_vm1, %v10744_v51, 0.0  ;;  %v10746_v53 = vpop.eup %10745 }
0x1970   :  { %3865 = vadd.xlane.f32.xlu0 %v3864_v52  ;;  %v4030_v54 = vsel %vm703_vm1, %v10746_v53, 0.0 }
0x1974   :  { %4031 = vadd.xlane.f32.xlu0 %v4030_v54 }
0x198a   :  { %4035 = vrot.lane.b32.xlu0 %v12435_v28, %s11604_s23 }
0x19fd   :  { %v3866_v56 = vpop.xlane.xlu0 %3865 }
0x19fe   :  { %10747 = vrcp.f32 %v3866_v56 }
0x1a01   :  { %v4032_v57 = vpop.xlane.xlu0 %4031 }
0x1a02   :  { %10749 = vrcp.f32 %v4032_v57 }
0x1a05   :  { %v4036_v62 = vpop.permute.xlu0 %4035 }
0x1a08   :  { %v10748_v58 = vpop.eup %10747 }
0x1a09   :  { %v3868_v60 = vmul.f32 %v10748_v58, %v10744_v51 }
0x1a0b   :  { %9677 = vmatmul.mubr.msk.f32.vlgmr.msra.gmra.mrb[26].mxu1 %vm703_vm1, %v3868_v60 }
0x1a0c   :  { %v10750_v63 = vpop.eup %10749  ;;  %9685 = vmatpush3.msra.mxu1 %v4036_v62  ;;  %9686 = vmatprep.mubr.msk.f32.mxu1 %vm11612_vm10, %v11613_v3 }
0x1a0d   :  { %v4034_v0 = vmul.f32 %v10750_v63, %v10746_v53  ;;  %9694 = vmatprep.subr.mxu1 %v11613_v3 }
0x1a0f   :  { %9687 = vmatmul.mubr.msk.f32.vlgmr.msra.gmra.mrb[28].mxu1 %vm703_vm1, %v4034_v0 }
0x1a10   :  { %9696 = vmatprep.mubr.msk.f32.mxu1 %vm11612_vm10, %v11613_v3  ;;  %9695 = vmatpush3.msra.mxu1 %v3945_v2 }
0x1a11   :  { %9704 = vmatprep.subr.mxu1 %v11613_v3 }
0x1ade   :  { %v3941_v4 = vpop.f32.mrb[26].mxu1 }
0x1adf   :  { %v9678_v6 = vpop.f32.mrb[27].mxu1  ;;  %9697 = vmatmul.mubr.msk.f32.vlgmr.msra.gmra.mrb[30].mxu1 %vm703_vm1, %v3941_v4 }
0x1ae0   :  { %9706 = vmatprep.mubr.msk.f32.mxu1 %vm11612_vm10, %v11613_v3 }
0x1ae2   :  { %v4107_v10 = vpop.f32.mrb[28].mxu1 }
0x1ae3   :  { %v9688_v11 = vpop.f32.mrb[29].mxu1  ;;  %9692 = vmatmul.mubr.msk.f32.vlgmr.msra.gmra.mrb[28].mxu0 %vm703_vm1, %v4107_v10 }
0x1ae4   :  { %9700 = vmatpush3.xpose.msk.msra.mxu0 %vm703_vm1, %v4261_v8  ;;  %9701 = vmatprep.mubr.msk.f32.mxu0 %vm11612_vm10, %v11613_v3 }
0x1ae5   :  { %9709 = vmatprep.subr.mxu0 %v11613_v3 }
0x1ae7   :  { %9702 = vmatmul.mubr.msk.f32.vlgmr.msra.gmra.mrb[30].mxu0 %vm703_vm1, %v4259_v12 }
0x1ae8   :  { %9711 = vmatprep.mubr.msk.f32.mxu0 %vm11612_vm10, %v11613_v3  ;;  %9710 = vmatpush3.msra.mxu0 %v4423_v38 }
0x1ae9   :  { %9719 = vmatprep.subr.mxu0 %v11613_v3 }
0x1bb2   :  { %v4254_v15 = vpop.f32.mrb[30].mxu1 }
0x1bb3   :  { %v9698_v16 = vpop.f32.mrb[31].mxu1 }
0x1bb6   :  { %v4181_v18 = vpop.f32.mrb[28].mxu0 }
0x1bb7   :  { %v12498_v19 = vadd.f32 %v4254_v15, %v4181_v18  ;;  %v9693_v20 = vpop.f32.mrb[29].mxu0 }
0x1bba   :  { %v4332_v21 = vpop.f32.mrb[30].mxu0 }
0x1bbb   :  { %v4333_v22 = vadd.f32 %v4332_v21, %v12459_v36  ;;  %v9703_v23 = vpop.f32.mrb[31].mxu0 }
0x1bbc   :  { %v8992_v23 = vld [vmem:[#allocation37] ss:$0 sm:$0xff] }
0x1bbd   :  { %v4336_v24 = vsel %vm703_vm1, %v4333_v22, -inf }
0x1bbe   :  { %4337 = vmax.xlane.f32.xlu0 %v4336_v24 }
0x1bd4   :  { %4347 = vrot.lane.b32.xlu0 %v12435_v28, %s11608_s21 }
0x1bd8   :  { %4498 = vrot.lane.b32.xlu0 %v12435_v28, %s11607_s26 }
0x1c4b   :  { %v4338_v25 = vpop.xlane.xlu0 %4337 }
0x1c4c   :  { %v4339_v26 = vsub.f32 %v4333_v22, %v4338_v25 }
0x1c4e   :  { %v4340_v27 = vmul.f32 1.442695, %v4339_v26 }
0x1c4f   :  { %v4348_v29 = vpop.permute.xlu0 %4347 }
0x1c50   :  { %10751 = vpow2.f32 %v4340_v27  ;;  %9705 = vmatpush3.msra.mxu1 %v4348_v29 }
0x1c51   :  { %9714 = vmatprep.subr.mxu1 %v11613_v3 }
0x1c53   :  { %v4499_v37 = vpop.permute.xlu0 %4498 }
0x1c5a   :  { %v10752_v30 = vpop.eup %10751 }
0x1c5b   :  { %v4342_v31 = vsel %vm703_vm1, %v10752_v30, 0.0 }
0x1c5c   :  { %4343 = vadd.xlane.f32.xlu1 %v4342_v31 }
0x1c6d   :  { %4500 = vrot.lane.b32.xlu1 %v12435_v28, %s11605_s27 }
0x1ce9   :  { %v4344_v34 = vpop.xlane.xlu1 %4343 }
0x1cea   :  { %10753 = vrcp.f32 %v4344_v34 }
0x1ced   :  { %v4501_v32 = vpop.permute.xlu1 %4500 }
0x1cf4   :  { %v10754_v61 = vpop.eup %10753 }
0x1cf5   :  { %v4346_v59 = vmul.f32 %v10754_v61, %v10752_v30  ;;  %v4663_v61 = vld [vmem:[%s13089_s20 + $0x18] sm:$0xff] }
0x1cf7   :  { %9707 = vmatmul.mubr.msk.f32.vlgmr.msra.gmra.mrb[32].mxu1 %vm703_vm1, %v4346_v59 }
0x1cf8   :  { %9715 = vmatpush3.xpose.msk.msra.mxu1 %vm703_vm1, %v4501_v32  ;;  %9716 = vmatprep.mubr.msk.f32.mxu1 %vm11612_vm10, %v11613_v3 }
0x1cf9   :  { %9724 = vmatprep.subr.mxu1 %v11613_v3 }
0x1cfb   :  { %9717 = vmatmul.mubr.msk.f32.vlgmr.msra.gmra.mrb[34].mxu1 %vm703_vm1, %v4499_v37 }
0x1cfc   :  { %9726 = vmatprep.mubr.msk.f32.mxu1 %vm11612_vm10, %v11613_v3  ;;  %9725 = vmatpush3.msra.mxu1 %v4663_v61 }
0x1dca   :  { %v4419_v40 = vpop.f32.mrb[32].mxu1 }
0x1dcb   :  { %v9708_v5 = vpop.f32.mrb[33].mxu1  ;;  %9712 = vmatmul.mubr.msk.f32.vlgmr.msra.gmra.mrb[32].mxu0 %vm703_vm1, %v4419_v40 }
0x1dcc   :  { %9721 = vmatprep.mubr.msk.f32.mxu0 %vm11612_vm10, %v11613_v3  ;;  %v9013_v5 = vld [vmem:[%s13090_s11] ss:$0 sm:$0xff] }
0x1dce   :  { %v4572_v43 = vpop.f32.mrb[34].mxu1 }
0x1dcf   :  { %v4573_v44 = vadd.f32 %v4572_v43, %v12459_v36  ;;  %v9718_v39 = vpop.f32.mrb[35].mxu1 }
0x1dd1   :  { %v4576_v46 = vsel %vm703_vm1, %v4573_v44, -inf }
0x1dd2   :  { %4577 = vmax.xlane.f32.xlu1 %v4576_v46 }
0x1dd6   :  { %3605 = vadd.xlane.f32.xlu1 %v3604_v48 }
0x1dda   :  { %3608 = vadd.xlane.f32.xlu1 %v3607_v50 }
0x1e5f   :  { %v4578_v33 = vpop.xlane.xlu1 %4577 }
0x1e60   :  { %v4579_v51 = vsub.f32 %v4573_v44, %v4578_v33 }
0x1e62   :  { %v4580_v52 = vmul.f32 1.442695, %v4579_v51 }
0x1e63   :  { %v3606_v53 = vpop.xlane.xlu1 %3605 }
0x1e64   :  { %10755 = vpow2.f32 %v4580_v52  ;;  %v3610_v54 = vmul.f32 0.03125, %v3606_v53  ;;  %v4776_v52 = vld [vmem:[%s13091_s9] sm:$0xff]  ;;  %v4777_v53 = vld [vmem:[%s13091_s9 + $0x8] sm:$0xff] }
0x1e66   :  { %v3612_v35 = vsub.f32 %v3600_v47, %v3610_v54  ;;  %v4778_v54 = vld [vmem:[%s13091_s9 + $0x10] sm:$0xff] }
0x1e67   :  { %v3609_v55 = vpop.xlane.xlu1 %3608 }
0x1e68   :  { %v3611_v56 = vmul.f32 0.03125, %v3609_v55  ;;  %v3614_v57 = vmul.f32 %v3612_v35, %v3612_v35  ;;  %v10234_v55 = vpack.c.bf16 %v4777_v53, %v4776_v52 }
0x1e6a   :  { %v3613_v1 = vsub.f32 %v3601_v49, %v3611_v56  ;;  %v3616_v58 = vsel %vm615_vm0, %v3614_v57, 0.0  ;;  %v4779_v56 = vld [vmem:[%s13091_s9 + $0x18] sm:$0xff] }
0x1e6b   :  { %3617 = vadd.xlane.f32.xlu1 %v3616_v58  ;;  %v10582_v57 = vpack.i.bf16 %v4779_v56, %v4778_v54 }
0x1e6c   :  { %v3615_v60 = vmul.f32 %v3613_v1, %v3613_v1 }
0x1e6e   :  { %v10756_v9 = vpop.eup %10755  ;;  %v3619_v62 = vsel %vm1851_vm8, %v3615_v60, 0.0 }
0x1e6f   :  { %3620 = vadd.xlane.f32.xlu1 %v3619_v62  ;;  %v4582_v63 = vsel %vm703_vm1, %v10756_v9, 0.0 }
0x1e70   :  { %4583 = vadd.xlane.f32.xlu0 %v4582_v63 }
0x1e86   :  { %4587 = vrot.lane.b32.xlu0 %v12435_v28, %s11609_s0  ;;  %v8991_v28 = vld [vmem:[#allocation38] ss:$0 sm:$0xff] }
0x1e9e   :  { %v4493_v0 = vpop.f32.mrb[32].mxu0 }
0x1e9f   :  { %v4497_v2 = vadd.f32 %v4493_v0, %v12498_v19  ;;  %v9713_v4 = vpop.f32.mrb[33].mxu0 }
0x1ef8   :  { %v3618_v6 = vpop.xlane.xlu1 %3617 }
0x1ef9   :  { %v3622_v8 = vmul.f32 0.03125, %v3618_v6 }
0x1efb   :  { %v3624_v10 = vadd.f32 1e-05, %v3622_v8 }
0x1efc   :  { %v3621_v11 = vpop.xlane.xlu1 %3620 }
0x1efd   :  { %10757 = vrsqrt.f32 %v3624_v10  ;;  %v3623_v12 = vmul.f32 0.03125, %v3621_v11  ;;  %v4584_v15 = vpop.xlane.xlu0 %4583  ;;  %v8993_v10 = vld [vmem:[#allocation43] ss:$0 sm:$0xff] }
0x1efe   :  { %10759 = vrcp.f32 %v4584_v15 }
0x1eff   :  { %v3625_v16 = vadd.f32 1e-05, %v3623_v12  ;;  %v8994_v12 = vld [vmem:[#allocation41] ss:$0 sm:$0xff] }
0x1f01   :  { %10761 = vrsqrt.f32 %v3625_v16  ;;  %v4588_v18 = vpop.permute.xlu0 %4587 }
0x1f02   :  { %9720 = vmatpush3.msra.mxu0 %v4588_v18 }
0x1f03   :  { %10233 = vmatprep.subr.bf16.mxu0 %v11611_v7 }
0x1f07   :  { %v10758_v20 = vpop.eup %10757 }
0x1f08   :  { %v10760_v21 = vpop.eup %10759  ;;  %v3628_v19 = vmul.f32 %v10758_v20, %v3612_v35  ;;  %v10577_v35 = vpack.i.bf16 %v4777_v53, %v4776_v52 }
0x1f09   :  { %v4586_v22 = vmul.f32 %v10760_v21, %v10756_v9 }
0x1f0a   :  { %v3636_v24 = vmul.f32 %v8991_v28, %v3628_v19  ;;  %v10237_v19 = vpack.c.bf16 %v4779_v56, %v4778_v54 }
0x1f0b   :  { %v10762_v25 = vpop.eup %10761  ;;  %9722 = vmatmul.mubr.msk.f32.vlgmr.msra.gmra.mrb[34].mxu0 %vm703_vm1, %v4586_v22  ;;  %v9016_v22 = vld [vmem:[%s13092_s15] ss:$0 sm:$0xff] }
0x1f0c   :  { %v3644_v26 = vadd.f32 %v8992_v23, %v3636_v24  ;;  %v3629_v27 = vmul.f32 %v10762_v25, %v3613_v1  ;;  %9737 = vmatprep.mubr.msk.f32.mxu0 %vm11612_vm10, %v11613_v3  ;;  %10235 = vmatpush3.bf16.msra.mxu0 %v10234_v55 }
0x1f0d   :  { %10236 = vmatprep.subr.bf16.mxu0 %v11611_v7 }
0x1f0e   :  { %v3648_v29 = vsel %vm615_vm0, %v3644_v26, 0.0  ;;  %v3637_v30 = vmul.f32 %v8991_v28, %v3629_v27 }
0x1f0f   :  { %3649 = vadd.xlane.f32.xlu1 %v3648_v29 }
0x1f10   :  { %v3645_v31 = vadd.f32 %v8992_v23, %v3637_v30  ;;  %10238 = vmatpush3.bf16.msra.mxu0 %v10237_v19 }
0x1f11   :  { %10247 = vmatprep.subr.bf16.mxu0 %v11611_v7 }
0x1f12   :  { %v3651_v34 = vsel %vm1851_vm8, %v3645_v31, 0.0 }
0x1f13   :  { %3652 = vadd.xlane.f32.xlu0 %v3651_v34 }
0x1f29   :  { %10583 = vrot.lane.b32.xlu0 %v10582_v57, %s11600_s13 }
0x1f9c   :  { %v3650_v37 = vpop.xlane.xlu1 %3649 }
0x1f9d   :  { %v3654_v38 = vmul.f32 0.03125, %v3650_v37  ;;  %v9014_v37 = vld [vmem:[%s13093_s16] ss:$0 sm:$0xff] }
0x1f9f   :  { %v3656_v44 = vsub.f32 %v3644_v26, %v3654_v38 }
0x1fa0   :  { %v3653_v41 = vpop.xlane.xlu0 %3652 }
0x1fa1   :  { %v3655_v39 = vmul.f32 0.03125, %v3653_v41  ;;  %v3658_v49 = vmul.f32 %v3656_v44, %v3656_v44  ;;  %v9015_v41 = vld [vmem:[%s13094_s18] ss:$0 sm:$0xff] }
0x1fa3   :  { %v3657_v47 = vsub.f32 %v3645_v31, %v3655_v39  ;;  %v3660_v50 = vsel %vm615_vm0, %v3658_v49, 0.0 }
0x1fa4   :  { %v10584_v24 = vpop.permute.xlu0 %10583 }
0x1fa5   :  { %v3659_v33 = vmul.f32 %v3657_v47, %v3657_v47  ;;  %v10586_v27 = vunpack.i.h.bf16 %v10584_v24  ;;  %v10585_v29 = vunpack.i.l.bf16 %v10584_v24 }
0x1fa7   :  { %v3663_v51 = vsel %vm1851_vm8, %v3659_v33, 0.0 }
0x1fde   :  { %v4659_v59 = vpop.f32.mrb[34].mxu0 }
0x1fdf   :  { %v9723_v32 = vpop.f32.mrb[35].mxu0  ;;  %9727 = vmatmul.mubr.msk.f32.vlgmr.msra.gmra.mrb[36].mxu1 %vm703_vm1, %v4659_v59  ;;  %v10243_v59 = vpack.c.bf16 %v10586_v27, %v10585_v29 }
0x20b2   :  { %v4733_v40 = vpop.f32.mrb[36].mxu1 }
0x20b3   :  { %v4737_v42 = vadd.f32 %v4733_v40, %v4497_v2  ;;  %v9728_v43 = vpop.f32.mrb[37].mxu1 }
0x20b5   :  { %v4745_v45 = vadd.f32 %v9013_v5, %v4737_v42 }
0x20b7   :  { %v4746_v46 = vadd.f32 %v4745_v45, %v12420_v14 }
0x20b9   :  { %v4749_v48 = vsel %vm615_vm0, %v4746_v46, 0.0 }
0x20ba   :  { %4750 = vadd.xlane.f32.xlu1 %v4749_v48 }
0x20be   :  { %3661 = vadd.xlane.f32.xlu1 %v3660_v50 }
0x20c2   :  { %3664 = vadd.xlane.f32.xlu1 %v3663_v51 }
0x2147   :  { %v4751_v14 = vpop.xlane.xlu1 %4750 }
0x2148   :  { %v4752_v1 = vmul.f32 0.03125, %v4751_v14 }
0x214a   :  { %v4753_v58 = vsub.f32 %v4746_v46, %v4752_v1 }
0x214b   :  { %v3662_v60 = vpop.xlane.xlu1 %3661 }
0x214c   :  { %v3666_v9 = vmul.f32 0.03125, %v3662_v60  ;;  %v4754_v62 = vmul.f32 %v4753_v58, %v4753_v58 }
0x214e   :  { %v3668_v63 = vadd.f32 1e-05, %v3666_v9  ;;  %v4755_v0 = vsel %vm615_vm0, %v4754_v62, 0.0 }
0x214f   :  { %4756 = vadd.xlane.f32.xlu1 %v4755_v0  ;;  %v3665_v2 = vpop.xlane.xlu1 %3664 }
0x2150   :  { %10763 = vrsqrt.f32 %v3668_v63  ;;  %v3667_v4 = vmul.f32 0.03125, %v3665_v2 }
0x2152   :  { %v3669_v6 = vadd.f32 1e-05, %v3667_v4 }
0x2154   :  { %10765 = vrsqrt.f32 %v3669_v6 }
0x215a   :  { %v10764_v8 = vpop.eup %10763 }
0x215b   :  { %v3672_v11 = vmul.f32 %v10764_v8, %v3656_v44  ;;  %v5130_v8 = vld [vmem:[%s13095_s14] sm:$0xff] }
0x215d   :  { %v3680_v15 = vmul.f32 %v8993_v10, %v3672_v11 }
0x215e   :  { %v10766_v16 = vpop.eup %10765 }
0x215f   :  { %v3673_v18 = vmul.f32 %v10766_v16, %v3657_v47  ;;  %v12557_v20 = vadd.f32 %v8994_v12, %v3680_v15 }
0x2160   :  { %10578 = vrot.lane.b32.xlu1 %v10577_v35, %s11600_s13 }
0x2161   :  { %v3681_v28 = vmul.f32 %v8993_v10, %v3673_v18  ;;  %9748 = vmatprep.mubr.msk.f32.mxu1 %vm615_vm0, %v12557_v20 }
0x2163   :  { %v12562_v21 = vadd.f32 %v8994_v12, %v3681_v28 }
0x2164   :  { %4876 = vrot.lane.b32.xlu1 %v9016_v22, %s11600_s13 }
0x21dc   :  { %v4757_v23 = vpop.xlane.xlu1 %4756 }
0x21dd   :  { %v4758_v25 = vmul.f32 0.03125, %v4757_v23 }
0x21df   :  { %v4759_v26 = vadd.f32 1e-05, %v4758_v25 }
0x21e0   :  { %v10579_v30 = vpop.permute.xlu1 %10578 }
0x21e1   :  { %10767 = vrsqrt.f32 %v4759_v26  ;;  %v10581_v31 = vunpack.i.h.bf16 %v10579_v30  ;;  %v10580_v34 = vunpack.i.l.bf16 %v10579_v30 }
0x21e3   :  { %v10239_v61 = vpack.c.bf16 %v10581_v31, %v10580_v34 }
0x21e4   :  { %v4877_v42 = vpop.permute.xlu1 %4876 }
0x21e5   :  { %10240 = vmatprep.subr.bf16.mxu1 %v10239_v61 }
0x21e6   :  { %10242 = vmatpush3.bf16.msra.mxu1 %v10239_v61 }
0x21e7   :  { %10244 = vmatprep.subr.bf16.mxu1 %v10243_v59 }
0x21ea   :  { %10246 = vmatpush3.bf16.msra.mxu1 %v10243_v59  ;;  %v5304_v59 = vld [vmem:[%s13095_s14 + $0x8] sm:$0xff] }
0x21eb   :  { %v10768_v32 = vpop.eup %10767  ;;  %10251 = vmatprep.subr.bf16.mxu1 %v11611_v7 }
0x21ec   :  { %v4761_v38 = vmul.f32 %v10768_v32, %v4753_v58 }
0x21ed   :  { %9749 = vmatmul.mubr.msk.f32.vlgmr.msra.gmra.mrb[38].mxu1 %vm615_vm0, %v12562_v21 }
0x21ee   :  { %v4768_v40 = vmul.f32 %v9014_v37, %v4761_v38  ;;  %9762 = vmatprep.mubr.msk.f32.mxu1 %vm11612_vm10, %v11613_v3 }
0x21f0   :  { %v12574_v5 = vadd.f32 %v9015_v41, %v4768_v40 }
0x21f2   :  { %9738 = vmatmul.mubr.msk.f32.vlgmr.msra.gmra.mrb[36].mxu0 %vm615_vm0, %v12574_v5 }
0x21f3   :  { %9755 = vmatprep.mubr.msk.f32.mxu0 %vm11612_vm10, %v11613_v3 }
0x22c0   :  { %v9750_v43 = vpop.f32.mrb[38].mxu1 }
0x22c1   :  { %v4957_v44 = vadd.f32 %v9750_v43, %v4877_v42  ;;  %v4951_v39 = vpop.f32.mrb[39].mxu1 }
0x22c2   :  { %v4952_v45 = vadd.f32 %v4951_v39, %v4877_v42 }
0x22c4   :  { %v10248_v46 = vpack.c.bf16 %v4957_v44, %v4952_v45  ;;  %v12580_v47 = vpack.i.bf16 %v4957_v44, %v4952_v45 }
0x22c5   :  { %v4856_v48 = vpop.f32.mrb[36].mxu0 }
0x22c6   :  { %v9739_v49 = vpop.f32.mrb[37].mxu0  ;;  %10250 = vmatpush3.bf16.xpose.msk.msra.mxu0 %vm12117_vm2, %v10248_v46  ;;  %v4857_v50 = vadd.f32 %v9016_v22, %v4856_v48 }
0x22c7   :  { %10259 = vmatprep.subr.bf16.mxu0 %v11611_v7 }
0x22cd   :  { %9756 = vmatmul.mubr.msk.f32.vlgmr.msra.gmra.mrb[38].mxu0 %vm703_vm1, %v4857_v50 }
0x22ce   :  { %9776 = vmatprep.mubr.msk.f32.mxu0 %vm11612_vm10, %v11613_v3 }
0x23a0   :  { %v5035_v33 = vpop.f32.mrb[38].mxu0 }
0x23a1   :  { %v9757_v51 = vpop.f32.mrb[39].mxu0  ;;  %v5039_v52 = vsel %vm787_vm4, %v5035_v33, -inf }
0x23a2   :  { %5040 = vmax.xlane.f32.xlu1 %v5039_v52 }
0x23b3   :  { %10588 = vrot.lane.b32.xlu1 %v12580_v47, %s11600_s13 }
0x23b7   :  { %5131 = vrot.lane.b32.xlu1 %v4857_v50, %s11599_s22 }
0x242f   :  { %v5041_v53 = vpop.xlane.xlu1 %5040 }
0x2430   :  { %v5042_v54 = vsub.f32 %v5035_v33, %v5041_v53 }
0x2432   :  { %v5043_v35 = vmul.f32 1.442695, %v5042_v54 }
0x2433   :  { %v10589_v55 = vpop.permute.xlu1 %10588 }
0x2434   :  { %10769 = vpow2.f32 %v5043_v35  ;;  %v10591_v56 = vunpack.i.h.bf16 %v10589_v55  ;;  %v10590_v57 = vunpack.i.l.bf16 %v10589_v55 }
0x2436   :  { %v10252_v14 = vpack.c.bf16 %v10591_v56, %v10590_v57 }
0x2437   :  { %v5132_v6 = vpop.permute.xlu1 %5131 }
0x2438   :  { %10254 = vmatpush3.bf16.msk.msra.mxu1 %vm12173_vm7, %v10252_v14 }
0x2439   :  { %10255 = vmatprep.subr.bf16.mxu1 %v11611_v7 }
0x243e   :  { %v10770_v1 = vpop.eup %10769 }
0x243f   :  { %v5045_v58 = vsel %vm787_vm4, %v10770_v1, 0.0 }
0x2440   :  { %5046 = vadd.xlane.f32.xlu0 %v5045_v58 }
0x2456   :  { %10593 = vrot.lane.b32.xlu0 %v12580_v47, %s11599_s22 }
0x24cd   :  { %v5047_v60 = vpop.xlane.xlu0 %5046 }
0x24ce   :  { %10771 = vrcp.f32 %v5047_v60 }
0x24d1   :  { %v10594_v9 = vpop.permute.xlu0 %10593 }
0x24d2   :  { %v10596_v62 = vunpack.i.h.bf16 %v10594_v9  ;;  %v10595_v63 = vunpack.i.l.bf16 %v10594_v9 }
0x24d4   :  { %v10256_v4 = vpack.c.bf16 %v10596_v62, %v10595_v63 }
0x24d8   :  { %v10772_v0 = vpop.eup %10771 }
0x24d9   :  { %v5049_v2 = vmul.f32 %v10772_v0, %v10770_v1 }
0x24db   :  { %9763 = vmatmul.mubr.msk.f32.vlgmr.msra.gmra.mrb[40].mxu1 %vm787_vm4, %v5049_v2 }
0x24dc   :  { %10258 = vmatpush3.bf16.xpose.msk.msra.mxu1 %vm12117_vm2, %v10256_v4  ;;  %9769 = vmatprep.mubr.msk.f32.mxu1 %vm11612_vm10, %v11613_v3 }
0x24dd   :  { %9784 = vmatprep.subr.mxu1 %v11613_v3 }
0x24e3   :  { %9770 = vmatmul.mubr.msk.f32.vlgmr.msra.gmra.mrb[42].mxu1 %vm703_vm1, %v5132_v6 }
0x24e4   :  { %9786 = vmatprep.mubr.msk.f32.mxu1 %vm11612_vm10, %v11613_v3  ;;  %9785 = vmatpush3.msra.mxu1 %v5130_v8 }
0x24e5   :  { %10267 = vmatprep.subr.bf16.mxu1 %v11611_v7 }
0x25ae   :  { %v5126_v10 = vpop.f32.mrb[40].mxu1 }
0x25af   :  { %v9764_v11 = vpop.f32.mrb[41].mxu1  ;;  %9787 = vmatmul.mubr.msk.f32.vlgmr.msra.gmra.mrb[44].mxu1 %vm703_vm1, %v5126_v10 }
0x25b0   :  { %9800 = vmatprep.mubr.msk.f32.mxu1 %vm11612_vm10, %v11613_v3 }
0x25b6   :  { %v5209_v12 = vpop.f32.mrb[42].mxu1 }
0x25b7   :  { %v9771_v15 = vpop.f32.mrb[43].mxu1  ;;  %v5213_v16 = vsel %vm787_vm4, %v5209_v12, -inf }
0x25b8   :  { %5214 = vmax.xlane.f32.xlu1 %v5213_v16  ;;  %v5624_v15 = vld [vmem:[%s13095_s14 + $0x10] sm:$0xff] }
0x25c9   :  { %10598 = vrot.lane.b32.xlu1 %v12580_v47, %s11601_s12 }
0x25cd   :  { %5451 = vrot.lane.b32.xlu1 %v4857_v50, %s11602_s24 }
0x25d1   :  { %10608 = vrot.lane.b32.xlu1 %v12580_v47, %s11607_s26 }
0x25d5   :  { %5699 = vrot.lane.b32.xlu1 %v4857_v50, %s11607_s26 }
0x2645   :  { %v5215_v18 = vpop.xlane.xlu1 %5214 }
0x2646   :  { %v5216_v28 = vsub.f32 %v5209_v12, %v5215_v18 }
0x2648   :  { %v5217_v19 = vmul.f32 1.442695, %v5216_v28 }
0x2649   :  { %v10599_v22 = vpop.permute.xlu1 %10598 }
0x264a   :  { %10773 = vpow2.f32 %v5217_v19  ;;  %v10601_v23 = vunpack.i.h.bf16 %v10599_v22  ;;  %v10600_v24 = vunpack.i.l.bf16 %v10599_v22 }
0x264c   :  { %v10260_v25 = vpack.c.bf16 %v10601_v23, %v10600_v24 }
0x264d   :  { %v5452_v37 = vpop.permute.xlu1 %5451 }
0x264e   :  { %10262 = vmatpush3.bf16.msk.msra.mxu0 %vm12173_vm7, %v10260_v25 }
0x264f   :  { %9779 = vmatprep.subr.mxu0 %v11613_v3 }
0x2651   :  { %v10609_v43 = vpop.permute.xlu1 %10608 }
0x2652   :  { %v10611_v39 = vunpack.i.h.bf16 %v10609_v43  ;;  %v10610_v45 = vunpack.i.l.bf16 %v10609_v43 }
0x2654   :  { %v10774_v26 = vpop.eup %10773  ;;  %v10272_v46 = vpack.c.bf16 %v10611_v39, %v10610_v45 }
0x2655   :  { %v5219_v27 = vsel %vm787_vm4, %v10774_v26, 0.0  ;;  %v5700_v48 = vpop.permute.xlu1 %5699 }
0x2656   :  { %5220 = vadd.xlane.f32.xlu0 %v5219_v27 }
0x266c   :  { %10603 = vrot.lane.b32.xlu0 %v12580_v47, %s11602_s24 }
0x2682   :  { %v5447_v29 = vpop.f32.mrb[44].mxu1 }
0x2683   :  { %v9788_v30 = vpop.f32.mrb[45].mxu1 }
0x26e3   :  { %v5221_v31 = vpop.xlane.xlu0 %5220 }
0x26e4   :  { %10775 = vrcp.f32 %v5221_v31 }
0x26e7   :  { %v10604_v32 = vpop.permute.xlu0 %10603 }
0x26e8   :  { %v10606_v38 = vunpack.i.h.bf16 %v10604_v32  ;;  %v10605_v41 = vunpack.i.l.bf16 %v10604_v32 }
0x26ea   :  { %v10264_v40 = vpack.c.bf16 %v10606_v38, %v10605_v41 }
0x26ee   :  { %v10776_v34 = vpop.eup %10775 }
0x26ef   :  { %v5223_v61 = vmul.f32 %v10776_v34, %v10774_v26  ;;  %v5872_v26 = vld [vmem:[%s13095_s14 + $0x18] sm:$0xff] }
0x26f1   :  { %9777 = vmatmul.mubr.msk.f32.vlgmr.msra.gmra.mrb[40].mxu0 %vm787_vm4, %v5223_v61 }
0x26f2   :  { %9780 = vmatpush3.msra.mxu0 %v5304_v59  ;;  %9781 = vmatprep.mubr.msk.f32.mxu0 %vm11612_vm10, %v11613_v3  ;;  %v9044_v59 = vld [vmem:[%s13096_s19] ss:$0 sm:$0xff] }
0x26f3   :  { %10263 = vmatprep.subr.bf16.mxu0 %v11611_v7 }
0x27c4   :  { %v5300_v42 = vpop.f32.mrb[40].mxu0 }
0x27c5   :  { %v9778_v44 = vpop.f32.mrb[41].mxu0  ;;  %9782 = vmatmul.mubr.msk.f32.vlgmr.msra.gmra.mrb[42].mxu0 %vm703_vm1, %v5300_v42 }
0x27c6   :  { %10266 = vmatpush3.bf16.xpose.msk.msra.mxu0 %vm12117_vm2, %v10264_v40  ;;  %9793 = vmatprep.mubr.msk.f32.mxu0 %vm11612_vm10, %v11613_v3 }
0x27c7   :  { %10271 = vmatprep.subr.bf16.mxu0 %v11611_v7 }
0x27cd   :  { %9794 = vmatmul.mubr.msk.f32.vlgmr.msra.gmra.mrb[44].mxu0 %vm703_vm1, %v5452_v37 }
0x27ce   :  { %10274 = vmatpush3.bf16.xpose.msk.msra.mxu0 %vm12117_vm2, %v10272_v46  ;;  %9812 = vmatprep.mubr.msk.f32.mxu0 %vm11612_vm10, %v11613_v3  ;;  %v5985_v46 = vld [vmem:[%s13097_s28] sm:$0xff] }
0x27cf   :  { %10279 = vmatprep.subr.bf16.mxu0 %v11611_v7 }
0x27d5   :  { %9813 = vmatmul.mubr.msk.f32.vlgmr.msra.gmra.mrb[46].mxu0 %vm703_vm1, %v5700_v48  ;;  %v5986_v48 = vld [vmem:[%s13097_s28 + $0x8] sm:$0xff] }
0x27d6   :  { %9835 = vmatprep.mubr.msk.f32.mxu0 %vm11612_vm10, %v11613_v3 }
0x2898   :  { %v5374_v49 = vpop.f32.mrb[42].mxu0 }
0x2899   :  { %v5448_v50 = vadd.f32 %v5447_v29, %v5374_v49  ;;  %v9783_v33 = vpop.f32.mrb[43].mxu0  ;;  %v10280_v49 = vpack.c.bf16 %v5986_v48, %v5985_v46  ;;  %v9053_v48 = vld [vmem:[#allocation13] ss:$0 sm:$0xff] }
0x289b   :  { %10281 = vmatpush3.bf16.msra.mxu0 %v10280_v49 }
0x289c   :  { %10282 = vmatprep.subr.bf16.mxu0 %v11611_v7 }
0x28a0   :  { %v5529_v51 = vpop.f32.mrb[44].mxu0 }
0x28a1   :  { %v9795_v52 = vpop.f32.mrb[45].mxu0  ;;  %v5533_v53 = vsel %vm787_vm4, %v5529_v51, -inf }
0x28a2   :  { %5534 = vmax.xlane.f32.xlu0 %v5533_v53  ;;  %v6071_v52 = vld [vmem:[%s13098_s1 + $0x8] sm:$0xff]  ;;  %v6072_v53 = vld [vmem:[%s13098_s1 + $0x10] sm:$0xff] }
0x28a8   :  { %v5777_v54 = vpop.f32.mrb[46].mxu0 }
0x28a9   :  { %v9814_v35 = vpop.f32.mrb[47].mxu0  ;;  %v5781_v63 = vsel %vm787_vm4, %v5777_v54, -inf }
0x28aa   :  { %v6073_v35 = vld [vmem:[%s13098_s1 + $0x18] sm:$0xff] }
0x28b8   :  { %10613 = vrot.lane.b32.xlu0 %v12580_v47, %s11603_s30 }
0x292f   :  { %v5535_v55 = vpop.xlane.xlu0 %5534 }
0x2930   :  { %v5536_v56 = vsub.f32 %v5529_v51, %v5535_v55  ;;  %v6070_v51 = vld [vmem:[%s13098_s1] sm:$0xff]  ;;  %v10289_v55 = vpack.c.bf16 %v6073_v35, %v6072_v53 }
0x2932   :  { %v5537_v57 = vmul.f32 1.442695, %v5536_v56  ;;  %v6074_v56 = vld [vmem:[%s13098_s1 + $0x20] sm:$0xff] }
0x2933   :  { %v10614_v14 = vpop.permute.xlu0 %10613 }
0x2934   :  { %10777 = vpow2.f32 %v5537_v57  ;;  %v10616_v1 = vunpack.i.h.bf16 %v10614_v14  ;;  %v10615_v58 = vunpack.i.l.bf16 %v10614_v14  ;;  %v6075_v57 = vld [vmem:[%s13098_s1 + $0x28] sm:$0xff] }
0x2935   :  { %v10292_v14 = vpack.c.bf16 %v6075_v57, %v6074_v56 }
0x2936   :  { %v10268_v60 = vpack.c.bf16 %v10616_v1, %v10615_v58 }
0x2938   :  { %10270 = vmatpush3.bf16.msk.msra.mxu1 %vm12173_vm7, %v10268_v60 }
0x2939   :  { %9803 = vmatprep.subr.mxu1 %v11613_v3 }
0x293e   :  { %v10778_v9 = vpop.eup %10777 }
0x293f   :  { %v5539_v62 = vsel %vm787_vm4, %v10778_v9, 0.0 }
0x2940   :  { %5540 = vadd.xlane.f32.xlu1 %v5539_v62  ;;  %v9045_v62 = vld [vmem:[%s13099_s25] ss:$0 sm:$0xff] }
0x2944   :  { %5782 = vmax.xlane.f32.xlu1 %v5781_v63 }
0x29cd   :  { %v5541_v0 = vpop.xlane.xlu1 %5540 }
0x29ce   :  { %10779 = vrcp.f32 %v5541_v0  ;;  %v9046_v0 = vld [vmem:[%s13100_s8] ss:$0 sm:$0xff] }
0x29d1   :  { %v5783_v2 = vpop.xlane.xlu1 %5782 }
0x29d2   :  { %v5784_v4 = vsub.f32 %v5777_v54, %v5783_v2  ;;  %v10286_v54 = vpack.c.bf16 %v6071_v52, %v6070_v51 }
0x29d4   :  { %v5785_v6 = vmul.f32 1.442695, %v5784_v4 }
0x29d6   :  { %10781 = vpow2.f32 %v5785_v6  ;;  %v6076_v6 = vld [vmem:[%s13098_s1 + $0x30] sm:$0xff] }
0x29d8   :  { %v10780_v8 = vpop.eup %10779 }
0x29d9   :  { %v5543_v10 = vmul.f32 %v10780_v8, %v10778_v9  ;;  %v6077_v8 = vld [vmem:[%s13098_s1 + $0x38] sm:$0xff] }
0x29db   :  { %9801 = vmatmul.mubr.msk.f32.vlgmr.msra.gmra.mrb[46].mxu1 %vm787_vm4, %v5543_v10  ;;  %v10295_v10 = vpack.c.bf16 %v6077_v8, %v6076_v6 }
0x29dc   :  { %9805 = vmatprep.mubr.msk.f32.mxu1 %vm11612_vm10, %v11613_v3  ;;  %9804 = vmatpush3.msra.mxu1 %v5624_v15 }
0x29dd   :  { %10275 = vmatprep.subr.bf16.mxu1 %v11611_v7 }
0x29e0   :  { %v10782_v11 = vpop.eup %10781 }
0x29e1   :  { %v5787_v12 = vsel %vm787_vm4, %v10782_v11, 0.0 }
0x29e2   :  { %5788 = vadd.xlane.f32.xlu1 %v5787_v12 }
0x29f3   :  { %10618 = vrot.lane.b32.xlu1 %v12580_v47, %s11605_s27 }
0x2a6f   :  { %v5789_v16 = vpop.xlane.xlu1 %5788 }
0x2a70   :  { %10783 = vrcp.f32 %v5789_v16 }
0x2a73   :  { %v10619_v18 = vpop.permute.xlu1 %10618 }
0x2a74   :  { %v10621_v28 = vunpack.i.h.bf16 %v10619_v18  ;;  %v10620_v19 = vunpack.i.l.bf16 %v10619_v18 }
0x2a76   :  { %v10276_v23 = vpack.c.bf16 %v10621_v28, %v10620_v19  ;;  %v9049_v28 = vld [vmem:[%s13102_s4] ss:$0 sm:$0xff] }
0x2a7a   :  { %v10784_v22 = vpop.eup %10783 }
0x2a7b   :  { %v5791_v47 = vmul.f32 %v10784_v22, %v10782_v11  ;;  %v9047_v11 = vld [vmem:[%s13101_s2] ss:$0 sm:$0xff] }
0x2aae   :  { %v5620_v24 = vpop.f32.mrb[46].mxu1 }
0x2aaf   :  { %v9802_v25 = vpop.f32.mrb[47].mxu1  ;;  %9806 = vmatmul.mubr.msk.f32.vlgmr.msra.gmra.mrb[48].mxu1 %vm703_vm1, %v5620_v24 }
0x2ab0   :  { %10278 = vmatpush3.bf16.msk.msra.mxu1 %vm12173_vm7, %v10276_v23  ;;  %9819 = vmatprep.mubr.msk.f32.mxu1 %vm11612_vm10, %v11613_v3 }
0x2ab1   :  { %9822 = vmatprep.subr.mxu1 %v11613_v3 }
0x2ab3   :  { %9820 = vmatmul.mubr.msk.f32.vlgmr.msra.gmra.mrb[50].mxu1 %vm787_vm4, %v5791_v47 }
0x2ab4   :  { %9824 = vmatprep.mubr.msk.f32.mxu1 %vm11612_vm10, %v11613_v3  ;;  %9823 = vmatpush3.msra.mxu1 %v5872_v26 }
0x2ab5   :  { %10285 = vmatprep.subr.bf16.mxu1 %v11611_v7 }
0x2b82   :  { %v5694_v27 = vpop.f32.mrb[48].mxu1 }
0x2b83   :  { %v5698_v29 = vadd.f32 %v5694_v27, %v5448_v50  ;;  %v9807_v30 = vpop.f32.mrb[49].mxu1  ;;  %v5988_v50 = vld [vmem:[%s13097_s28 + $0x18] sm:$0xff] }
0x2b86   :  { %v5868_v31 = vpop.f32.mrb[50].mxu1 }
0x2b87   :  { %v9821_v34 = vpop.f32.mrb[51].mxu1  ;;  %9825 = vmatmul.mubr.msk.f32.vlgmr.msra.gmra.mrb[52].mxu1 %vm703_vm1, %v5868_v31  ;;  %v6188_v31 = vld [vmem:[%s13103_s5] sm:$0xff] }
0x2b88   :  { %9854 = vmatprep.mubr.msk.f32.mxu1 %vm11612_vm10, %v11613_v3  ;;  %10287 = vmatpush3.bf16.msra.mxu1 %v10286_v54  ;;  %v6189_v34 = vld [vmem:[%s13103_s5 + $0x8] sm:$0xff] }
0x2b89   :  { %10288 = vmatprep.subr.bf16.mxu1 %v11611_v7 }
0x2b8c   :  { %10290 = vmatpush3.bf16.msra.mxu1 %v10289_v55 }
0x2b8d   :  { %10291 = vmatprep.subr.bf16.mxu1 %v11611_v7 }
0x2b90   :  { %10293 = vmatpush3.bf16.msra.mxu1 %v10292_v14 }
0x2b91   :  { %10294 = vmatprep.subr.bf16.mxu1 %v11611_v7 }
0x2b94   :  { %10296 = vmatpush3.bf16.msra.mxu1 %v10295_v10  ;;  %v6602_v10 = vld [vmem:[%s13106_s3 + $0x8] sm:$0xff] }
0x2b95   :  { %9873 = vmatprep.subr.mxu1 %v11613_v3 }
0x2c5a   :  { %v5942_v61 = vpop.f32.mrb[52].mxu1 }
0x2c5b   :  { %v5946_v32 = vadd.f32 %v5942_v61, %v5698_v29  ;;  %v9826_v37 = vpop.f32.mrb[53].mxu1  ;;  %v10298_v61 = vpack.c.bf16 %v6189_v34, %v6188_v31 }
0x2c5d   :  { %v5954_v38 = vadd.f32 %v9044_v59, %v5946_v32  ;;  %v6190_v59 = vld [vmem:[%s13103_s5 + $0x10] sm:$0xff]  ;;  %v6191_v32 = vld [vmem:[%s13103_s5 + $0x18] sm:$0xff] }
0x2c5e   :  { %v10301_v37 = vpack.c.bf16 %v6191_v32, %v6190_v59 }
0x2c5f   :  { %v5955_v41 = vadd.f32 %v5954_v38, %v12574_v5  ;;  %v5987_v5 = vld [vmem:[%s13097_s28 + $0x10] sm:$0xff] }
0x2c60   :  { %v10283_v33 = vpack.c.bf16 %v5988_v50, %v5987_v5 }
0x2c61   :  { %v5958_v40 = vsel %vm615_vm0, %v5955_v41, 0.0 }
0x2c62   :  { %5959 = vadd.xlane.f32.xlu0 %v5958_v40  ;;  %10284 = vmatpush3.bf16.msra.mxu0 %v10283_v33 }
0x2c63   :  { %10297 = vmatprep.subr.bf16.mxu0 %v11611_v7 }
0x2cef   :  { %v5960_v42 = vpop.xlane.xlu0 %5959 }
0x2cf0   :  { %v5961_v43 = vmul.f32 0.03125, %v5960_v42 }
0x2cf2   :  { %v5962_v44 = vsub.f32 %v5955_v41, %v5961_v43  ;;  %v9051_v43 = vld [vmem:[%s13104_s7] ss:$0 sm:$0xff] }
0x2cf4   :  { %v5963_v39 = vmul.f32 %v5962_v44, %v5962_v44 }
0x2cf6   :  { %v5964_v45 = vsel %vm615_vm0, %v5963_v39, 0.0  ;;  %v9052_v39 = vld [vmem:[%s13105_s10] ss:$0 sm:$0xff] }
0x2cf7   :  { %5965 = vadd.xlane.f32.xlu1 %v5964_v45 }
0x2d84   :  { %v5966_v1 = vpop.xlane.xlu1 %5965 }
0x2d85   :  { %v5967_v58 = vmul.f32 0.03125, %v5966_v1 }
0x2d87   :  { %v5968_v60 = vadd.f32 1e-05, %v5967_v58 }
0x2d89   :  { %10785 = vrsqrt.f32 %v5968_v60 }
0x2d93   :  { %v10786_v9 = vpop.eup %10785 }
0x2d94   :  { %v5970_v63 = vmul.f32 %v10786_v9, %v5962_v44 }
0x2d96   :  { %v5977_v2 = vmul.f32 %v9045_v62, %v5970_v63 }
0x2d98   :  { %v5984_v4 = vadd.f32 %v9046_v0, %v5977_v2 }
0x2d9a   :  { %9836 = vmatmul.mubr.msk.f32.vlgmr.msra.gmra.mrb[48].mxu0 %vm615_vm0, %v5984_v4 }
0x2d9b   :  { %9865 = vmatprep.mubr.msk.f32.mxu0 %vm11612_vm10, %v11613_v3  ;;  %10299 = vmatpush3.bf16.msra.mxu0 %v10298_v61 }
0x2d9c   :  { %10300 = vmatprep.subr.bf16.mxu0 %v11611_v7 }
0x2d9f   :  { %10302 = vmatpush3.bf16.msra.mxu0 %v10301_v37 }
0x2da0   :  { %9868 = vmatprep.subr.mxu0 %v11613_v3 }
0x2e6d   :  { %v6065_v12 = vpop.f32.mrb[48].mxu0 }
0x2e6e   :  { %v6066_v15 = vadd.f32 %v9047_v11, %v6065_v12  ;;  %v9837_v16 = vpop.f32.mrb[49].mxu0 }
0x2e70   :  { %v6069_v18 = vmax.f32 %v6066_v15, 0.0 }
0x2e72   :  { %9855 = vmatmul.mubr.msk.f32.vlgmr.msra.gmra.mrb[54].mxu1 %vm2001_vm9, %v6069_v18 }
0x2e73   :  { %9875 = vmatprep.mubr.msk.f32.mxu1 %vm11612_vm10, %v11613_v3 }
0x2f45   :  { %v6154_v19 = vpop.f32.mrb[54].mxu1 }
0x2f46   :  { %v6155_v22 = vadd.f32 %v9049_v28, %v6154_v19  ;;  %v9856_v23 = vpop.f32.mrb[55].mxu1 }
0x2f47   :  { %v6436_v23 = vld [vmem:[%s13106_s3] sm:$0xff] }
0x2f48   :  { %v6158_v24 = vadd.f32 %v6155_v22, %v5984_v4 }
0x2f4a   :  { %v6161_v25 = vsel %vm615_vm0, %v6158_v24, 0.0 }
0x2f4b   :  { %6162 = vadd.xlane.f32.xlu0 %v6161_v25 }
0x2fd8   :  { %v6163_v47 = vpop.xlane.xlu0 %6162 }
0x2fd9   :  { %v6164_v26 = vmul.f32 0.03125, %v6163_v47 }
0x2fdb   :  { %v6165_v27 = vsub.f32 %v6158_v24, %v6164_v26 }
0x2fdd   :  { %v6166_v29 = vmul.f32 %v6165_v27, %v6165_v27 }
0x2fdf   :  { %v6167_v30 = vsel %vm615_vm0, %v6166_v29, 0.0 }
0x2fe0   :  { %6168 = vadd.xlane.f32.xlu0 %v6167_v30 }
0x306d   :  { %v6169_v38 = vpop.xlane.xlu0 %6168 }
0x306e   :  { %v6170_v41 = vmul.f32 0.03125, %v6169_v38 }
0x3070   :  { %v6171_v40 = vadd.f32 1e-05, %v6170_v41 }
0x3072   :  { %10787 = vrsqrt.f32 %v6171_v40 }
0x307c   :  { %v10788_v42 = vpop.eup %10787 }
0x307d   :  { %v6173_v44 = vmul.f32 %v10788_v42, %v6165_v27 }
0x307f   :  { %v6180_v45 = vmul.f32 %v9051_v43, %v6173_v44 }
0x3081   :  { %v12717_v46 = vadd.f32 %v9052_v39, %v6180_v45 }
0x3083   :  { %9866 = vmatmul.mubr.msk.f32.vlgmr.msra.gmra.mrb[50].mxu0 %vm615_vm0, %v12717_v46 }
0x3084   :  { %9870 = vmatprep.mubr.msk.f32.mxu0 %vm11612_vm10, %v11613_v3 }
0x3156   :  { %v6268_v49 = vpop.f32.mrb[50].mxu0 }
0x3157   :  { %v12723_v5 = vadd.f32 %v9053_v48, %v6268_v49  ;;  %v9867_v50 = vpop.f32.mrb[51].mxu0 }
0x3159   :  { %6439 = vrot.lane.b32.xlu1 %v12723_v5, %s11601_s12  ;;  %6273 = vrot.lane.b32.xlu0 %v12723_v5, %s11600_s13 }
0x315d   :  { %6437 = vrot.lane.b32.xlu0 %v12723_v5, %s11599_s22 }
0x31cb   :  { %v6274_v33 = vpop.permute.xlu0 %6273  ;;  %v6440_v51 = vpop.permute.xlu1 %6439 }
0x31cc   :  { %9869 = vmatpush3.xpose.msk.msra.mxu0 %vm703_vm1, %v6274_v33 }
0x31cd   :  { %9878 = vmatprep.subr.mxu0 %v11613_v3 }
0x31cf   :  { %9871 = vmatmul.mubr.msk.f32.vlgmr.msra.gmra.mrb[52].mxu0 %vm703_vm1, %v12723_v5  ;;  %v6438_v52 = vpop.permute.xlu0 %6437 }
0x31d0   :  { %9879 = vmatpush3.xpose.msk.msra.mxu0 %vm703_vm1, %v6440_v51  ;;  %9880 = vmatprep.mubr.msk.f32.mxu0 %vm11612_vm10, %v11613_v3 }
0x31d1   :  { %9888 = vmatprep.subr.mxu0 %v11613_v3 }
0x31d3   :  { %9881 = vmatmul.mubr.msk.f32.vlgmr.msra.gmra.mrb[54].mxu0 %vm703_vm1, %v6438_v52  ;;  %v6914_v52 = vld [vmem:[%s13106_s3 + $0x10] sm:$0xff] }
0x31d4   :  { %9890 = vmatprep.mubr.msk.f32.mxu0 %vm11612_vm10, %v11613_v3  ;;  %9889 = vmatpush3.msra.mxu0 %v6602_v10 }
0x31d5   :  { %9898 = vmatprep.subr.mxu0 %v11613_v3 }
0x32a2   :  { %v6345_v53 = vpop.f32.mrb[52].mxu0 }
0x32a3   :  { %v6346_v54 = vadd.f32 %v6345_v53, %v12459_v36  ;;  %v9872_v35 = vpop.f32.mrb[53].mxu0 }
0x32a5   :  { %v6349_v55 = vsel %vm703_vm1, %v6346_v54, -inf }
0x32a6   :  { %6350 = vmax.xlane.f32.xlu1 %v6349_v55  ;;  %v6511_v56 = vpop.f32.mrb[54].mxu0 }
0x32a7   :  { %v6512_v57 = vadd.f32 %v6511_v56, %v12459_v36  ;;  %v9882_v14 = vpop.f32.mrb[55].mxu0 }
0x32a9   :  { %v6515_v1 = vsel %vm703_vm1, %v6512_v57, -inf }
0x32aa   :  { %6516 = vmax.xlane.f32.xlu0 %v6515_v1 }
0x3333   :  { %v6351_v58 = vpop.xlane.xlu1 %6350 }
0x3334   :  { %v6352_v60 = vsub.f32 %v6346_v54, %v6351_v58 }
0x3336   :  { %v6353_v9 = vmul.f32 1.442695, %v6352_v60 }
0x3337   :  { %v6517_v62 = vpop.xlane.xlu0 %6516 }
0x3338   :  { %10789 = vpow2.f32 %v6353_v9  ;;  %v6518_v63 = vsub.f32 %v6512_v57, %v6517_v62 }
0x333a   :  { %v6519_v0 = vmul.f32 1.442695, %v6518_v63 }
0x333c   :  { %10791 = vpow2.f32 %v6519_v0 }
0x3342   :  { %v10790_v2 = vpop.eup %10789 }
0x3343   :  { %v6355_v4 = vsel %vm703_vm1, %v10790_v2, 0.0 }
0x3344   :  { %6356 = vadd.xlane.f32.xlu0 %v6355_v4 }
0x3346   :  { %v10792_v6 = vpop.eup %10791 }
0x3347   :  { %v6521_v8 = vsel %vm703_vm1, %v10792_v6, 0.0 }
0x3348   :  { %6522 = vadd.xlane.f32.xlu1 %v6521_v8 }
0x3359   :  { %6526 = vrot.lane.b32.xlu1 %v12723_v5, %s11604_s23  ;;  %s13107_s23 = sld [smem:[#allocation86_spill]] }
0x335a   :  { %6360 = vrot.lane.b32.xlu0 %v12723_v5, %s11606_s29  ;;  %s13108_s29 = sld [smem:[#allocation85_spill]] }
0x335d   :  { %6751 = vrot.lane.b32.xlu1 %v12723_v5, %s11603_s30 }
0x335e   :  { %6749 = vrot.lane.b32.xlu0 %v12723_v5, %s11602_s24 }
0x33d1   :  { %v6357_v11 = vpop.xlane.xlu0 %6356 }
0x33d2   :  { %10793 = vrcp.f32 %v6357_v11 }
0x33d5   :  { %v6523_v12 = vpop.xlane.xlu1 %6522  ;;  %v6361_v15 = vpop.permute.xlu0 %6360 }
0x33d6   :  { %10795 = vrcp.f32 %v6523_v12  ;;  %9874 = vmatpush3.msra.mxu1 %v6361_v15  ;;  %v9071_v12 = vld [vmem:[#allocation11] ss:$0 sm:$0xff] }
0x33d7   :  { %9883 = vmatprep.subr.mxu1 %v11613_v3 }
0x33d9   :  { %v6527_v28 = vpop.permute.xlu1 %6526  ;;  %v6750_v29 = vpop.permute.xlu0 %6749 }
0x33dc   :  { %v10794_v16 = vpop.eup %10793 }
0x33dd   :  { %v6359_v18 = vmul.f32 %v10794_v16, %v10790_v2  ;;  %v6752_v26 = vpop.permute.xlu1 %6751 }
0x33df   :  { %9876 = vmatmul.mubr.msk.f32.vlgmr.msra.gmra.mrb[56].mxu1 %vm703_vm1, %v6359_v18 }
0x33e0   :  { %v10796_v19 = vpop.eup %10795  ;;  %9884 = vmatpush3.msra.mxu1 %v6527_v28  ;;  %9885 = vmatprep.mubr.msk.f32.mxu1 %vm11612_vm10, %v11613_v3 }
0x33e1   :  { %v6525_v22 = vmul.f32 %v10796_v19, %v10792_v6  ;;  %9893 = vmatprep.subr.mxu1 %v11613_v3 }
0x33e3   :  { %9886 = vmatmul.mubr.msk.f32.vlgmr.msra.gmra.mrb[58].mxu1 %vm703_vm1, %v6525_v22  ;;  %v7269_v22 = vld [vmem:[%s13107_s23 + $0x10] sm:$0xff] }
0x33e4   :  { %9895 = vmatprep.mubr.msk.f32.mxu1 %vm11612_vm10, %v11613_v3  ;;  %9894 = vmatpush3.msra.mxu1 %v6436_v23  ;;  %v7270_v23 = vld [vmem:[%s13107_s23 + $0x18] sm:$0xff] }
0x33e5   :  { %9903 = vmatprep.subr.mxu1 %v11613_v3 }
0x34b2   :  { %v6432_v24 = vpop.f32.mrb[56].mxu1 }
0x34b3   :  { %v9877_v25 = vpop.f32.mrb[57].mxu1  ;;  %9896 = vmatmul.mubr.msk.f32.vlgmr.msra.gmra.mrb[60].mxu1 %vm703_vm1, %v6432_v24  ;;  %v10627_v24 = vpack.i.bf16 %v7270_v23, %v7269_v22 }
0x34b4   :  { %9905 = vmatprep.mubr.msk.f32.mxu1 %vm11612_vm10, %v11613_v3 }
0x34b6   :  { %v6598_v47 = vpop.f32.mrb[58].mxu1 }
0x34b7   :  { %v9887_v27 = vpop.f32.mrb[59].mxu1  ;;  %9891 = vmatmul.mubr.msk.f32.vlgmr.msra.gmra.mrb[56].mxu0 %vm703_vm1, %v6598_v47 }
0x34b8   :  { %9899 = vmatpush3.xpose.msk.msra.mxu0 %vm703_vm1, %v6752_v26  ;;  %9900 = vmatprep.mubr.msk.f32.mxu0 %vm11612_vm10, %v11613_v3 }
0x34b9   :  { %9908 = vmatprep.subr.mxu0 %v11613_v3 }
0x34bb   :  { %9901 = vmatmul.mubr.msk.f32.vlgmr.msra.gmra.mrb[58].mxu0 %vm703_vm1, %v6750_v29  ;;  %v7267_v29 = vld [vmem:[%s13107_s23] sm:$0xff] }
0x34bc   :  { %9910 = vmatprep.mubr.msk.f32.mxu0 %vm11612_vm10, %v11613_v3  ;;  %9909 = vmatpush3.msra.mxu0 %v6914_v52 }
0x34bd   :  { %9918 = vmatprep.subr.mxu0 %v11613_v3 }
0x3586   :  { %v6745_v30 = vpop.f32.mrb[60].mxu1 }
0x3587   :  { %v9897_v31 = vpop.f32.mrb[61].mxu1 }
0x358a   :  { %v6672_v34 = vpop.f32.mrb[56].mxu0 }
0x358b   :  { %v6746_v61 = vadd.f32 %v6745_v30, %v6672_v34  ;;  %v9892_v59 = vpop.f32.mrb[57].mxu0  ;;  %v7268_v30 = vld [vmem:[%s13107_s23 + $0x8] sm:$0xff]  ;;  %v10307_v34 = vpack.c.bf16 %v7270_v23, %v7269_v22 }
0x358c   :  { %v10622_v31 = vpack.i.bf16 %v7268_v30, %v7267_v29 }
0x358e   :  { %v6823_v32 = vpop.f32.mrb[58].mxu0 }
0x358f   :  { %v6824_v37 = vadd.f32 %v6823_v32, %v12459_v36  ;;  %v9902_v38 = vpop.f32.mrb[59].mxu0 }
0x3591   :  { %v6827_v41 = vsel %vm703_vm1, %v6824_v37, -inf }
0x3592   :  { %6828 = vmax.xlane.f32.xlu1 %v6827_v41 }
0x35a3   :  { %6991 = vrot.lane.b32.xlu1 %v12723_v5, %s11605_s27 }
0x35a7   :  { %6989 = vrot.lane.b32.xlu1 %v12723_v5, %s11607_s26 }
0x361f   :  { %v6829_v40 = vpop.xlane.xlu1 %6828 }
0x3620   :  { %v6830_v42 = vsub.f32 %v6824_v37, %v6829_v40 }
0x3622   :  { %v6831_v43 = vmul.f32 1.442695, %v6830_v42 }
0x3623   :  { %v6992_v50 = vpop.permute.xlu1 %6991 }
0x3624   :  { %10797 = vpow2.f32 %v6831_v43 }
0x3627   :  { %v6990_v51 = vpop.permute.xlu1 %6989 }
0x362e   :  { %v10798_v44 = vpop.eup %10797 }
0x362f   :  { %v6833_v39 = vsel %vm703_vm1, %v10798_v44, 0.0 }
0x3630   :  { %6834 = vadd.xlane.f32.xlu0 %v6833_v39 }
0x3646   :  { %6838 = vrot.lane.b32.xlu0 %v12723_v5, %s11608_s21  ;;  %s13109_s21 = sld [smem:[#allocation91_spill]] }
0x36bd   :  { %v6835_v45 = vpop.xlane.xlu0 %6834 }
0x36be   :  { %10799 = vrcp.f32 %v6835_v45 }
0x36c1   :  { %v6839_v48 = vpop.permute.xlu0 %6838 }
0x36c2   :  { %9904 = vmatpush3.msra.mxu1 %v6839_v48 }
0x36c3   :  { %9913 = vmatprep.subr.mxu1 %v11613_v3 }
0x36c8   :  { %v10800_v49 = vpop.eup %10799 }
0x36c9   :  { %v6837_v33 = vmul.f32 %v10800_v49, %v10798_v44  ;;  %v9072_v49 = vld [vmem:[#allocation2] ss:$0 sm:$0xff] }
0x36cb   :  { %9906 = vmatmul.mubr.msk.f32.vlgmr.msra.gmra.mrb[62].mxu1 %vm703_vm1, %v6837_v33  ;;  %v9073_v33 = vld [vmem:[%s13109_s21] ss:$0 sm:$0xff] }
0x36cc   :  { %9914 = vmatpush3.xpose.msk.msra.mxu1 %vm703_vm1, %v6992_v50  ;;  %9915 = vmatprep.mubr.msk.f32.mxu1 %vm11612_vm10, %v11613_v3 }
0x36cd   :  { %9923 = vmatprep.subr.mxu1 %v11613_v3 }
0x36cf   :  { %9916 = vmatmul.mubr.msk.f32.vlgmr.msra.gmra.mrb[64].mxu1 %vm703_vm1, %v6990_v51 }
0x36d0   :  { %9925 = vmatprep.mubr.msk.f32.mxu1 %vm11612_vm10, %v11613_v3 }
0x379e   :  { %v6910_v53 = vpop.f32.mrb[62].mxu1 }
0x379f   :  { %v9907_v54 = vpop.f32.mrb[63].mxu1  ;;  %9911 = vmatmul.mubr.msk.f32.vlgmr.msra.gmra.mrb[60].mxu0 %vm703_vm1, %v6910_v53 }
0x37a0   :  { %9920 = vmatprep.mubr.msk.f32.mxu0 %vm11612_vm10, %v11613_v3 }
0x37a2   :  { %v7063_v35 = vpop.f32.mrb[64].mxu1 }
0x37a3   :  { %v7064_v55 = vadd.f32 %v7063_v35, %v12459_v36  ;;  %v9917_v56 = vpop.f32.mrb[65].mxu1  ;;  %v7154_v36 = vld [vmem:[%s13106_s3 + $0x18] sm:$0xff] }
0x37a4   :  { %9924 = vmatpush3.msra.mxu1 %v7154_v36 }
0x37a5   :  { %v7067_v57 = vsel %vm703_vm1, %v7064_v55, -inf }
0x37a6   :  { %7068 = vmax.xlane.f32.xlu0 %v7067_v57 }
0x37bc   :  { %7078 = vrot.lane.b32.xlu0 %v12723_v5, %s11609_s0 }
0x37c0   :  { %10628 = vrot.lane.b32.xlu0 %v10627_v24, %s11600_s13 }
0x3833   :  { %v7069_v14 = vpop.xlane.xlu0 %7068 }
0x3834   :  { %v7070_v1 = vsub.f32 %v7064_v55, %v7069_v14 }
0x3836   :  { %v7071_v58 = vmul.f32 1.442695, %v7070_v1 }
0x3837   :  { %v7079_v60 = vpop.permute.xlu0 %7078 }
0x3838   :  { %10801 = vpow2.f32 %v7071_v58  ;;  %9919 = vmatpush3.msra.mxu0 %v7079_v60 }
0x3839   :  { %10303 = vmatprep.subr.bf16.mxu0 %v11611_v7 }
0x383b   :  { %v10629_v32 = vpop.permute.xlu0 %10628 }
0x383c   :  { %v10631_v41 = vunpack.i.h.bf16 %v10629_v32  ;;  %v10630_v40 = vunpack.i.l.bf16 %v10629_v32 }
0x383e   :  { %v10313_v45 = vpack.c.bf16 %v10631_v41, %v10630_v40 }
0x3842   :  { %v10802_v9 = vpop.eup %10801 }
0x3843   :  { %v7073_v62 = vsel %vm703_vm1, %v10802_v9, 0.0 }
0x3844   :  { %7074 = vadd.xlane.f32.xlu1 %v7073_v62 }
0x3872   :  { %v6984_v63 = vpop.f32.mrb[60].mxu0 }
0x3873   :  { %v6988_v0 = vadd.f32 %v6984_v63, %v6746_v61  ;;  %v9912_v2 = vpop.f32.mrb[61].mxu0  ;;  %v9074_v61 = vld [vmem:[%s13108_s29] ss:$0 sm:$0xff] }
0x3874   :  { %7367 = vrot.lane.b32.xlu0 %v9074_v61, %s11600_s13 }
0x38d1   :  { %v7075_v4 = vpop.xlane.xlu1 %7074 }
0x38d2   :  { %10803 = vrcp.f32 %v7075_v4 }
0x38dc   :  { %v10804_v5 = vpop.eup %10803 }
0x38dd   :  { %v7077_v6 = vmul.f32 %v10804_v5, %v10802_v9 }
0x38df   :  { %9921 = vmatmul.mubr.msk.f32.vlgmr.msra.gmra.mrb[62].mxu0 %vm703_vm1, %v7077_v6 }
0x38e0   :  { %9936 = vmatprep.mubr.msk.f32.mxu0 %vm11612_vm10, %v11613_v3 }
0x38e6   :  { %v7368_v53 = vpop.permute.xlu0 %7367 }
0x39b2   :  { %v7150_v8 = vpop.f32.mrb[62].mxu0 }
0x39b3   :  { %v9922_v10 = vpop.f32.mrb[63].mxu0  ;;  %9926 = vmatmul.mubr.msk.f32.vlgmr.msra.gmra.mrb[66].mxu1 %vm703_vm1, %v7150_v8 }
0x39b4   :  { %9947 = vmatprep.mubr.msk.f32.mxu1 %vm615_vm0, %v12557_v20 }
0x3a86   :  { %v7224_v11 = vpop.f32.mrb[66].mxu1 }
0x3a87   :  { %v7228_v15 = vadd.f32 %v7224_v11, %v6988_v0  ;;  %v9927_v16 = vpop.f32.mrb[67].mxu1 }
0x3a89   :  { %v7236_v18 = vadd.f32 %v9071_v12, %v7228_v15 }
0x3a8b   :  { %v7237_v28 = vadd.f32 %v7236_v18, %v12717_v46  ;;  %v10304_v46 = vpack.c.bf16 %v7268_v30, %v7267_v29 }
0x3a8d   :  { %v7240_v19 = vsel %vm615_vm0, %v7237_v28, 0.0  ;;  %10305 = vmatpush3.bf16.msra.mxu0 %v10304_v46 }
0x3a8e   :  { %7241 = vadd.xlane.f32.xlu1 %v7240_v19  ;;  %10306 = vmatprep.subr.bf16.mxu0 %v11611_v7 }
0x3a91   :  { %10308 = vmatpush3.bf16.msra.mxu0 %v10307_v34 }
0x3a92   :  { %10317 = vmatprep.subr.bf16.mxu0 %v11611_v7 }
0x3b1b   :  { %v7242_v25 = vpop.xlane.xlu1 %7241 }
0x3b1c   :  { %v7243_v20 = vmul.f32 0.03125, %v7242_v25 }
0x3b1e   :  { %v7244_v47 = vsub.f32 %v7237_v28, %v7243_v20 }
0x3b20   :  { %v7245_v26 = vmul.f32 %v7244_v47, %v7244_v47 }
0x3b22   :  { %v7246_v27 = vsel %vm615_vm0, %v7245_v26, 0.0 }
0x3b23   :  { %7247 = vadd.xlane.f32.xlu1 %v7246_v27 }
0x3b34   :  { %10623 = vrot.lane.b32.xlu1 %v10622_v31, %s11600_s13 }
0x3bb0   :  { %v7248_v59 = vpop.xlane.xlu1 %7247 }
0x3bb1   :  { %v7249_v37 = vmul.f32 0.03125, %v7248_v59 }
0x3bb3   :  { %v7250_v38 = vadd.f32 1e-05, %v7249_v37 }
0x3bb4   :  { %v10624_v42 = vpop.permute.xlu1 %10623 }
0x3bb5   :  { %10805 = vrsqrt.f32 %v7250_v38  ;;  %v10626_v43 = vunpack.i.h.bf16 %v10624_v42  ;;  %v10625_v44 = vunpack.i.l.bf16 %v10624_v42 }
0x3bb7   :  { %v10309_v39 = vpack.c.bf16 %v10626_v43, %v10625_v44 }
0x3bb9   :  { %10310 = vmatprep.subr.bf16.mxu1 %v10309_v39 }
0x3bba   :  { %10312 = vmatpush3.bf16.msra.mxu1 %v10309_v39 }
0x3bbb   :  { %10314 = vmatprep.subr.bf16.mxu1 %v10313_v45 }
0x3bbe   :  { %10316 = vmatpush3.bf16.msra.mxu1 %v10313_v45 }
0x3bbf   :  { %v10806_v48 = vpop.eup %10805  ;;  %10321 = vmatprep.subr.bf16.mxu1 %v11611_v7 }
0x3bc0   :  { %v7252_v50 = vmul.f32 %v10806_v48, %v7244_v47 }
0x3bc1   :  { %9948 = vmatmul.mubr.msk.f32.vlgmr.msra.gmra.mrb[68].mxu1 %vm615_vm0, %v12562_v21 }
0x3bc2   :  { %v7259_v51 = vmul.f32 %v9072_v49, %v7252_v50  ;;  %9961 = vmatprep.mubr.msk.f32.mxu1 %vm11612_vm10, %v11613_v3 }
0x3bc4   :  { %v12834_v52 = vadd.f32 %v9073_v33, %v7259_v51 }
0x3bc6   :  { %9937 = vmatmul.mubr.msk.f32.vlgmr.msra.gmra.mrb[64].mxu0 %vm615_vm0, %v12834_v52 }
0x3bc7   :  { %9954 = vmatprep.mubr.msk.f32.mxu0 %vm11612_vm10, %v11613_v3 }
0x3c94   :  { %v9949_v54 = vpop.f32.mrb[68].mxu1 }
0x3c95   :  { %v7442_v35 = vadd.f32 %v9949_v54, %v7368_v53  ;;  %v7436_v55 = vpop.f32.mrb[69].mxu1 }
0x3c96   :  { %v7437_v56 = vadd.f32 %v7436_v55, %v7368_v53 }
0x3c98   :  { %v10318_v57 = vpack.c.bf16 %v7442_v35, %v7437_v56  ;;  %v12840_v21 = vpack.i.bf16 %v7442_v35, %v7437_v56 }
0x3c99   :  { %v7347_v14 = vpop.f32.mrb[64].mxu0 }
0x3c9a   :  { %v9938_v1 = vpop.f32.mrb[65].mxu0  ;;  %10320 = vmatpush3.bf16.xpose.msk.msra.mxu0 %vm12117_vm2, %v10318_v57  ;;  %v7348_v58 = vadd.f32 %v9074_v61, %v7347_v14 }
0x3c9b   :  { %10329 = vmatprep.subr.bf16.mxu0 %v11611_v7 }
0x3ca1   :  { %9955 = vmatmul.mubr.msk.f32.vlgmr.msra.gmra.mrb[66].mxu0 %vm703_vm1, %v7348_v58 }
0x3ca2   :  { %9975 = vmatprep.mubr.msk.f32.mxu0 %vm11612_vm10, %v11613_v3 }
0x3d74   :  { %v7520_v60 = vpop.f32.mrb[66].mxu0 }
0x3d75   :  { %v9956_v9 = vpop.f32.mrb[67].mxu0  ;;  %v7524_v62 = vsel %vm787_vm4, %v7520_v60, -inf }
0x3d76   :  { %7525 = vmax.xlane.f32.xlu0 %v7524_v62 }
0x3d8c   :  { %10633 = vrot.lane.b32.xlu0 %v12840_v21, %s11600_s13  ;;  %s13110_s13 = sld [smem:[#allocation84_spill]] }
0x3d90   :  { %7616 = vrot.lane.b32.xlu0 %v7348_v58, %s11599_s22 }
0x3d92   :  { %v7615_v23 = vld [vmem:[%s13110_s13] sm:$0xff]  ;;  %v7789_v43 = vld [vmem:[%s13110_s13 + $0x8] sm:$0xff] }
0x3e03   :  { %v7526_v36 = vpop.xlane.xlu0 %7525 }
0x3e04   :  { %v7527_v63 = vsub.f32 %v7520_v60, %v7526_v36 }
0x3e06   :  { %v7528_v0 = vmul.f32 1.442695, %v7527_v63 }
0x3e07   :  { %v10634_v2 = vpop.permute.xlu0 %10633 }
0x3e08   :  { %10807 = vpow2.f32 %v7528_v0  ;;  %v10636_v4 = vunpack.i.h.bf16 %v10634_v2  ;;  %v10635_v5 = vunpack.i.l.bf16 %v10634_v2 }
0x3e0a   :  { %v10322_v6 = vpack.c.bf16 %v10636_v4, %v10635_v5 }
0x3e0b   :  { %v7617_v22 = vpop.permute.xlu0 %7616 }
0x3e0c   :  { %10324 = vmatpush3.bf16.msk.msra.mxu1 %vm12173_vm7, %v10322_v6 }
0x3e0d   :  { %10325 = vmatprep.subr.bf16.mxu1 %v11611_v7 }
0x3e12   :  { %v10808_v8 = vpop.eup %10807 }
0x3e13   :  { %v7530_v10 = vsel %vm787_vm4, %v10808_v8, 0.0 }
0x3e14   :  { %7531 = vadd.xlane.f32.xlu1 %v7530_v10 }
0x3e25   :  { %10638 = vrot.lane.b32.xlu1 %v12840_v21, %s11599_s22  ;;  %s13111_s22 = sld [smem:[#allocation83_spill]] }
0x3ea1   :  { %v7532_v11 = vpop.xlane.xlu1 %7531 }
0x3ea2   :  { %10809 = vrcp.f32 %v7532_v11 }
0x3ea5   :  { %v10639_v12 = vpop.permute.xlu1 %10638 }
0x3ea6   :  { %v10641_v15 = vunpack.i.h.bf16 %v10639_v12  ;;  %v10640_v16 = vunpack.i.l.bf16 %v10639_v12 }
0x3ea8   :  { %v10326_v19 = vpack.c.bf16 %v10641_v15, %v10640_v16 }
0x3eac   :  { %v10810_v18 = vpop.eup %10809 }
0x3ead   :  { %v7534_v28 = vmul.f32 %v10810_v18, %v10808_v8 }
0x3eaf   :  { %9962 = vmatmul.mubr.msk.f32.vlgmr.msra.gmra.mrb[70].mxu1 %vm787_vm4, %v7534_v28 }
0x3eb0   :  { %10328 = vmatpush3.bf16.xpose.msk.msra.mxu1 %vm12117_vm2, %v10326_v19  ;;  %9968 = vmatprep.mubr.msk.f32.mxu1 %vm11612_vm10, %v11613_v3 }
0x3eb1   :  { %9983 = vmatprep.subr.mxu1 %v11613_v3 }
0x3eb7   :  { %9969 = vmatmul.mubr.msk.f32.vlgmr.msra.gmra.mrb[72].mxu1 %vm703_vm1, %v7617_v22 }
0x3eb8   :  { %9985 = vmatprep.mubr.msk.f32.mxu1 %vm11612_vm10, %v11613_v3  ;;  %9984 = vmatpush3.msra.mxu1 %v7615_v23  ;;  %v8109_v23 = vld [vmem:[%s13110_s13 + $0x10] sm:$0xff] }
0x3eb9   :  { %10337 = vmatprep.subr.bf16.mxu1 %v11611_v7 }
0x3f82   :  { %v7611_v24 = vpop.f32.mrb[70].mxu1 }
0x3f83   :  { %v9963_v25 = vpop.f32.mrb[71].mxu1  ;;  %9986 = vmatmul.mubr.msk.f32.vlgmr.msra.gmra.mrb[74].mxu1 %vm703_vm1, %v7611_v24 }
0x3f84   :  { %9999 = vmatprep.mubr.msk.f32.mxu1 %vm11612_vm10, %v11613_v3 }
0x3f8a   :  { %v7694_v20 = vpop.f32.mrb[72].mxu1 }
0x3f8b   :  { %v9970_v47 = vpop.f32.mrb[73].mxu1  ;;  %v7698_v26 = vsel %vm787_vm4, %v7694_v20, -inf }
0x3f8c   :  { %7699 = vmax.xlane.f32.xlu1 %v7698_v26 }
0x3f9d   :  { %10648 = vrot.lane.b32.xlu1 %v12840_v21, %s11602_s24 }
0x3fa1   :  { %7936 = vrot.lane.b32.xlu1 %v7348_v58, %s11602_s24  ;;  %s13113_s24 = sld [smem:[#allocation90_spill]] }
0x3fa5   :  { %8184 = vrot.lane.b32.xlu1 %v7348_v58, %s11607_s26 }
0x4019   :  { %v7700_v27 = vpop.xlane.xlu1 %7699 }
0x401a   :  { %v7701_v29 = vsub.f32 %v7694_v20, %v7700_v27 }
0x401c   :  { %v7702_v30 = vmul.f32 1.442695, %v7701_v29 }
0x401d   :  { %v10649_v44 = vpop.permute.xlu1 %10648 }
0x401e   :  { %10811 = vpow2.f32 %v7702_v30  ;;  %v10651_v39 = vunpack.i.h.bf16 %v10649_v44  ;;  %v10650_v45 = vunpack.i.l.bf16 %v10649_v44 }
0x4020   :  { %v10334_v48 = vpack.c.bf16 %v10651_v39, %v10650_v45 }
0x4021   :  { %v7937_v54 = vpop.permute.xlu1 %7936 }
0x4025   :  { %v8185_v55 = vpop.permute.xlu1 %8184 }
0x4028   :  { %v10812_v31 = vpop.eup %10811 }
0x4029   :  { %v7704_v46 = vsel %vm787_vm4, %v10812_v31, 0.0 }
0x402a   :  { %7705 = vadd.xlane.f32.xlu0 %v7704_v46 }
0x4040   :  { %10643 = vrot.lane.b32.xlu0 %v12840_v21, %s11601_s12  ;;  %s13112_s12 = sld [smem:[#allocation88_spill]] }
0x4044   :  { %10653 = vrot.lane.b32.xlu0 %v12840_v21, %s11607_s26 }
0x4056   :  { %v7932_v34 = vpop.f32.mrb[74].mxu1 }
0x4057   :  { %v9987_v61 = vpop.f32.mrb[75].mxu1 }
0x40b7   :  { %v7706_v59 = vpop.xlane.xlu0 %7705 }
0x40b8   :  { %10813 = vrcp.f32 %v7706_v59 }
0x40bb   :  { %v10644_v32 = vpop.permute.xlu0 %10643 }
0x40bc   :  { %v10646_v37 = vunpack.i.h.bf16 %v10644_v32  ;;  %v10645_v38 = vunpack.i.l.bf16 %v10644_v32 }
0x40be   :  { %v10330_v41 = vpack.c.bf16 %v10646_v37, %v10645_v38  ;;  %v9102_v37 = vld [vmem:[%s13111_s22] ss:$0 sm:$0xff] }
0x40bf   :  { %v10654_v50 = vpop.permute.xlu0 %10653 }
0x40c0   :  { %10332 = vmatpush3.bf16.msk.msra.mxu0 %vm12173_vm7, %v10330_v41  ;;  %v10656_v51 = vunpack.i.h.bf16 %v10654_v50  ;;  %v10655_v53 = vunpack.i.l.bf16 %v10654_v50  ;;  %v8470_v50 = vld [vmem:[%s13112_s12] sm:$0xff] }
0x40c1   :  { %9978 = vmatprep.subr.mxu0 %v11613_v3 }
0x40c2   :  { %v10814_v40 = vpop.eup %10813  ;;  %v10342_v35 = vpack.c.bf16 %v10656_v51, %v10655_v53  ;;  %v8473_v53 = vld [vmem:[%s13112_s12 + $0x18] sm:$0xff] }
0x40c3   :  { %v7708_v42 = vmul.f32 %v10814_v40, %v10812_v31  ;;  %v8357_v31 = vld [vmem:[%s13110_s13 + $0x18] sm:$0xff] }
0x40c5   :  { %9976 = vmatmul.mubr.msk.f32.vlgmr.msra.gmra.mrb[68].mxu0 %vm787_vm4, %v7708_v42 }
0x40c6   :  { %9979 = vmatpush3.msra.mxu0 %v7789_v43  ;;  %9980 = vmatprep.mubr.msk.f32.mxu0 %vm11612_vm10, %v11613_v3 }
0x40c7   :  { %10333 = vmatprep.subr.bf16.mxu0 %v11611_v7 }
0x4198   :  { %v7785_v49 = vpop.f32.mrb[68].mxu0 }
0x4199   :  { %v9977_v33 = vpop.f32.mrb[69].mxu0  ;;  %9981 = vmatmul.mubr.msk.f32.vlgmr.msra.gmra.mrb[70].mxu0 %vm703_vm1, %v7785_v49 }
0x419a   :  { %10336 = vmatpush3.bf16.xpose.msk.msra.mxu0 %vm12117_vm2, %v10334_v48  ;;  %9992 = vmatprep.mubr.msk.f32.mxu0 %vm11612_vm10, %v11613_v3  ;;  %v8471_v33 = vld [vmem:[%s13112_s12 + $0x8] sm:$0xff] }
0x419b   :  { %10341 = vmatprep.subr.bf16.mxu0 %v11611_v7  ;;  %v10350_v51 = vpack.c.bf16 %v8471_v33, %v8470_v50 }
0x41a1   :  { %9993 = vmatmul.mubr.msk.f32.vlgmr.msra.gmra.mrb[72].mxu0 %vm703_vm1, %v7937_v54 }
0x41a2   :  { %10344 = vmatpush3.bf16.xpose.msk.msra.mxu0 %vm12117_vm2, %v10342_v35  ;;  %10011 = vmatprep.mubr.msk.f32.mxu0 %vm11612_vm10, %v11613_v3  ;;  %v8555_v35 = vld [vmem:[%s13113_s24] sm:$0xff] }
0x41a3   :  { %10349 = vmatprep.subr.bf16.mxu0 %v11611_v7 }
0x41a9   :  { %10012 = vmatmul.mubr.msk.f32.vlgmr.msra.gmra.mrb[74].mxu0 %vm703_vm1, %v8185_v55  ;;  %v8556_v55 = vld [vmem:[%s13113_s24 + $0x8] sm:$0xff] }
0x41aa   :  { %10034 = vmatprep.mubr.msk.f32.mxu0 %vm11612_vm10, %v11613_v3  ;;  %10351 = vmatpush3.bf16.msra.mxu0 %v10350_v51 }
0x41ab   :  { %10352 = vmatprep.subr.bf16.mxu0 %v11611_v7 }
0x426c   :  { %v7859_v56 = vpop.f32.mrb[70].mxu0 }
0x426d   :  { %v7933_v57 = vadd.f32 %v7932_v34, %v7859_v56  ;;  %v9982_v14 = vpop.f32.mrb[71].mxu0  ;;  %v8557_v56 = vld [vmem:[%s13113_s24 + $0x10] sm:$0xff] }
0x426e   :  { %v8558_v14 = vld [vmem:[%s13113_s24 + $0x18] sm:$0xff] }
0x4274   :  { %v8014_v1 = vpop.f32.mrb[72].mxu0 }
0x4275   :  { %v9994_v58 = vpop.f32.mrb[73].mxu0  ;;  %v8018_v60 = vsel %vm787_vm4, %v8014_v1, -inf }
0x4276   :  { %8019 = vmax.xlane.f32.xlu0 %v8018_v60  ;;  %v8559_v58 = vld [vmem:[%s13113_s24 + $0x20] sm:$0xff]  ;;  %v8560_v60 = vld [vmem:[%s13113_s24 + $0x28] sm:$0xff] }
0x427c   :  { %v8262_v17 = vpop.f32.mrb[74].mxu0 }
0x427d   :  { %v10013_v9 = vpop.f32.mrb[75].mxu0  ;;  %v8266_v10 = vsel %vm787_vm4, %v8262_v17, -inf }
0x428c   :  { %10658 = vrot.lane.b32.xlu0 %v12840_v21, %s11603_s30  ;;  %s13114_s30 = sld [smem:[#allocation87_spill]] }
0x4303   :  { %v8020_v62 = vpop.xlane.xlu0 %8019 }
0x4304   :  { %v8021_v36 = vsub.f32 %v8014_v1, %v8020_v62  ;;  %v10359_v1 = vpack.c.bf16 %v8558_v14, %v8557_v56  ;;  %v9113_v14 = vld [vmem:[#allocation44] ss:$0 sm:$0xff] }
0x4306   :  { %v8022_v63 = vmul.f32 1.442695, %v8021_v36 }
0x4307   :  { %v10659_v0 = vpop.permute.xlu0 %10658 }
0x4308   :  { %10815 = vpow2.f32 %v8022_v63  ;;  %v10661_v2 = vunpack.i.h.bf16 %v10659_v0  ;;  %v10660_v4 = vunpack.i.l.bf16 %v10659_v0  ;;  %v9103_v0 = vld [vmem:[#allocation7] ss:$0 sm:$0xff] }
0x430a   :  { %v10338_v5 = vpack.c.bf16 %v10661_v2, %v10660_v4  ;;  %v9104_v4 = vld [vmem:[#allocation5] ss:$0 sm:$0xff] }
0x430c   :  { %10340 = vmatpush3.bf16.msk.msra.mxu1 %vm12173_vm7, %v10338_v5 }
0x430d   :  { %10002 = vmatprep.subr.mxu1 %v11613_v3 }
0x4312   :  { %v10816_v6 = vpop.eup %10815 }
0x4313   :  { %v8024_v8 = vsel %vm787_vm4, %v10816_v6, 0.0 }
0x4314   :  { %8025 = vadd.xlane.f32.xlu1 %v8024_v8  ;;  %v8561_v8 = vld [vmem:[%s13113_s24 + $0x30] sm:$0xff] }
0x4318   :  { %8267 = vmax.xlane.f32.xlu1 %v8266_v10  ;;  %v8562_v10 = vld [vmem:[%s13113_s24 + $0x38] sm:$0xff] }
0x43a1   :  { %v8026_v11 = vpop.xlane.xlu1 %8025 }
0x43a2   :  { %10817 = vrcp.f32 %v8026_v11  ;;  %v10365_v11 = vpack.c.bf16 %v8562_v10, %v8561_v8 }
0x43a5   :  { %v8268_v12 = vpop.xlane.xlu1 %8267 }
0x43a6   :  { %v8269_v15 = vsub.f32 %v8262_v17, %v8268_v12  ;;  %v10362_v17 = vpack.c.bf16 %v8560_v60, %v8559_v58  ;;  %v9105_v12 = vld [vmem:[%s13114_s30] ss:$0 sm:$0xff] }
0x43a8   :  { %v8270_v16 = vmul.f32 1.442695, %v8269_v15 }
0x43aa   :  { %10819 = vpow2.f32 %v8270_v16 }
0x43ac   :  { %v10818_v18 = vpop.eup %10817 }
0x43ad   :  { %v8028_v28 = vmul.f32 %v10818_v18, %v10816_v6 }
0x43af   :  { %10000 = vmatmul.mubr.msk.f32.vlgmr.msra.gmra.mrb[76].mxu1 %vm787_vm4, %v8028_v28 }
0x43b0   :  { %10004 = vmatprep.mubr.msk.f32.mxu1 %vm11612_vm10, %v11613_v3  ;;  %10003 = vmatpush3.msra.mxu1 %v8109_v23 }
0x43b1   :  { %10345 = vmatprep.subr.bf16.mxu1 %v11611_v7 }
0x43b4   :  { %v10820_v19 = vpop.eup %10819 }
0x43b5   :  { %v8272_v22 = vsel %vm787_vm4, %v10820_v19, 0.0 }
0x43b6   :  { %8273 = vadd.xlane.f32.xlu1 %v8272_v22 }
0x43c7   :  { %10663 = vrot.lane.b32.xlu1 %v12840_v21, %s11605_s27  ;;  %s13115_s27 = sld [smem:[#allocation89_spill]] }
0x4443   :  { %v8274_v24 = vpop.xlane.xlu1 %8273 }
0x4444   :  { %10821 = vrcp.f32 %v8274_v24 }
0x4447   :  { %v10664_v25 = vpop.permute.xlu1 %10663 }
0x4448   :  { %v10666_v20 = vunpack.i.h.bf16 %v10664_v25  ;;  %v10665_v47 = vunpack.i.l.bf16 %v10664_v25 }
0x444a   :  { %v10346_v27 = vpack.c.bf16 %v10666_v20, %v10665_v47 }
0x444e   :  { %v10822_v26 = vpop.eup %10821 }
0x444f   :  { %v8276_v21 = vmul.f32 %v10822_v26, %v10820_v19  ;;  %v9107_v19 = vld [vmem:[%s13115_s27] ss:$0 sm:$0xff] }
0x4482   :  { %v8105_v29 = vpop.f32.mrb[76].mxu1 }
0x4483   :  { %v10001_v30 = vpop.f32.mrb[77].mxu1  ;;  %10005 = vmatmul.mubr.msk.f32.vlgmr.msra.gmra.mrb[78].mxu1 %vm703_vm1, %v8105_v29 }
0x4484   :  { %10348 = vmatpush3.bf16.msk.msra.mxu1 %vm12173_vm7, %v10346_v27  ;;  %10018 = vmatprep.mubr.msk.f32.mxu1 %vm11612_vm10, %v11613_v3 }
0x4485   :  { %10021 = vmatprep.subr.mxu1 %v11613_v3 }
0x4487   :  { %10019 = vmatmul.mubr.msk.f32.vlgmr.msra.gmra.mrb[80].mxu1 %vm787_vm4, %v8276_v21 }
0x4488   :  { %10023 = vmatprep.mubr.msk.f32.mxu1 %vm11612_vm10, %v11613_v3  ;;  %10022 = vmatpush3.msra.mxu1 %v8357_v31 }
0x4489   :  { %10355 = vmatprep.subr.bf16.mxu1 %v11611_v7 }
0x4556   :  { %v8179_v46 = vpop.f32.mrb[78].mxu1 }
0x4557   :  { %v8183_v34 = vadd.f32 %v8179_v46, %v7933_v57  ;;  %v10006_v13 = vpop.f32.mrb[79].mxu1  ;;  %v10356_v57 = vpack.c.bf16 %v8556_v55, %v8555_v35  ;;  %v9112_v55 = vld [vmem:[#allocation14] ss:$0 sm:$0xff] }
0x455a   :  { %v8353_v61 = vpop.f32.mrb[80].mxu1 }
0x455b   :  { %v10020_v59 = vpop.f32.mrb[81].mxu1  ;;  %10024 = vmatmul.mubr.msk.f32.vlgmr.msra.gmra.mrb[82].mxu1 %vm703_vm1, %v8353_v61  ;;  %v9110_v61 = vld [vmem:[#allocation8] ss:$0 sm:$0xff] }
0x455c   :  { %10053 = vmatprep.mubr.msk.f32.mxu1 %vm11612_vm10, %v11613_v3  ;;  %10357 = vmatpush3.bf16.msra.mxu1 %v10356_v57 }
0x455d   :  { %10358 = vmatprep.subr.bf16.mxu1 %v11611_v7 }
0x4560   :  { %10360 = vmatpush3.bf16.msra.mxu1 %v10359_v1 }
0x4561   :  { %10361 = vmatprep.subr.bf16.mxu1 %v11611_v7 }
0x4564   :  { %10363 = vmatpush3.bf16.msra.mxu1 %v10362_v17 }
0x4565   :  { %10364 = vmatprep.subr.bf16.mxu1 %v11611_v7 }
0x4568   :  { %10366 = vmatpush3.bf16.msra.mxu1 %v10365_v11 }
0x462e   :  { %v8427_v32 = vpop.f32.mrb[82].mxu1 }
0x462f   :  { %v8431_v38 = vadd.f32 %v8427_v32, %v8183_v34  ;;  %v10025_v41 = vpop.f32.mrb[83].mxu1  ;;  %v9109_v34 = vld [vmem:[#allocation10] ss:$0 sm:$0xff] }
0x4631   :  { %v8439_v40 = vadd.f32 %v9102_v37, %v8431_v38 }
0x4633   :  { %v8440_v42 = vadd.f32 %v8439_v40, %v12834_v52  ;;  %v8472_v52 = vld [vmem:[%s13112_s12 + $0x10] sm:$0xff] }
0x4634   :  { %v10353_v54 = vpack.c.bf16 %v8473_v53, %v8472_v52 }
0x4635   :  { %v8443_v43 = vsel %vm615_vm0, %v8440_v42, 0.0 }
0x4636   :  { %8444 = vadd.xlane.f32.xlu0 %v8443_v43  ;;  %10354 = vmatpush3.bf16.msra.mxu0 %v10353_v54  ;;  %v9111_v54 = vld [vmem:[#allocation16] ss:$0 sm:$0xff] }
0x4637   :  { %10367 = vmatprep.subr.bf16.mxu0 %v11611_v7 }
0x46c3   :  { %v8445_v44 = vpop.xlane.xlu0 %8444 }
0x46c4   :  { %v8446_v39 = vmul.f32 0.03125, %v8445_v44  ;;  %v8702_v44 = vld [vmem:[%s11958_s17] sm:$0xff] }
0x46c6   :  { %v8447_v45 = vsub.f32 %v8440_v42, %v8446_v39  ;;  %v8703_v39 = vld [vmem:[%s11958_s17 + $0x8] sm:$0xff] }
0x46c8   :  { %v8448_v48 = vmul.f32 %v8447_v45, %v8447_v45 }
0x46ca   :  { %v8449_v49 = vsel %vm615_vm0, %v8448_v48, 0.0  ;;  %v8704_v48 = vld [vmem:[%s11958_s17 + $0x10] sm:$0xff] }
0x46cb   :  { %8450 = vadd.xlane.f32.xlu1 %v8449_v49  ;;  %v8705_v49 = vld [vmem:[%s11958_s17 + $0x18] sm:$0xff]  ;;  %s11614_s17 = smov [#allocation46]  }
0x46cc   :  { %v10371_v50 = vpack.c.bf16 %v8705_v49, %v8704_v48  ;;  %s8802_s26 = sshll.u32 %s11614_s17, 4  ;;  %s8803_s26 = int_to_ptr.vmem [resolvable:$true] %s8802_s26 }
0x46cd   :  { %s11449_s0 = scalar_lea.vmem %s8803_s26, 128  ;;  %p11454_p1 = scmp.lt.s32.totalorder %s8803_s26, %s8803_s26 }
0x46ce   :  { %p11450_p0 = scmp.ne.s32.totalorder %s8803_s26, %s11449_s0  ;;  %p11455_p2 = scmp.lt.s32.totalorder %s11449_s0, %s11449_s0 }
0x46d0   :  { %p11456_p3 = por %p11455_p2, %p11454_p1 }
0x46d2   :  { %p11457_p4 = pnand %p11456_p3, %p11450_p0 }
0x4758   :  { %v8451_v9 = vpop.xlane.xlu1 %8450 }
0x4759   :  { %v8452_v62 = vmul.f32 0.03125, %v8451_v9 }
0x475b   :  { %v8453_v36 = vadd.f32 1e-05, %v8452_v62 }
0x475d   :  { %10823 = vrsqrt.f32 %v8453_v36 }
0x4767   :  { %v10824_v63 = vpop.eup %10823 }
0x4768   :  { %v8455_v2 = vmul.f32 %v10824_v63, %v8447_v45  ;;  %v10368_v45 = vpack.c.bf16 %v8703_v39, %v8702_v44 }
0x476a   :  { %v8462_v5 = vmul.f32 %v9103_v0, %v8455_v2 }
0x476c   :  { %v8469_v6 = vadd.f32 %v9104_v4, %v8462_v5 }
0x476e   :  { %10035 = vmatmul.mubr.msk.f32.vlgmr.msra.gmra.mrb[76].mxu0 %vm615_vm0, %v8469_v6 }
0x476f   :  { %10064 = vmatprep.mubr.msk.f32.mxu0 %vm11612_vm10, %v11613_v3  ;;  %10369 = vmatpush3.bf16.msra.mxu0 %v10368_v45 }
0x4770   :  { %10370 = vmatprep.subr.bf16.mxu0 %v11611_v7 }
0x4773   :  { %10372 = vmatpush3.bf16.msra.mxu0 %v10371_v50 }
0x4841   :  { %v8550_v15 = vpop.f32.mrb[76].mxu0 }
0x4842   :  { %v8551_v16 = vadd.f32 %v9105_v12, %v8550_v15  ;;  %v10036_v18 = vpop.f32.mrb[77].mxu0 }
0x4844   :  { %v8554_v28 = vmax.f32 %v8551_v16, 0.0 }
0x4846   :  { %10054 = vmatmul.mubr.msk.f32.vlgmr.msra.gmra.mrb[84].mxu1 %vm2001_vm9, %v8554_v28 }
0x4919   :  { %v8639_v22 = vpop.f32.mrb[84].mxu1 }
0x491a   :  { %v8640_v23 = vadd.f32 %v9107_v19, %v8639_v22  ;;  %v10055_v24 = vpop.f32.mrb[85].mxu1 }
0x491c   :  { %v8643_v25 = vadd.f32 %v8640_v23, %v8469_v6 }
0x491e   :  { %v8646_v20 = vsel %vm615_vm0, %v8643_v25, 0.0 }
0x491f   :  { %8647 = vadd.xlane.f32.xlu0 %v8646_v20 }
0x49ac   :  { %v8648_v3 = vpop.xlane.xlu0 %8647 }
0x49ad   :  { %v8649_v47 = vmul.f32 0.03125, %v8648_v3 }
0x49af   :  { %v8650_v26 = vsub.f32 %v8643_v25, %v8649_v47 }
0x49b1   :  { %v8651_v27 = vmul.f32 %v8650_v26, %v8650_v26 }
0x49b3   :  { %v8652_v29 = vsel %vm615_vm0, %v8651_v27, 0.0 }
0x49b4   :  { %8653 = vadd.xlane.f32.xlu0 %v8652_v29 }
0x4a41   :  { %v8654_v30 = vpop.xlane.xlu0 %8653 }
0x4a42   :  { %v8655_v21 = vmul.f32 0.03125, %v8654_v30 }
0x4a44   :  { %v8656_v31 = vadd.f32 1e-05, %v8655_v21 }
0x4a46   :  { %10825 = vrsqrt.f32 %v8656_v31 }
0x4a50   :  { %v10826_v46 = vpop.eup %10825 }
0x4a51   :  { %v8658_v13 = vmul.f32 %v10826_v46, %v8650_v26 }
0x4a53   :  { %v8665_v59 = vmul.f32 %v9109_v34, %v8658_v13 }
0x4a55   :  { %v8672_v32 = vadd.f32 %v9110_v61, %v8665_v59 }
0x4a57   :  { %v8675_v37 = vsel %vm615_vm0, %v8672_v32, 0.0 }
0x4a58   :  { %8676 = vadd.xlane.f32.xlu0 %v8675_v37 }
0x4ae5   :  { %v8677_v38 = vpop.xlane.xlu0 %8676 }
0x4ae6   :  { %v8678_v41 = vmul.f32 0.03125, %v8677_v38 }
0x4ae8   :  { %v8679_v40 = vsub.f32 %v8672_v32, %v8678_v41 }
0x4aea   :  { %v8680_v42 = vmul.f32 %v8679_v40, %v8679_v40 }
0x4aec   :  { %v8681_v43 = vsel %vm615_vm0, %v8680_v42, 0.0 }
0x4aed   :  { %8682 = vadd.xlane.f32.xlu0 %v8681_v43 }
0x4b7a   :  { %v8683_v33 = vpop.xlane.xlu0 %8682 }
0x4b7b   :  { %v8684_v51 = vmul.f32 0.03125, %v8683_v33 }
0x4b7d   :  { %v8685_v52 = vadd.f32 1e-05, %v8684_v51 }
0x4b7f   :  { %10827 = vrsqrt.f32 %v8685_v52 }
0x4b89   :  { %v10828_v53 = vpop.eup %10827 }
0x4b8a   :  { %v8687_v35 = vmul.f32 %v10828_v53, %v8679_v40 }
0x4b8c   :  { %v8694_v56 = vmul.f32 %v9111_v54, %v8687_v35 }
0x4b8e   :  { %v8701_v57 = vadd.f32 %v9112_v55, %v8694_v56 }
0x4b90   :  { %10065 = vmatmul.mubr.msk.f32.vlgmr.msra.gmra.mrb[78].mxu0 %vm615_vm0, %v8701_v57 }
0x4c63   :  { %v8782_v1 = vpop.f32.mrb[78].mxu0 }
0x4c64   :  { %v8783_v58 = vadd.f32 %v9113_v14, %v8782_v1  ;;  %v10066_v60 = vpop.f32.mrb[79].mxu0 }
0x4c66   :  { %8786 = vmax.xlane.f32.xlu1 %v8783_v58 }
0x4cf3   :  { %v8787_v7 = vpop.xlane.xlu1 %8786 }
0x4cf4   :  { %v8788_v17 = vsub.f32 %v8783_v58, %v8787_v7 }
0x4cf6   :  { %v8789_v9 = vmul.f32 1.442695, %v8788_v17 }
0x4cf8   :  { %10829 = vpow2.f32 %v8789_v9 }
0x4d02   :  { %v10830_v62 = vpop.eup %10829 }
0x4d03   :  { %8791 = vadd.xlane.f32.xlu0 %v10830_v62 }
0x4d90   :  { %v8792_v36 = vpop.xlane.xlu0 %8791 }
0x4d91   :  { %10831 = vrcp.f32 %v8792_v36 }
0x4d9b   :  { %v10832_v63 = vpop.eup %10831 }
0x4d9c   :  { %v8794_v0 = vmul.f32 %v10832_v63, %v10830_v62 }
0x4d9e   :  { %8795 = vst [vmem:[#allocation46] sm:$0xff] %v8794_v0 }
0x4d9f   :  { %11460 = shalt.err (!%p11457_p4)
}
0x4da0   :  { %s11461_s20 = scalar_lea.hbm %s11963_s6, 128 }
0x4da1   :  { %p11462_p5 = scmp.ne.s32.totalorder %s11963_s6, %s11461_s20  ;;  %p11465_p6 = scmp.lt.u32.totalorder %s11461_s20, %s11963_s6 }
0x4da3   :  { %p11467_p7 = pnand %p11465_p6, %p11462_p5 }
0x4da5   :  { %11470 = shalt.err (!%p11467_p7)
}
0x4da6   :  { %8805 = dma.vmem_to_hbm [thread:$0]  %s8803_s26, 128, %s11963_s6, [#allocation4]  }
0x4da7   :  { %11501 = dma.done.wait [#allocation4], 128  }
0x4da8   :  { %11502 = vsyncadd [#allocation4], 4294967168 }
0x4da9   :  { %8809 = vsyncpa [#allocation3], 1 }
0x4daa   :  { %8810 = vsyncpa [#allocation6], 1 }
0x4dab   :  { %8811 = vsyncpa [#allocation9], 1 }
0x4dac   :  { %8812 = vsyncpa [#allocation12], 1 }
0x4dad   :  { %8813 = vsyncpa [#allocation15], 1 }
0x4dae   :  { %8814 = vsyncpa [#allocation18], 1 }
0x4daf   :  { %8815 = vsyncpa [#allocation21], 1 }
0x4db0   :  { %8816 = vsyncpa [#allocation24], 1 }
0x4db1   :  { %8817 = vsyncpa [#allocation27], 1 }
0x4db2   :  { %8818 = vsyncpa [#allocation30], 1 }
0x4db3   :  { %8819 = vsyncpa [#allocation33], 1 }
0x4db4   :  { %8820 = vsyncpa [#allocation36], 1 }
0x4db5   :  { %8821 = vsyncpa [#allocation39], 1 }
0x4db6   :  { %8822 = vsyncpa [#allocation42], 1 }
0x4db7   :  { %8823 = vsyncpa [#allocation45], 1 }
0x4db8   :  { %8824 = vsyncpa [#allocation4], 1 }

</bundles_post_ra>
